<compile_context>
chip_gen: v7x
topology: tpu7x:2x2x1
jax: 0.10.0
libtpu: 0.0.40
codegen_flags: <defaults>
</compile_context>

<pallas_src>
import jax
import jax.numpy as jnp
from jax.experimental import pallas as pl
from jax.experimental.pallas import tpu as pltpu


def _round_up(x, m):
    return (x + m - 1) // m * m


def _make_lstm_kernel(T, TC, Hp, need_mask):
    """Kernel factory; T/TC/Hp/need_mask are static Python ints/bools."""

    def kernel(x_ref, c0_ref, h0_ref, w_ref, b_ref,
               hy_ref, c_out_ref, h_out_ref):
        chunk = pl.program_id(0)

        @pl.when(chunk == 0)
        def _():
            c_out_ref[...] = c0_ref[...]
            h_out_ref[...] = h0_ref[...]

        # Static slices of the resident merged weight (no per-step concat).
        wx = w_ref[0:Hp, :]           # (Hp, 4Hp) bf16, x -> gates
        wh = w_ref[Hp:2 * Hp, :]      # (Hp, 4Hp) bf16, h -> gates
        bias = b_ref[...]             # (Bp, 4Hp) f32, pre-broadcast

        t_base = chunk * TC

        def step(i, carry):
            c, h = carry
            # Two accumulated MXU dots; f32 accumulation.
            gates = jnp.dot(x_ref[i], wx, preferred_element_type=jnp.float32)
            gates = gates + jnp.dot(h.astype(jnp.bfloat16), wh,
                                    preferred_element_type=jnp.float32)
            gates = gates + bias
            # Gate slabs are [ i | f | o | g ]; sigmoid slabs were pre-scaled
            # by 0.5 so sigmoid(z) = 0.5*tanh(z/2)+0.5 -> one wide tanh.
            t_all = jnp.tanh(gates)
            i_g = 0.5 * t_all[:, 0 * Hp:1 * Hp] + 0.5
            f_g = 0.5 * t_all[:, 1 * Hp:2 * Hp] + 0.5
            o_g = 0.5 * t_all[:, 2 * Hp:3 * Hp] + 0.5
            g_g = t_all[:, 3 * Hp:4 * Hp]

            c_new = f_g * c + i_g * g_g           # f32 elementwise (v5e-safe)
            h_new = o_g * jnp.tanh(c_new)
            hy_ref[i] = h_new                     # padded-step rows sliced off
            if need_mask:
                valid = (t_base + i) < T          # don't advance state on pad
                c_new = jnp.where(valid, c_new, c)
                h_new = jnp.where(valid, h_new, h)
            return c_new, h_new

        c_fin, h_fin = jax.lax.fori_loop(
            0, TC, step, (c_out_ref[...], h_out_ref[...]), unroll=True)
        c_out_ref[...] = c_fin
        h_out_ref[...] = h_fin

    return kernel


def pack_lstm_params(w_i2h, b_i2h, w_h2h, b_h2h, batch_padded):
    """Merge/reorder/pad PyTorch Linear params into the kernel layout.

    Returns (W, bias):
      W    : (2*Hp, 4*Hp) bf16, rows [0:Hp]=Wx, [Hp:2Hp]=Wh; gate slabs
             reordered to [i, f, o, g]; sigmoid slabs pre-scaled by 0.5.
      bias : (Bp, 4*Hp) f32, pre-broadcast, same reorder/scale.
    Hoist/cache this per parameter set in production (it is pure data prep).
    """
    fourH, H = w_i2h.shape
    assert fourH == 4 * H
    Hp = _round_up(H, 128)
    gate_order = [0, 1, 3, 2]                       # i, f, o, g
    scale = jnp.array([0.5, 0.5, 0.5, 1.0], jnp.float32)

    def pack_w(w):
        wt = jnp.transpose(w).reshape(H, 4, H)      # x @ wt == linear(x)-bias
        wt = wt[:, gate_order, :] * scale[None, :, None]
        wt = jnp.pad(wt, ((0, Hp - H), (0, 0), (0, Hp - H)))
        return wt.reshape(Hp, 4 * Hp)

    W = jnp.concatenate([pack_w(w_i2h), pack_w(w_h2h)], axis=0)
    W = W.astype(jnp.bfloat16)

    b = (b_i2h + b_h2h).reshape(4, H)[gate_order, :] * scale[:, None]
    b = jnp.pad(b, ((0, 0), (0, Hp - H))).reshape(1, 4 * Hp)
    bias = jnp.broadcast_to(b, (batch_padded, 4 * Hp)).astype(jnp.float32)
    return W, bias


def lstm_sequence(x_seq, prev_c, prev_h, w_i2h, b_i2h, w_h2h, b_h2h, *,
                  time_chunk=8):
    """Run the LSTM cell over a sequence with one fused Pallas kernel.

    x_seq        : (T, B, H) f32
    prev_c/prev_h: (B, H)    f32
    w_i2h, w_h2h : (4H, H)   PyTorch nn.Linear weights, gate order [i, f, g, o]
    b_i2h, b_h2h : (4H,)     PyTorch nn.Linear biases
    Returns (hy_all (T,B,H), c_last (B,H), h_last (B,H)).
    """
    T, B, H = x_seq.shape
    Hp = _round_up(H, 128)            # lane-aligned gate slabs
    Bp = _round_up(B, 8)              # sublane alignment
    TC = max(1, int(time_chunk))
    Tp = _round_up(T, TC)
    n_chunks = Tp // TC

    # NOTE: hoist pack_lstm_params and the x padding out of the hot path in
    # production (jit once per parameter set).
    W, bias = pack_lstm_params(w_i2h, b_i2h, w_h2h, b_h2h, Bp)

    # x streamed as bf16; padded rows/lanes are zero and stay inert (padded
    # gate columns have zero weight/bias, padded state lanes stay zero).
    xp = jnp.zeros((Tp, Bp, Hp), jnp.bfloat16)
    xp = xp.at[:T, :B, :H].set(x_seq.astype(jnp.bfloat16))
    cp = jnp.zeros((Bp, Hp), jnp.float32).at[:B, :H].set(prev_c)
    hp = jnp.zeros((Bp, Hp), jnp.float32).at[:B, :H].set(prev_h)

    def resident(shape):
        return pl.BlockSpec(shape, lambda n: tuple(0 for _ in shape))

    cost = pl.CostEstimate(
        flops=2 * Tp * Bp * (2 * Hp) * (4 * Hp),
        transcendentals=5 * Tp * Bp * Hp,
        bytes_accessed=int(W.size * 2 + bias.size * 4 + xp.size * 2
                           + 4 * Bp * Hp * 4 + Tp * Bp * Hp * 4),
    )

    # Rough VMEM need: resident operands + double-buffered streamed blocks.
    vmem_need = (W.size * 2 + bias.size * 4 + 4 * Bp * Hp * 4
                 + 2 * TC * Bp * Hp * 2 + 2 * TC * Bp * Hp * 4)
    vmem_limit = int(min(64 * 1024 * 1024,
                         max(4 * 1024 * 1024, 2 * vmem_need)))

    kernel = _make_lstm_kernel(T, TC, Hp, need_mask=(Tp != T))

    hy_all, c_last, h_last = pl.pallas_call(
        kernel,
        out_shape=(jax.ShapeDtypeStruct((Tp, Bp, Hp), jnp.float32),
                   jax.ShapeDtypeStruct((Bp, Hp), jnp.float32),
                   jax.ShapeDtypeStruct((Bp, Hp), jnp.float32)),
        grid_spec=pltpu.PrefetchScalarGridSpec(
            num_scalar_prefetch=0,
            grid=(n_chunks,),
            in_specs=[
                pl.BlockSpec((TC, Bp, Hp), lambda n: (n, 0, 0)),  # x chunk
                resident((Bp, Hp)),            # prev_c (read at chunk 0)
                resident((Bp, Hp)),            # prev_h (read at chunk 0)
                resident((2 * Hp, 4 * Hp)),    # merged bf16 weight (resident)
                resident((Bp, 4 * Hp)),        # pre-broadcast f32 bias
            ],
            out_specs=[
                pl.BlockSpec((TC, Bp, Hp), lambda n: (n, 0, 0)),  # hy chunk
                resident((Bp, Hp)),            # final c (VMEM carry)
                resident((Bp, Hp)),            # final h (VMEM carry)
            ],
        ),
        compiler_params=pltpu.CompilerParams(
            dimension_semantics=("arbitrary",),    # time axis is a recurrence
            vmem_limit_bytes=vmem_limit),
        cost_estimate=cost,
    )(xp, cp, hp, W, bias)

    # Keep padded layout downstream when possible; slicing here is only for
    # the small-API convenience / test.
    return hy_all[:T, :B, :H], c_last[:B, :H], h_last[:B, :H]


def lstm_cell(x, prev_c, prev_h, w_i2h, b_i2h, w_h2h, b_h2h):
    """Single-step API matching LSTM.forward(x, prev_c, prev_h) -> (cy, hy)."""
    _, c_last, h_last = lstm_sequence(x[None], prev_c, prev_h,
                                      w_i2h, b_i2h, w_h2h, b_h2h, time_chunk=1)
    return c_last, h_last


def _ref_cell(x, c, h, w_i2h, b_i2h, w_h2h, b_h2h):
    """Plain-JAX f32 reference of the PyTorch forward (gate order i, f, g, o)."""
    H = x.shape[1]
    gates = x @ w_i2h.T + b_i2h + h @ w_h2h.T + b_h2h
    ig = jax.nn.sigmoid(gates[:, 0 * H:1 * H])
    fg = jax.nn.sigmoid(gates[:, 1 * H:2 * H])
    gg = jnp.tanh(gates[:, 2 * H:3 * H])
    og = jax.nn.sigmoid(gates[:, 3 * H:4 * H])
    c_new = fg * c + ig * gg
    h_new = og * jnp.tanh(c_new)
    return c_new, h_new


if __name__ == "__main__":
    # Small shapes consistent with the module (production uses H = d_rnn_size
    # = 300, not a multiple of 128 -> the Hp padding path is exercised anyway).
    # T=20 with time_chunk=8 exercises multi-chunk + masked partial last chunk.
    T, B, H = 20, 8, 32
    init_w = 0.08  # opt.init_weight

    key = jax.random.PRNGKey(0)
    keys = jax.random.split(key, 7)

    x_seq = jax.random.normal(keys[0], (T, B, H), dtype=jnp.float32)
    prev_c = jax.random.normal(keys[1], (B, H), dtype=jnp.float32)
    prev_h = jax.random.normal(keys[2], (B, H), dtype=jnp.float32)

    # PyTorch nn.Linear(hidden, 4*hidden): weight (4H, H), bias (4H,).
    w_i2h = jax.random.uniform(keys[3], (4 * H, H), jnp.float32, -init_w, init_w)
    b_i2h = jax.random.uniform(keys[4], (4 * H,), jnp.float32, -init_w, init_w)
    w_h2h = jax.random.uniform(keys[5], (4 * H, H), jnp.float32, -init_w, init_w)
    b_h2h = jax.random.uniform(keys[6], (4 * H,), jnp.float32, -init_w, init_w)

    # ---- fused time-chunked sequence kernel -----------------------------
    hy_all, c_last, h_last = lstm_sequence(x_seq, prev_c, prev_h,
                                           w_i2h, b_i2h, w_h2h, b_h2h,
                                           time_chunk=8)
    jax.block_until_ready((hy_all, c_last, h_last))

    # ---- single-step API (module-faithful semantics) --------------------
    cy1, hy1 = lstm_cell(x_seq[0], prev_c, prev_h,
                         w_i2h, b_i2h, w_h2h, b_h2h)
    jax.block_until_ready((cy1, hy1))

    # ---- plain-JAX f32 reference (loose tol: bf16 MXU operands) ---------
    c_ref, h_ref = prev_c, prev_h
    hy_ref_all = []
    for t in range(T):
        c_ref, h_ref = _ref_cell(x_seq[t], c_ref, h_ref,
                                 w_i2h, b_i2h, w_h2h, b_h2h)
        hy_ref_all.append(h_ref)
    hy_ref_all = jnp.stack(hy_ref_all)
    c0_ref, h0_ref = _ref_cell(x_seq[0], prev_c, prev_h,
                               w_i2h, b_i2h, w_h2h, b_h2h)

    atol = 3e-2  # bf16 MXU operands vs f32 reference
    assert jnp.allclose(hy_all, hy_ref_all, atol=atol), "sequence hy mismatch"
    assert jnp.allclose(c_last, c_ref, atol=atol), "final c mismatch"
    assert jnp.allclose(h_last, h_ref, atol=atol), "final h mismatch"
    assert jnp.allclose(cy1, c0_ref, atol=atol), "single-step cy mismatch"
    assert jnp.allclose(hy1, h0_ref, atol=atol), "single-step hy mismatch"

    print("KERNEL_OK")
</pallas_src>

<mosaic_0001>
module attributes {stable_mosaic.version = 11 : i64} {
  func.func @kernel(%arg0: i32, %arg1: memref<8x8x128xbf16, #tpu.memory_space<vmem>>, %arg2: memref<8x128xf32, #tpu.memory_space<vmem>>, %arg3: memref<8x128xf32, #tpu.memory_space<vmem>>, %arg4: memref<256x512xbf16, #tpu.memory_space<vmem>>, %arg5: memref<8x512xf32, #tpu.memory_space<vmem>>, %arg6: memref<8x8x128xf32, #tpu.memory_space<vmem>>, %arg7: memref<8x128xf32, #tpu.memory_space<vmem>>, %arg8: memref<8x128xf32, #tpu.memory_space<vmem>>) attributes {dimension_semantics = [#tpu.dimension_semantics<arbitrary>], iteration_bounds = array<i64: 3>, scalar_prefetch = 0 : i64, scratch_operands = 0 : i64, tpu.core_type = #tpu.core_type<tc>, window_params = [{transform_indices = @transform_0, window_bounds = array<i64: 8, 8, 128>}, {pipeline_mode = #tpu.pipeline_mode<synchronous>, transform_indices = @transform_1, window_bounds = array<i64: 8, 128>}, {pipeline_mode = #tpu.pipeline_mode<synchronous>, transform_indices = @transform_2, window_bounds = array<i64: 8, 128>}, {pipeline_mode = #tpu.pipeline_mode<synchronous>, transform_indices = @transform_3, window_bounds = array<i64: 256, 512>}, {pipeline_mode = #tpu.pipeline_mode<synchronous>, transform_indices = @transform_4, window_bounds = array<i64: 8, 512>}, {transform_indices = @transform_5, window_bounds = array<i64: 8, 8, 128>}, {pipeline_mode = #tpu.pipeline_mode<synchronous>, transform_indices = @transform_6, window_bounds = array<i64: 8, 128>}, {pipeline_mode = #tpu.pipeline_mode<synchronous>, transform_indices = @transform_7, window_bounds = array<i64: 8, 128>}]} {
    %c0_i32 = arith.constant 0 : i32
    %0 = arith.cmpi eq, %arg0, %c0_i32 : i32
    %1 = arith.extui %0 : i1 to i32
    %c0_i32_0 = arith.constant 0 : i32
    %2 = arith.cmpi ne, %1, %c0_i32_0 : i32
    scf.if %2 {
      %c0_117 = arith.constant 0 : index
      %c0_118 = arith.constant 0 : index
      %315 = vector.load %arg2[%c0_117, %c0_118] : memref<8x128xf32, #tpu.memory_space<vmem>>, vector<8x128xf32>
      %c0_119 = arith.constant 0 : index
      %c0_120 = arith.constant 0 : index
      %316 = vector.load %arg7[%c0_119, %c0_120] : memref<8x128xf32, #tpu.memory_space<vmem>>, vector<8x128xf32>
      tpu.vector_store %arg7[%c0_119, %c0_120], %315 {strides = array<i32>} : memref<8x128xf32, #tpu.memory_space<vmem>>, vector<8x128xf32>,
      %c0_121 = arith.constant 0 : index
      %c0_122 = arith.constant 0 : index
      %317 = vector.load %arg3[%c0_121, %c0_122] : memref<8x128xf32, #tpu.memory_space<vmem>>, vector<8x128xf32>
      %c0_123 = arith.constant 0 : index
      %c0_124 = arith.constant 0 : index
      %318 = vector.load %arg8[%c0_123, %c0_124] : memref<8x128xf32, #tpu.memory_space<vmem>>, vector<8x128xf32>
      tpu.vector_store %arg8[%c0_123, %c0_124], %317 {strides = array<i32>} : memref<8x128xf32, #tpu.memory_space<vmem>>, vector<8x128xf32>,
    } else {
    }
    %c0 = arith.constant 0 : index
    %c0_1 = arith.constant 0 : index
    %3 = vector.load %arg4[%c0, %c0_1] : memref<256x512xbf16, #tpu.memory_space<vmem>>, vector<128x512xbf16>
    %c128 = arith.constant 128 : index
    %c0_2 = arith.constant 0 : index
    %4 = vector.load %arg4[%c128, %c0_2] : memref<256x512xbf16, #tpu.memory_space<vmem>>, vector<128x512xbf16>
    %c0_3 = arith.constant 0 : index
    %c0_4 = arith.constant 0 : index
    %5 = vector.load %arg5[%c0_3, %c0_4] : memref<8x512xf32, #tpu.memory_space<vmem>>, vector<8x512xf32>
    %c8_i32 = arith.constant 8 : i32
    %6 = arith.muli %arg0, %c8_i32 : i32
    %c0_5 = arith.constant 0 : index
    %c0_6 = arith.constant 0 : index
    %7 = vector.load %arg7[%c0_5, %c0_6] : memref<8x128xf32, #tpu.memory_space<vmem>>, vector<8x128xf32>
    %c0_7 = arith.constant 0 : index
    %c0_8 = arith.constant 0 : index
    %8 = vector.load %arg8[%c0_7, %c0_8] : memref<8x128xf32, #tpu.memory_space<vmem>>, vector<8x128xf32>
    %c0_i32_9 = arith.constant 0 : i32
    %9 = arith.index_cast %c0_i32_9 : i32 to index
    %c0_10 = arith.constant 0 : index
    %c0_11 = arith.constant 0 : index
    %10 = vector.load %arg1[%9, %c0_10, %c0_11] : memref<8x8x128xbf16, #tpu.memory_space<vmem>>, vector<1x8x128xbf16>
    %11 = vector.shape_cast %10 : vector<1x8x128xbf16> to vector<8x128xbf16>
    %cst = arith.constant dense<0.000000e+00> : vector<8x512xf32>
    %12 = tpu.matmul %11, %3, %cst {dimension_numbers = #tpu.dot_dimension_numbers<[1], [0], [0], [1], [0, 0, 1, 1], [], []>} : vector<8x128xbf16>, vector<128x512xbf16>, vector<8x512xf32> -> vector<8x512xf32>
    %13 = arith.truncf %8 : vector<8x128xf32> to vector<8x128xbf16>
    %cst_12 = arith.constant dense<0.000000e+00> : vector<8x512xf32>
    %14 = tpu.matmul %13, %4, %cst_12 {dimension_numbers = #tpu.dot_dimension_numbers<[1], [0], [0], [1], [0, 0, 1, 1], [], []>} : vector<8x128xbf16>, vector<128x512xbf16>, vector<8x512xf32> -> vector<8x512xf32>
    %15 = arith.addf %12, %14 : vector<8x512xf32>
    %16 = arith.addf %15, %5 : vector<8x512xf32>
    %17 = math.tanh %16 : vector<8x512xf32>
    %18 = vector.extract_strided_slice %17 {offsets = [0, 0], sizes = [8, 128], strides = [1, 1]} : vector<8x512xf32> to vector<8x128xf32>
    %cst_13 = arith.constant 5.000000e-01 : f32
    %19 = vector.broadcast %cst_13 : f32 to vector<8x128xf32>
    %20 = arith.mulf %19, %18 : vector<8x128xf32>
    %cst_14 = arith.constant 5.000000e-01 : f32
    %21 = vector.broadcast %cst_14 : f32 to vector<8x128xf32>
    %22 = arith.addf %20, %21 : vector<8x128xf32>
    %23 = vector.extract_strided_slice %17 {offsets = [0, 128], sizes = [8, 128], strides = [1, 1]} : vector<8x512xf32> to vector<8x128xf32>
    %cst_15 = arith.constant 5.000000e-01 : f32
    %24 = vector.broadcast %cst_15 : f32 to vector<8x128xf32>
    %25 = arith.mulf %24, %23 : vector<8x128xf32>
    %cst_16 = arith.constant 5.000000e-01 : f32
    %26 = vector.broadcast %cst_16 : f32 to vector<8x128xf32>
    %27 = arith.addf %25, %26 : vector<8x128xf32>
    %28 = vector.extract_strided_slice %17 {offsets = [0, 256], sizes = [8, 128], strides = [1, 1]} : vector<8x512xf32> to vector<8x128xf32>
    %cst_17 = arith.constant 5.000000e-01 : f32
    %29 = vector.broadcast %cst_17 : f32 to vector<8x128xf32>
    %30 = arith.mulf %29, %28 : vector<8x128xf32>
    %cst_18 = arith.constant 5.000000e-01 : f32
    %31 = vector.broadcast %cst_18 : f32 to vector<8x128xf32>
    %32 = arith.addf %30, %31 : vector<8x128xf32>
    %33 = vector.extract_strided_slice %17 {offsets = [0, 384], sizes = [8, 128], strides = [1, 1]} : vector<8x512xf32> to vector<8x128xf32>
    %34 = arith.mulf %27, %7 : vector<8x128xf32>
    %35 = arith.mulf %22, %33 : vector<8x128xf32>
    %36 = arith.addf %34, %35 : vector<8x128xf32>
    %37 = math.tanh %36 : vector<8x128xf32>
    %38 = arith.mulf %32, %37 : vector<8x128xf32>
    %39 = arith.index_cast %c0_i32_9 : i32 to index
    %c0_19 = arith.constant 0 : index
    %c0_20 = arith.constant 0 : index
    %40 = vector.load %arg6[%39, %c0_19, %c0_20] : memref<8x8x128xf32, #tpu.memory_space<vmem>>, vector<1x8x128xf32>
    %41 = vector.shape_cast %40 : vector<1x8x128xf32> to vector<8x128xf32>
    %42 = vector.shape_cast %38 : vector<8x128xf32> to vector<1x8x128xf32>
    tpu.vector_store %arg6[%39, %c0_19, %c0_20], %42 {strides = array<i32>} : memref<8x8x128xf32, #tpu.memory_space<vmem>>, vector<1x8x128xf32>,
    %43 = arith.addi %6, %c0_i32_9 : i32
    %c20_i32 = arith.constant 20 : i32
    %44 = arith.cmpi slt, %43, %c20_i32 : i32
    %45 = arith.select %44, %36, %7 : vector<8x128xf32>
    %46 = arith.select %44, %38, %8 : vector<8x128xf32>
    %c1_i32 = arith.constant 1 : i32
    %47 = arith.index_cast %c1_i32 : i32 to index
    %c0_21 = arith.constant 0 : index
    %c0_22 = arith.constant 0 : index
    %48 = vector.load %arg1[%47, %c0_21, %c0_22] : memref<8x8x128xbf16, #tpu.memory_space<vmem>>, vector<1x8x128xbf16>
    %49 = vector.shape_cast %48 : vector<1x8x128xbf16> to vector<8x128xbf16>
    %cst_23 = arith.constant dense<0.000000e+00> : vector<8x512xf32>
    %50 = tpu.matmul %49, %3, %cst_23 {dimension_numbers = #tpu.dot_dimension_numbers<[1], [0], [0], [1], [0, 0, 1, 1], [], []>} : vector<8x128xbf16>, vector<128x512xbf16>, vector<8x512xf32> -> vector<8x512xf32>
    %51 = arith.truncf %46 : vector<8x128xf32> to vector<8x128xbf16>
    %cst_24 = arith.constant dense<0.000000e+00> : vector<8x512xf32>
    %52 = tpu.matmul %51, %4, %cst_24 {dimension_numbers = #tpu.dot_dimension_numbers<[1], [0], [0], [1], [0, 0, 1, 1], [], []>} : vector<8x128xbf16>, vector<128x512xbf16>, vector<8x512xf32> -> vector<8x512xf32>
    %53 = arith.addf %50, %52 : vector<8x512xf32>
    %54 = arith.addf %53, %5 : vector<8x512xf32>
    %55 = math.tanh %54 : vector<8x512xf32>
    %56 = vector.extract_strided_slice %55 {offsets = [0, 0], sizes = [8, 128], strides = [1, 1]} : vector<8x512xf32> to vector<8x128xf32>
    %cst_25 = arith.constant 5.000000e-01 : f32
    %57 = vector.broadcast %cst_25 : f32 to vector<8x128xf32>
    %58 = arith.mulf %57, %56 : vector<8x128xf32>
    %cst_26 = arith.constant 5.000000e-01 : f32
    %59 = vector.broadcast %cst_26 : f32 to vector<8x128xf32>
    %60 = arith.addf %58, %59 : vector<8x128xf32>
    %61 = vector.extract_strided_slice %55 {offsets = [0, 128], sizes = [8, 128], strides = [1, 1]} : vector<8x512xf32> to vector<8x128xf32>
    %cst_27 = arith.constant 5.000000e-01 : f32
    %62 = vector.broadcast %cst_27 : f32 to vector<8x128xf32>
    %63 = arith.mulf %62, %61 : vector<8x128xf32>
    %cst_28 = arith.constant 5.000000e-01 : f32
    %64 = vector.broadcast %cst_28 : f32 to vector<8x128xf32>
    %65 = arith.addf %63, %64 : vector<8x128xf32>
    %66 = vector.extract_strided_slice %55 {offsets = [0, 256], sizes = [8, 128], strides = [1, 1]} : vector<8x512xf32> to vector<8x128xf32>
    %cst_29 = arith.constant 5.000000e-01 : f32
    %67 = vector.broadcast %cst_29 : f32 to vector<8x128xf32>
    %68 = arith.mulf %67, %66 : vector<8x128xf32>
    %cst_30 = arith.constant 5.000000e-01 : f32
    %69 = vector.broadcast %cst_30 : f32 to vector<8x128xf32>
    %70 = arith.addf %68, %69 : vector<8x128xf32>
    %71 = vector.extract_strided_slice %55 {offsets = [0, 384], sizes = [8, 128], strides = [1, 1]} : vector<8x512xf32> to vector<8x128xf32>
    %72 = arith.mulf %65, %45 : vector<8x128xf32>
    %73 = arith.mulf %60, %71 : vector<8x128xf32>
    %74 = arith.addf %72, %73 : vector<8x128xf32>
    %75 = math.tanh %74 : vector<8x128xf32>
    %76 = arith.mulf %70, %75 : vector<8x128xf32>
    %77 = arith.index_cast %c1_i32 : i32 to index
    %c0_31 = arith.constant 0 : index
    %c0_32 = arith.constant 0 : index
    %78 = vector.load %arg6[%77, %c0_31, %c0_32] : memref<8x8x128xf32, #tpu.memory_space<vmem>>, vector<1x8x128xf32>
    %79 = vector.shape_cast %78 : vector<1x8x128xf32> to vector<8x128xf32>
    %80 = vector.shape_cast %76 : vector<8x128xf32> to vector<1x8x128xf32>
    tpu.vector_store %arg6[%77, %c0_31, %c0_32], %80 {strides = array<i32>} : memref<8x8x128xf32, #tpu.memory_space<vmem>>, vector<1x8x128xf32>,
    %81 = arith.addi %6, %c1_i32 : i32
    %c20_i32_33 = arith.constant 20 : i32
    %82 = arith.cmpi slt, %81, %c20_i32_33 : i32
    %83 = arith.select %82, %74, %45 : vector<8x128xf32>
    %84 = arith.select %82, %76, %46 : vector<8x128xf32>
    %c2_i32 = arith.constant 2 : i32
    %85 = arith.index_cast %c2_i32 : i32 to index
    %c0_34 = arith.constant 0 : index
    %c0_35 = arith.constant 0 : index
    %86 = vector.load %arg1[%85, %c0_34, %c0_35] : memref<8x8x128xbf16, #tpu.memory_space<vmem>>, vector<1x8x128xbf16>
    %87 = vector.shape_cast %86 : vector<1x8x128xbf16> to vector<8x128xbf16>
    %cst_36 = arith.constant dense<0.000000e+00> : vector<8x512xf32>
    %88 = tpu.matmul %87, %3, %cst_36 {dimension_numbers = #tpu.dot_dimension_numbers<[1], [0], [0], [1], [0, 0, 1, 1], [], []>} : vector<8x128xbf16>, vector<128x512xbf16>, vector<8x512xf32> -> vector<8x512xf32>
    %89 = arith.truncf %84 : vector<8x128xf32> to vector<8x128xbf16>
    %cst_37 = arith.constant dense<0.000000e+00> : vector<8x512xf32>
    %90 = tpu.matmul %89, %4, %cst_37 {dimension_numbers = #tpu.dot_dimension_numbers<[1], [0], [0], [1], [0, 0, 1, 1], [], []>} : vector<8x128xbf16>, vector<128x512xbf16>, vector<8x512xf32> -> vector<8x512xf32>
    %91 = arith.addf %88, %90 : vector<8x512xf32>
    %92 = arith.addf %91, %5 : vector<8x512xf32>
    %93 = math.tanh %92 : vector<8x512xf32>
    %94 = vector.extract_strided_slice %93 {offsets = [0, 0], sizes = [8, 128], strides = [1, 1]} : vector<8x512xf32> to vector<8x128xf32>
    %cst_38 = arith.constant 5.000000e-01 : f32
    %95 = vector.broadcast %cst_38 : f32 to vector<8x128xf32>
    %96 = arith.mulf %95, %94 : vector<8x128xf32>
    %cst_39 = arith.constant 5.000000e-01 : f32
    %97 = vector.broadcast %cst_39 : f32 to vector<8x128xf32>
    %98 = arith.addf %96, %97 : vector<8x128xf32>
    %99 = vector.extract_strided_slice %93 {offsets = [0, 128], sizes = [8, 128], strides = [1, 1]} : vector<8x512xf32> to vector<8x128xf32>
    %cst_40 = arith.constant 5.000000e-01 : f32
    %100 = vector.broadcast %cst_40 : f32 to vector<8x128xf32>
    %101 = arith.mulf %100, %99 : vector<8x128xf32>
    %cst_41 = arith.constant 5.000000e-01 : f32
    %102 = vector.broadcast %cst_41 : f32 to vector<8x128xf32>
    %103 = arith.addf %101, %102 : vector<8x128xf32>
    %104 = vector.extract_strided_slice %93 {offsets = [0, 256], sizes = [8, 128], strides = [1, 1]} : vector<8x512xf32> to vector<8x128xf32>
    %cst_42 = arith.constant 5.000000e-01 : f32
    %105 = vector.broadcast %cst_42 : f32 to vector<8x128xf32>
    %106 = arith.mulf %105, %104 : vector<8x128xf32>
    %cst_43 = arith.constant 5.000000e-01 : f32
    %107 = vector.broadcast %cst_43 : f32 to vector<8x128xf32>
    %108 = arith.addf %106, %107 : vector<8x128xf32>
    %109 = vector.extract_strided_slice %93 {offsets = [0, 384], sizes = [8, 128], strides = [1, 1]} : vector<8x512xf32> to vector<8x128xf32>
    %110 = arith.mulf %103, %83 : vector<8x128xf32>
    %111 = arith.mulf %98, %109 : vector<8x128xf32>
    %112 = arith.addf %110, %111 : vector<8x128xf32>
    %113 = math.tanh %112 : vector<8x128xf32>
    %114 = arith.mulf %108, %113 : vector<8x128xf32>
    %115 = arith.index_cast %c2_i32 : i32 to index
    %c0_44 = arith.constant 0 : index
    %c0_45 = arith.constant 0 : index
    %116 = vector.load %arg6[%115, %c0_44, %c0_45] : memref<8x8x128xf32, #tpu.memory_space<vmem>>, vector<1x8x128xf32>
    %117 = vector.shape_cast %116 : vector<1x8x128xf32> to vector<8x128xf32>
    %118 = vector.shape_cast %114 : vector<8x128xf32> to vector<1x8x128xf32>
    tpu.vector_store %arg6[%115, %c0_44, %c0_45], %118 {strides = array<i32>} : memref<8x8x128xf32, #tpu.memory_space<vmem>>, vector<1x8x128xf32>,
    %119 = arith.addi %6, %c2_i32 : i32
    %c20_i32_46 = arith.constant 20 : i32
    %120 = arith.cmpi slt, %119, %c20_i32_46 : i32
    %121 = arith.select %120, %112, %83 : vector<8x128xf32>
    %122 = arith.select %120, %114, %84 : vector<8x128xf32>
    %c3_i32 = arith.constant 3 : i32
    %123 = arith.index_cast %c3_i32 : i32 to index
    %c0_47 = arith.constant 0 : index
    %c0_48 = arith.constant 0 : index
    %124 = vector.load %arg1[%123, %c0_47, %c0_48] : memref<8x8x128xbf16, #tpu.memory_space<vmem>>, vector<1x8x128xbf16>
    %125 = vector.shape_cast %124 : vector<1x8x128xbf16> to vector<8x128xbf16>
    %cst_49 = arith.constant dense<0.000000e+00> : vector<8x512xf32>
    %126 = tpu.matmul %125, %3, %cst_49 {dimension_numbers = #tpu.dot_dimension_numbers<[1], [0], [0], [1], [0, 0, 1, 1], [], []>} : vector<8x128xbf16>, vector<128x512xbf16>, vector<8x512xf32> -> vector<8x512xf32>
    %127 = arith.truncf %122 : vector<8x128xf32> to vector<8x128xbf16>
    %cst_50 = arith.constant dense<0.000000e+00> : vector<8x512xf32>
    %128 = tpu.matmul %127, %4, %cst_50 {dimension_numbers = #tpu.dot_dimension_numbers<[1], [0], [0], [1], [0, 0, 1, 1], [], []>} : vector<8x128xbf16>, vector<128x512xbf16>, vector<8x512xf32> -> vector<8x512xf32>
    %129 = arith.addf %126, %128 : vector<8x512xf32>
    %130 = arith.addf %129, %5 : vector<8x512xf32>
    %131 = math.tanh %130 : vector<8x512xf32>
    %132 = vector.extract_strided_slice %131 {offsets = [0, 0], sizes = [8, 128], strides = [1, 1]} : vector<8x512xf32> to vector<8x128xf32>
    %cst_51 = arith.constant 5.000000e-01 : f32
    %133 = vector.broadcast %cst_51 : f32 to vector<8x128xf32>
    %134 = arith.mulf %133, %132 : vector<8x128xf32>
    %cst_52 = arith.constant 5.000000e-01 : f32
    %135 = vector.broadcast %cst_52 : f32 to vector<8x128xf32>
    %136 = arith.addf %134, %135 : vector<8x128xf32>
    %137 = vector.extract_strided_slice %131 {offsets = [0, 128], sizes = [8, 128], strides = [1, 1]} : vector<8x512xf32> to vector<8x128xf32>
    %cst_53 = arith.constant 5.000000e-01 : f32
    %138 = vector.broadcast %cst_53 : f32 to vector<8x128xf32>
    %139 = arith.mulf %138, %137 : vector<8x128xf32>
    %cst_54 = arith.constant 5.000000e-01 : f32
    %140 = vector.broadcast %cst_54 : f32 to vector<8x128xf32>
    %141 = arith.addf %139, %140 : vector<8x128xf32>
    %142 = vector.extract_strided_slice %131 {offsets = [0, 256], sizes = [8, 128], strides = [1, 1]} : vector<8x512xf32> to vector<8x128xf32>
    %cst_55 = arith.constant 5.000000e-01 : f32
    %143 = vector.broadcast %cst_55 : f32 to vector<8x128xf32>
    %144 = arith.mulf %143, %142 : vector<8x128xf32>
    %cst_56 = arith.constant 5.000000e-01 : f32
    %145 = vector.broadcast %cst_56 : f32 to vector<8x128xf32>
    %146 = arith.addf %144, %145 : vector<8x128xf32>
    %147 = vector.extract_strided_slice %131 {offsets = [0, 384], sizes = [8, 128], strides = [1, 1]} : vector<8x512xf32> to vector<8x128xf32>
    %148 = arith.mulf %141, %121 : vector<8x128xf32>
    %149 = arith.mulf %136, %147 : vector<8x128xf32>
    %150 = arith.addf %148, %149 : vector<8x128xf32>
    %151 = math.tanh %150 : vector<8x128xf32>
    %152 = arith.mulf %146, %151 : vector<8x128xf32>
    %153 = arith.index_cast %c3_i32 : i32 to index
    %c0_57 = arith.constant 0 : index
    %c0_58 = arith.constant 0 : index
    %154 = vector.load %arg6[%153, %c0_57, %c0_58] : memref<8x8x128xf32, #tpu.memory_space<vmem>>, vector<1x8x128xf32>
    %155 = vector.shape_cast %154 : vector<1x8x128xf32> to vector<8x128xf32>
    %156 = vector.shape_cast %152 : vector<8x128xf32> to vector<1x8x128xf32>
    tpu.vector_store %arg6[%153, %c0_57, %c0_58], %156 {strides = array<i32>} : memref<8x8x128xf32, #tpu.memory_space<vmem>>, vector<1x8x128xf32>,
    %157 = arith.addi %6, %c3_i32 : i32
    %c20_i32_59 = arith.constant 20 : i32
    %158 = arith.cmpi slt, %157, %c20_i32_59 : i32
    %159 = arith.select %158, %150, %121 : vector<8x128xf32>
    %160 = arith.select %158, %152, %122 : vector<8x128xf32>
    %c4_i32 = arith.constant 4 : i32
    %161 = arith.index_cast %c4_i32 : i32 to index
    %c0_60 = arith.constant 0 : index
    %c0_61 = arith.constant 0 : index
    %162 = vector.load %arg1[%161, %c0_60, %c0_61] : memref<8x8x128xbf16, #tpu.memory_space<vmem>>, vector<1x8x128xbf16>
    %163 = vector.shape_cast %162 : vector<1x8x128xbf16> to vector<8x128xbf16>
    %cst_62 = arith.constant dense<0.000000e+00> : vector<8x512xf32>
    %164 = tpu.matmul %163, %3, %cst_62 {dimension_numbers = #tpu.dot_dimension_numbers<[1], [0], [0], [1], [0, 0, 1, 1], [], []>} : vector<8x128xbf16>, vector<128x512xbf16>, vector<8x512xf32> -> vector<8x512xf32>
    %165 = arith.truncf %160 : vector<8x128xf32> to vector<8x128xbf16>
    %cst_63 = arith.constant dense<0.000000e+00> : vector<8x512xf32>
    %166 = tpu.matmul %165, %4, %cst_63 {dimension_numbers = #tpu.dot_dimension_numbers<[1], [0], [0], [1], [0, 0, 1, 1], [], []>} : vector<8x128xbf16>, vector<128x512xbf16>, vector<8x512xf32> -> vector<8x512xf32>
    %167 = arith.addf %164, %166 : vector<8x512xf32>
    %168 = arith.addf %167, %5 : vector<8x512xf32>
    %169 = math.tanh %168 : vector<8x512xf32>
    %170 = vector.extract_strided_slice %169 {offsets = [0, 0], sizes = [8, 128], strides = [1, 1]} : vector<8x512xf32> to vector<8x128xf32>
    %cst_64 = arith.constant 5.000000e-01 : f32
    %171 = vector.broadcast %cst_64 : f32 to vector<8x128xf32>
    %172 = arith.mulf %171, %170 : vector<8x128xf32>
    %cst_65 = arith.constant 5.000000e-01 : f32
    %173 = vector.broadcast %cst_65 : f32 to vector<8x128xf32>
    %174 = arith.addf %172, %173 : vector<8x128xf32>
    %175 = vector.extract_strided_slice %169 {offsets = [0, 128], sizes = [8, 128], strides = [1, 1]} : vector<8x512xf32> to vector<8x128xf32>
    %cst_66 = arith.constant 5.000000e-01 : f32
    %176 = vector.broadcast %cst_66 : f32 to vector<8x128xf32>
    %177 = arith.mulf %176, %175 : vector<8x128xf32>
    %cst_67 = arith.constant 5.000000e-01 : f32
    %178 = vector.broadcast %cst_67 : f32 to vector<8x128xf32>
    %179 = arith.addf %177, %178 : vector<8x128xf32>
    %180 = vector.extract_strided_slice %169 {offsets = [0, 256], sizes = [8, 128], strides = [1, 1]} : vector<8x512xf32> to vector<8x128xf32>
    %cst_68 = arith.constant 5.000000e-01 : f32
    %181 = vector.broadcast %cst_68 : f32 to vector<8x128xf32>
    %182 = arith.mulf %181, %180 : vector<8x128xf32>
    %cst_69 = arith.constant 5.000000e-01 : f32
    %183 = vector.broadcast %cst_69 : f32 to vector<8x128xf32>
    %184 = arith.addf %182, %183 : vector<8x128xf32>
    %185 = vector.extract_strided_slice %169 {offsets = [0, 384], sizes = [8, 128], strides = [1, 1]} : vector<8x512xf32> to vector<8x128xf32>
    %186 = arith.mulf %179, %159 : vector<8x128xf32>
    %187 = arith.mulf %174, %185 : vector<8x128xf32>
    %188 = arith.addf %186, %187 : vector<8x128xf32>
    %189 = math.tanh %188 : vector<8x128xf32>
    %190 = arith.mulf %184, %189 : vector<8x128xf32>
    %191 = arith.index_cast %c4_i32 : i32 to index
    %c0_70 = arith.constant 0 : index
    %c0_71 = arith.constant 0 : index
    %192 = vector.load %arg6[%191, %c0_70, %c0_71] : memref<8x8x128xf32, #tpu.memory_space<vmem>>, vector<1x8x128xf32>
    %193 = vector.shape_cast %192 : vector<1x8x128xf32> to vector<8x128xf32>
    %194 = vector.shape_cast %190 : vector<8x128xf32> to vector<1x8x128xf32>
    tpu.vector_store %arg6[%191, %c0_70, %c0_71], %194 {strides = array<i32>} : memref<8x8x128xf32, #tpu.memory_space<vmem>>, vector<1x8x128xf32>,
    %195 = arith.addi %6, %c4_i32 : i32
    %c20_i32_72 = arith.constant 20 : i32
    %196 = arith.cmpi slt, %195, %c20_i32_72 : i32
    %197 = arith.select %196, %188, %159 : vector<8x128xf32>
    %198 = arith.select %196, %190, %160 : vector<8x128xf32>
    %c5_i32 = arith.constant 5 : i32
    %199 = arith.index_cast %c5_i32 : i32 to index
    %c0_73 = arith.constant 0 : index
    %c0_74 = arith.constant 0 : index
    %200 = vector.load %arg1[%199, %c0_73, %c0_74] : memref<8x8x128xbf16, #tpu.memory_space<vmem>>, vector<1x8x128xbf16>
    %201 = vector.shape_cast %200 : vector<1x8x128xbf16> to vector<8x128xbf16>
    %cst_75 = arith.constant dense<0.000000e+00> : vector<8x512xf32>
    %202 = tpu.matmul %201, %3, %cst_75 {dimension_numbers = #tpu.dot_dimension_numbers<[1], [0], [0], [1], [0, 0, 1, 1], [], []>} : vector<8x128xbf16>, vector<128x512xbf16>, vector<8x512xf32> -> vector<8x512xf32>
    %203 = arith.truncf %198 : vector<8x128xf32> to vector<8x128xbf16>
    %cst_76 = arith.constant dense<0.000000e+00> : vector<8x512xf32>
    %204 = tpu.matmul %203, %4, %cst_76 {dimension_numbers = #tpu.dot_dimension_numbers<[1], [0], [0], [1], [0, 0, 1, 1], [], []>} : vector<8x128xbf16>, vector<128x512xbf16>, vector<8x512xf32> -> vector<8x512xf32>
    %205 = arith.addf %202, %204 : vector<8x512xf32>
    %206 = arith.addf %205, %5 : vector<8x512xf32>
    %207 = math.tanh %206 : vector<8x512xf32>
    %208 = vector.extract_strided_slice %207 {offsets = [0, 0], sizes = [8, 128], strides = [1, 1]} : vector<8x512xf32> to vector<8x128xf32>
    %cst_77 = arith.constant 5.000000e-01 : f32
    %209 = vector.broadcast %cst_77 : f32 to vector<8x128xf32>
    %210 = arith.mulf %209, %208 : vector<8x128xf32>
    %cst_78 = arith.constant 5.000000e-01 : f32
    %211 = vector.broadcast %cst_78 : f32 to vector<8x128xf32>
    %212 = arith.addf %210, %211 : vector<8x128xf32>
    %213 = vector.extract_strided_slice %207 {offsets = [0, 128], sizes = [8, 128], strides = [1, 1]} : vector<8x512xf32> to vector<8x128xf32>
    %cst_79 = arith.constant 5.000000e-01 : f32
    %214 = vector.broadcast %cst_79 : f32 to vector<8x128xf32>
    %215 = arith.mulf %214, %213 : vector<8x128xf32>
    %cst_80 = arith.constant 5.000000e-01 : f32
    %216 = vector.broadcast %cst_80 : f32 to vector<8x128xf32>
    %217 = arith.addf %215, %216 : vector<8x128xf32>
    %218 = vector.extract_strided_slice %207 {offsets = [0, 256], sizes = [8, 128], strides = [1, 1]} : vector<8x512xf32> to vector<8x128xf32>
    %cst_81 = arith.constant 5.000000e-01 : f32
    %219 = vector.broadcast %cst_81 : f32 to vector<8x128xf32>
    %220 = arith.mulf %219, %218 : vector<8x128xf32>
    %cst_82 = arith.constant 5.000000e-01 : f32
    %221 = vector.broadcast %cst_82 : f32 to vector<8x128xf32>
    %222 = arith.addf %220, %221 : vector<8x128xf32>
    %223 = vector.extract_strided_slice %207 {offsets = [0, 384], sizes = [8, 128], strides = [1, 1]} : vector<8x512xf32> to vector<8x128xf32>
    %224 = arith.mulf %217, %197 : vector<8x128xf32>
    %225 = arith.mulf %212, %223 : vector<8x128xf32>
    %226 = arith.addf %224, %225 : vector<8x128xf32>
    %227 = math.tanh %226 : vector<8x128xf32>
    %228 = arith.mulf %222, %227 : vector<8x128xf32>
    %229 = arith.index_cast %c5_i32 : i32 to index
    %c0_83 = arith.constant 0 : index
    %c0_84 = arith.constant 0 : index
    %230 = vector.load %arg6[%229, %c0_83, %c0_84] : memref<8x8x128xf32, #tpu.memory_space<vmem>>, vector<1x8x128xf32>
    %231 = vector.shape_cast %230 : vector<1x8x128xf32> to vector<8x128xf32>
    %232 = vector.shape_cast %228 : vector<8x128xf32> to vector<1x8x128xf32>
    tpu.vector_store %arg6[%229, %c0_83, %c0_84], %232 {strides = array<i32>} : memref<8x8x128xf32, #tpu.memory_space<vmem>>, vector<1x8x128xf32>,
    %233 = arith.addi %6, %c5_i32 : i32
    %c20_i32_85 = arith.constant 20 : i32
    %234 = arith.cmpi slt, %233, %c20_i32_85 : i32
    %235 = arith.select %234, %226, %197 : vector<8x128xf32>
    %236 = arith.select %234, %228, %198 : vector<8x128xf32>
    %c6_i32 = arith.constant 6 : i32
    %237 = arith.index_cast %c6_i32 : i32 to index
    %c0_86 = arith.constant 0 : index
    %c0_87 = arith.constant 0 : index
    %238 = vector.load %arg1[%237, %c0_86, %c0_87] : memref<8x8x128xbf16, #tpu.memory_space<vmem>>, vector<1x8x128xbf16>
    %239 = vector.shape_cast %238 : vector<1x8x128xbf16> to vector<8x128xbf16>
    %cst_88 = arith.constant dense<0.000000e+00> : vector<8x512xf32>
    %240 = tpu.matmul %239, %3, %cst_88 {dimension_numbers = #tpu.dot_dimension_numbers<[1], [0], [0], [1], [0, 0, 1, 1], [], []>} : vector<8x128xbf16>, vector<128x512xbf16>, vector<8x512xf32> -> vector<8x512xf32>
    %241 = arith.truncf %236 : vector<8x128xf32> to vector<8x128xbf16>
    %cst_89 = arith.constant dense<0.000000e+00> : vector<8x512xf32>
    %242 = tpu.matmul %241, %4, %cst_89 {dimension_numbers = #tpu.dot_dimension_numbers<[1], [0], [0], [1], [0, 0, 1, 1], [], []>} : vector<8x128xbf16>, vector<128x512xbf16>, vector<8x512xf32> -> vector<8x512xf32>
    %243 = arith.addf %240, %242 : vector<8x512xf32>
    %244 = arith.addf %243, %5 : vector<8x512xf32>
    %245 = math.tanh %244 : vector<8x512xf32>
    %246 = vector.extract_strided_slice %245 {offsets = [0, 0], sizes = [8, 128], strides = [1, 1]} : vector<8x512xf32> to vector<8x128xf32>
    %cst_90 = arith.constant 5.000000e-01 : f32
    %247 = vector.broadcast %cst_90 : f32 to vector<8x128xf32>
    %248 = arith.mulf %247, %246 : vector<8x128xf32>
    %cst_91 = arith.constant 5.000000e-01 : f32
    %249 = vector.broadcast %cst_91 : f32 to vector<8x128xf32>
    %250 = arith.addf %248, %249 : vector<8x128xf32>
    %251 = vector.extract_strided_slice %245 {offsets = [0, 128], sizes = [8, 128], strides = [1, 1]} : vector<8x512xf32> to vector<8x128xf32>
    %cst_92 = arith.constant 5.000000e-01 : f32
    %252 = vector.broadcast %cst_92 : f32 to vector<8x128xf32>
    %253 = arith.mulf %252, %251 : vector<8x128xf32>
    %cst_93 = arith.constant 5.000000e-01 : f32
    %254 = vector.broadcast %cst_93 : f32 to vector<8x128xf32>
    %255 = arith.addf %253, %254 : vector<8x128xf32>
    %256 = vector.extract_strided_slice %245 {offsets = [0, 256], sizes = [8, 128], strides = [1, 1]} : vector<8x512xf32> to vector<8x128xf32>
    %cst_94 = arith.constant 5.000000e-01 : f32
    %257 = vector.broadcast %cst_94 : f32 to vector<8x128xf32>
    %258 = arith.mulf %257, %256 : vector<8x128xf32>
    %cst_95 = arith.constant 5.000000e-01 : f32
    %259 = vector.broadcast %cst_95 : f32 to vector<8x128xf32>
    %260 = arith.addf %258, %259 : vector<8x128xf32>
    %261 = vector.extract_strided_slice %245 {offsets = [0, 384], sizes = [8, 128], strides = [1, 1]} : vector<8x512xf32> to vector<8x128xf32>
    %262 = arith.mulf %255, %235 : vector<8x128xf32>
    %263 = arith.mulf %250, %261 : vector<8x128xf32>
    %264 = arith.addf %262, %263 : vector<8x128xf32>
    %265 = math.tanh %264 : vector<8x128xf32>
    %266 = arith.mulf %260, %265 : vector<8x128xf32>
    %267 = arith.index_cast %c6_i32 : i32 to index
    %c0_96 = arith.constant 0 : index
    %c0_97 = arith.constant 0 : index
    %268 = vector.load %arg6[%267, %c0_96, %c0_97] : memref<8x8x128xf32, #tpu.memory_space<vmem>>, vector<1x8x128xf32>
    %269 = vector.shape_cast %268 : vector<1x8x128xf32> to vector<8x128xf32>
    %270 = vector.shape_cast %266 : vector<8x128xf32> to vector<1x8x128xf32>
    tpu.vector_store %arg6[%267, %c0_96, %c0_97], %270 {strides = array<i32>} : memref<8x8x128xf32, #tpu.memory_space<vmem>>, vector<1x8x128xf32>,
    %271 = arith.addi %6, %c6_i32 : i32
    %c20_i32_98 = arith.constant 20 : i32
    %272 = arith.cmpi slt, %271, %c20_i32_98 : i32
    %273 = arith.select %272, %264, %235 : vector<8x128xf32>
    %274 = arith.select %272, %266, %236 : vector<8x128xf32>
    %c7_i32 = arith.constant 7 : i32
    %275 = arith.index_cast %c7_i32 : i32 to index
    %c0_99 = arith.constant 0 : index
    %c0_100 = arith.constant 0 : index
    %276 = vector.load %arg1[%275, %c0_99, %c0_100] : memref<8x8x128xbf16, #tpu.memory_space<vmem>>, vector<1x8x128xbf16>
    %277 = vector.shape_cast %276 : vector<1x8x128xbf16> to vector<8x128xbf16>
    %cst_101 = arith.constant dense<0.000000e+00> : vector<8x512xf32>
    %278 = tpu.matmul %277, %3, %cst_101 {dimension_numbers = #tpu.dot_dimension_numbers<[1], [0], [0], [1], [0, 0, 1, 1], [], []>} : vector<8x128xbf16>, vector<128x512xbf16>, vector<8x512xf32> -> vector<8x512xf32>
    %279 = arith.truncf %274 : vector<8x128xf32> to vector<8x128xbf16>
    %cst_102 = arith.constant dense<0.000000e+00> : vector<8x512xf32>
    %280 = tpu.matmul %279, %4, %cst_102 {dimension_numbers = #tpu.dot_dimension_numbers<[1], [0], [0], [1], [0, 0, 1, 1], [], []>} : vector<8x128xbf16>, vector<128x512xbf16>, vector<8x512xf32> -> vector<8x512xf32>
    %281 = arith.addf %278, %280 : vector<8x512xf32>
    %282 = arith.addf %281, %5 : vector<8x512xf32>
    %283 = math.tanh %282 : vector<8x512xf32>
    %284 = vector.extract_strided_slice %283 {offsets = [0, 0], sizes = [8, 128], strides = [1, 1]} : vector<8x512xf32> to vector<8x128xf32>
    %cst_103 = arith.constant 5.000000e-01 : f32
    %285 = vector.broadcast %cst_103 : f32 to vector<8x128xf32>
    %286 = arith.mulf %285, %284 : vector<8x128xf32>
    %cst_104 = arith.constant 5.000000e-01 : f32
    %287 = vector.broadcast %cst_104 : f32 to vector<8x128xf32>
    %288 = arith.addf %286, %287 : vector<8x128xf32>
    %289 = vector.extract_strided_slice %283 {offsets = [0, 128], sizes = [8, 128], strides = [1, 1]} : vector<8x512xf32> to vector<8x128xf32>
    %cst_105 = arith.constant 5.000000e-01 : f32
    %290 = vector.broadcast %cst_105 : f32 to vector<8x128xf32>
    %291 = arith.mulf %290, %289 : vector<8x128xf32>
    %cst_106 = arith.constant 5.000000e-01 : f32
    %292 = vector.broadcast %cst_106 : f32 to vector<8x128xf32>
    %293 = arith.addf %291, %292 : vector<8x128xf32>
    %294 = vector.extract_strided_slice %283 {offsets = [0, 256], sizes = [8, 128], strides = [1, 1]} : vector<8x512xf32> to vector<8x128xf32>
    %cst_107 = arith.constant 5.000000e-01 : f32
    %295 = vector.broadcast %cst_107 : f32 to vector<8x128xf32>
    %296 = arith.mulf %295, %294 : vector<8x128xf32>
    %cst_108 = arith.constant 5.000000e-01 : f32
    %297 = vector.broadcast %cst_108 : f32 to vector<8x128xf32>
    %298 = arith.addf %296, %297 : vector<8x128xf32>
    %299 = vector.extract_strided_slice %283 {offsets = [0, 384], sizes = [8, 128], strides = [1, 1]} : vector<8x512xf32> to vector<8x128xf32>
    %300 = arith.mulf %293, %273 : vector<8x128xf32>
    %301 = arith.mulf %288, %299 : vector<8x128xf32>
    %302 = arith.addf %300, %301 : vector<8x128xf32>
    %303 = math.tanh %302 : vector<8x128xf32>
    %304 = arith.mulf %298, %303 : vector<8x128xf32>
    %305 = arith.index_cast %c7_i32 : i32 to index
    %c0_109 = arith.constant 0 : index
    %c0_110 = arith.constant 0 : index
    %306 = vector.load %arg6[%305, %c0_109, %c0_110] : memref<8x8x128xf32, #tpu.memory_space<vmem>>, vector<1x8x128xf32>
    %307 = vector.shape_cast %306 : vector<1x8x128xf32> to vector<8x128xf32>
    %308 = vector.shape_cast %304 : vector<8x128xf32> to vector<1x8x128xf32>
    tpu.vector_store %arg6[%305, %c0_109, %c0_110], %308 {strides = array<i32>} : memref<8x8x128xf32, #tpu.memory_space<vmem>>, vector<1x8x128xf32>,
    %309 = arith.addi %6, %c7_i32 : i32
    %c20_i32_111 = arith.constant 20 : i32
    %310 = arith.cmpi slt, %309, %c20_i32_111 : i32
    %311 = arith.select %310, %302, %273 : vector<8x128xf32>
    %312 = arith.select %310, %304, %274 : vector<8x128xf32>
    %c8_i32_112 = arith.constant 8 : i32
    %c0_113 = arith.constant 0 : index
    %c0_114 = arith.constant 0 : index
    %313 = vector.load %arg7[%c0_113, %c0_114] : memref<8x128xf32, #tpu.memory_space<vmem>>, vector<8x128xf32>
    tpu.vector_store %arg7[%c0_113, %c0_114], %311 {strides = array<i32>} : memref<8x128xf32, #tpu.memory_space<vmem>>, vector<8x128xf32>,
    %c0_115 = arith.constant 0 : index
    %c0_116 = arith.constant 0 : index
    %314 = vector.load %arg8[%c0_115, %c0_116] : memref<8x128xf32, #tpu.memory_space<vmem>>, vector<8x128xf32>
    tpu.vector_store %arg8[%c0_115, %c0_116], %312 {strides = array<i32>} : memref<8x128xf32, #tpu.memory_space<vmem>>, vector<8x128xf32>,
    return
  }
  func.func @transform_0(%arg0: i32) -> (i32, i32, i32) {
    %c0_i32 = arith.constant 0 : i32
    %c0_i32_0 = arith.constant 0 : i32
    %c0_i32_1 = arith.constant 0 : i32
    return %arg0, %c0_i32, %c0_i32_0 : i32, i32, i32
  }
  func.func @transform_1(%arg0: i32) -> (i32, i32) {
    %c0_i32 = arith.constant 0 : i32
    %c0_i32_0 = arith.constant 0 : i32
    %c0_i32_1 = arith.constant 0 : i32
    return %c0_i32, %c0_i32_0 : i32, i32
  }
  func.func @transform_2(%arg0: i32) -> (i32, i32) {
    %c0_i32 = arith.constant 0 : i32
    %c0_i32_0 = arith.constant 0 : i32
    %c0_i32_1 = arith.constant 0 : i32
    return %c0_i32, %c0_i32_0 : i32, i32
  }
  func.func @transform_3(%arg0: i32) -> (i32, i32) {
    %c0_i32 = arith.constant 0 : i32
    %c0_i32_0 = arith.constant 0 : i32
    %c0_i32_1 = arith.constant 0 : i32
    return %c0_i32, %c0_i32_0 : i32, i32
  }
  func.func @transform_4(%arg0: i32) -> (i32, i32) {
    %c0_i32 = arith.constant 0 : i32
    %c0_i32_0 = arith.constant 0 : i32
    %c0_i32_1 = arith.constant 0 : i32
    return %c0_i32, %c0_i32_0 : i32, i32
  }
  func.func @transform_5(%arg0: i32) -> (i32, i32, i32) {
    %c0_i32 = arith.constant 0 : i32
    %c0_i32_0 = arith.constant 0 : i32
    %c0_i32_1 = arith.constant 0 : i32
    return %arg0, %c0_i32, %c0_i32_0 : i32, i32, i32
  }
  func.func @transform_6(%arg0: i32) -> (i32, i32) {
    %c0_i32 = arith.constant 0 : i32
    %c0_i32_0 = arith.constant 0 : i32
    %c0_i32_1 = arith.constant 0 : i32
    return %c0_i32, %c0_i32_0 : i32, i32
  }
  func.func @transform_7(%arg0: i32) -> (i32, i32) {
    %c0_i32 = arith.constant 0 : i32
    %c0_i32_0 = arith.constant 0 : i32
    %c0_i32_1 = arith.constant 0 : i32
    return %c0_i32, %c0_i32_0 : i32, i32
  }
}

</mosaic_0001>

<bundles_post_ra>
// kernel: tpu_custom_call.1
= control target key start
LH: loop header
LB: loop body
LE: loop exit
PB: predicated region body
PF: predicated region fallthrough
CT: control target
= control target key end

     0   :  { %13 = vsyncpa [#allocation3], 0  ;;  %s4532_s0 = inlined_call_operand.hbm [shape: bf16[24,8,128], index: 0, kind: input, shape index: {}]   ;;  %s4533_s1 = inlined_call_operand.hbm [shape: f32[8,128], index: 1, kind: input, shape index: {}]   ;;  %s4534_s2 = inlined_call_operand.hbm [shape: f32[8,128], index: 2, kind: input, shape index: {}]   ;;  %s4535_s3 = inlined_call_operand.hbm [shape: bf16[256,512], index: 3, kind: input, shape index: {}]   ;;  %s4536_s4 = inlined_call_operand.hbm [shape: f32[8,512], index: 4, kind: input, shape index: {}]   ;;  %s4537_s5 = inlined_call_operand.hbm [shape: f32[24,8,128], index: 5, kind: output, shape index: {0}]   ;;  %s4538_s6 = inlined_call_operand.hbm [shape: f32[8,128], index: 6, kind: output, shape index: {1}]   ;;  %s4539_s7 = inlined_call_operand.hbm [shape: f32[8,128], index: 7, kind: output, shape index: {2}]  }
   0x1   :  { %15 = vsyncpa [#allocation3 + $0x1], 0 }
   0x2   :  { %16 = vsyncpa [#allocation6], 0 }
   0x3   :  { %17 = vsyncpa [#allocation9], 0 }
   0x4   :  { %18 = vsyncpa [#allocation4], 0 }
   0x5   :  { %20 = vsyncpa [#allocation4 + $0x1], 0 }
   0x6   :  { %21 = vsyncpa [#allocation13], 0  ;;  %s3263_s24 = smov 0   ;;  %s3265_s25 = smov 0  }
   0x7   :  { %s3267_s26 = smov 0   ;;  %s3269_s27 = smov 0  }
   0x8 LB: > { %s3284_s28 = sadd.s32 4294967295, %s3206_s27   ;;  %s2474_s29 = sadd.s32 4294967294, %s3206_s27   ;;  %s3206_s27 = sphi %s3269_s27, %s4846_s27   ;;  %s3202_s26 = sphi %s3267_s26, %s4845_s26   ;;  %s3198_s25 = sphi %s3265_s25, %s4844_s25   ;;  %s3194_s24 = sphi %s3263_s24, %s4843_s24  }
   0x9   : > { %p47_p0 = scmp.ne.s32.totalorder %s3198_s25, %s3194_s24  ;;  %p4540_p1 = scmp.eq.s32.totalorder %s3284_s28, 0 }
   0xa   : > { %p161_p3 = scmp.eq.s32.totalorder %s2474_s29, 2  ;;  %p2475_p5 = scmp.ge.s32.totalorder %s3206_s27, 1 }
   0xb   : > { %p3293_p4 = por %p4540_p1, %p47_p0  ;;  %p210_p7 = scmp.lt.s32.totalorder %s3206_s27, 4 }
   0xc   : > { %p3298_p6 = por %p161_p3, %p47_p0  ;;  %s3208_s10 = smov [#allocation5]  }
   0xd   : > { %s4655_s30 = scalar_select %p3293_p4, 1, 0 }
   0xe   : > { %s4656_s8 = scalar_select %p3298_p6, 1, 0 }
   0xf   : > { %p3304_p9 = pnand %p2475_p5, %p210_p7  ;;  %s223_s11 = sshll.u32 %s3208_s10, 4  ;;  %s224_s11 = int_to_ptr.vmem [resolvable:$true] %s223_s11 }
  0x10   : > { %s3209_s12 = smov [#allocation8]   ;;  %s3210_s15 = smov [#allocation7]  }
  0x11   : > { %s4657_s9 = scalar_select %p3304_p9, 1, 0 }
  0x12   : > { %p2610_p10 = pneg %p3304_p9  ;;  %s244_s13 = sshll.u32 %s3209_s12, 4  ;;  %s3316_s13 = int_to_ptr.vmem [resolvable:$true] %s244_s13 }
  0x13   : > { %s3318_s16 = sshll.u32 %s3210_s15, 4  ;;  %s2934_s19 = scalar_lea.hbm %s4533_s1, 128  ;;  %s235_s16 = int_to_ptr.vmem [resolvable:$true] %s3318_s16 }
  0x14   : > { %p3312_p11 = pnand %p2610_p10, %p4540_p1  ;;  %p2935_p12 = scmp.ne.s32.totalorder %s4533_s1, %s2934_s19 }
  0x15   : > { %p2941_p5 = scmp.lt.u32.totalorder %s2934_s19, %s4533_s1 }
  0x16   : > { %p3328_p13 = pneg %p3312_p11 }
  0x18   : > { %p2937_p0 = pnand %p3328_p13, %p2935_p12 }
  0x1a   : > { %p2938_p3 = pneg %p2937_p0 }
  0x1c   : > { %p2943_p7 = pnand %p2941_p5, %p2938_p3 }
  0x1e   : > { %2946 = shalt.err (!%p2943_p7)
}
  0x1f   : > { %s2947_s10 = scalar_lea.vmem %s224_s11, 128  ;;  %p2955_p2 = scmp.lt.s32.totalorder %s224_s11, %s224_s11 }
  0x20   : > { %p2948_p10 = scmp.ne.s32.totalorder %s224_s11, %s2947_s10  ;;  %p2956_p6 = scmp.lt.s32.totalorder %s2947_s10, %s2947_s10 }
  0x22   : > { %p2950_p8 = pnand %p2948_p10, %p3328_p13  ;;  %p2957_p4 = por %p2956_p6, %p2955_p2 }
  0x24   : > { %p2951_p1 = pneg %p2950_p8 }
  0x26   : > { %p2958_p9 = pnand %p2957_p4, %p2951_p1 }
  0x28   : > { %2961 = shalt.err (!%p2958_p9)
}
  0x29   : > { %2613 = dma.hbm_to_vmem [thread:$0]  (!%p3312_p11), %s4533_s1, 128, %s224_s11, [#allocation6]  }
  0x2a   : > { %s2962_s19 = scalar_lea.hbm %s4535_s3, 8192 }
  0x2b   : > { %p2963_p8 = scmp.ne.s32.totalorder %s4535_s3, %s2962_s19  ;;  %p2969_p1 = scmp.lt.u32.totalorder %s2962_s19, %s4535_s3 }
  0x2d   : > { %p2965_p12 = pnand %p2963_p8, %p3328_p13 }
  0x2f   : > { %p2966_p2 = pneg %p2965_p12 }
  0x31   : > { %p2971_p4 = pnand %p2969_p1, %p2966_p2 }
  0x33   : > { %2974 = shalt.err (!%p2971_p4)
}
  0x34   : > { %s2975_s11 = scalar_lea.vmem %s3316_s13, 8192  ;;  %p2983_p3 = scmp.lt.s32.totalorder %s3316_s13, %s3316_s13 }
  0x35   : > { %p2976_p6 = scmp.ne.s32.totalorder %s3316_s13, %s2975_s11  ;;  %p2984_p5 = scmp.lt.s32.totalorder %s2975_s11, %s2975_s11 }
  0x37   : > { %p2978_p9 = pnand %p2976_p6, %p3328_p13  ;;  %p2985_p7 = por %p2984_p5, %p2983_p3 }
  0x39   : > { %p2979_p0 = pneg %p2978_p9 }
  0x3b   : > { %p2986_p10 = pnand %p2985_p7, %p2979_p0 }
  0x3d   : > { %2989 = shalt.err (!%p2986_p10)
}
  0x3e   : > { %s3211_s10 = smov 256   ;;  %s3212_s12 = smov 16  }
  0x3f   : > { %2619 = dma.hbm_to_vmem [thread:$0]  (!%p3312_p11), %s4535_s3, 8192, %s3316_s13, [#allocation9], %s3211_s10, %s3211_s10, %s3212_s12  }
  0x40   : > { %s2990_s20 = scalar_lea.hbm %s4534_s2, 128 }
  0x41   : > { %p2991_p8 = scmp.ne.s32.totalorder %s4534_s2, %s2990_s20  ;;  %p2997_p1 = scmp.lt.u32.totalorder %s2990_s20, %s4534_s2 }
  0x43   : > { %p2993_p12 = pnand %p2991_p8, %p3328_p13 }
  0x45   : > { %p2994_p2 = pneg %p2993_p12 }
  0x47   : > { %p2999_p4 = pnand %p2997_p1, %p2994_p2 }
  0x49   : > { %3002 = shalt.err (!%p2999_p4)
}
  0x4a   : > { %s3003_s15 = scalar_lea.vmem %s235_s16, 128  ;;  %p3011_p3 = scmp.lt.s32.totalorder %s235_s16, %s235_s16 }
  0x4b   : > { %p3004_p6 = scmp.ne.s32.totalorder %s235_s16, %s3003_s15  ;;  %p3012_p5 = scmp.lt.s32.totalorder %s3003_s15, %s3003_s15 }
  0x4d   : > { %p3006_p9 = pnand %p3004_p6, %p3328_p13  ;;  %p3013_p7 = por %p3012_p5, %p3011_p3 }
  0x4f   : > { %p3007_p0 = pneg %p3006_p9 }
  0x51   : > { %p3014_p10 = pnand %p3013_p7, %p3007_p0 }
  0x53   : > { %3017 = shalt.err (!%p3014_p10)
}
  0x54   : > { %2616 = dma.hbm_to_vmem [thread:$0]  (!%p3312_p11), %s4534_s2, 128, %s235_s16, [#allocation6]  }
  0x55   : > { %s3213_s12 = smov [#allocation10]   ;;  %s3018_s20 = scalar_lea.hbm %s4536_s4, 512 }
  0x56   : > { %s258_s17 = sshll.u32 %s3213_s12, 4  ;;  %p3019_p8 = scmp.ne.s32.totalorder %s4536_s4, %s3018_s20  ;;  %s259_s17 = int_to_ptr.vmem [resolvable:$true] %s258_s17 }
  0x57   : > { %p3025_p1 = scmp.lt.u32.totalorder %s3018_s20, %s4536_s4 }
  0x58   : > { %p3021_p12 = pnand %p3019_p8, %p3328_p13 }
  0x5a   : > { %p3022_p2 = pneg %p3021_p12 }
  0x5c   : > { %p3027_p4 = pnand %p3025_p1, %p3022_p2 }
  0x5e   : > { %3030 = shalt.err (!%p3027_p4)
}
  0x5f   : > { %s3031_s16 = scalar_lea.vmem %s259_s17, 512  ;;  %p3039_p3 = scmp.lt.s32.totalorder %s259_s17, %s259_s17 }
  0x60   : > { %p3032_p6 = scmp.ne.s32.totalorder %s259_s17, %s3031_s16  ;;  %p3040_p5 = scmp.lt.s32.totalorder %s3031_s16, %s3031_s16 }
  0x62   : > { %p3034_p9 = pnand %p3032_p6, %p3328_p13  ;;  %p3041_p7 = por %p3040_p5, %p3039_p3 }
  0x64   : > { %p3035_p0 = pneg %p3034_p9 }
  0x66   : > { %p3042_p10 = pnand %p3041_p7, %p3035_p0 }
  0x68   : > { %3045 = shalt.err (!%p3042_p10)
}
  0x69   : > { %2622 = dma.hbm_to_vmem [thread:$0]  (!%p3312_p11), %s4536_s4, 512, %s259_s17, [#allocation9]  }
  0x6a   : > { %s3405_s22 = sadd.s32 1, %s3206_s27   ;;  %s34_s10 = sadd.s32 1, %s3202_s26 }
  0x6b   : > { %s31_s14 = ssub.s32 %s3206_s27, %s3405_s22  ;;  %p41_p13 = scmp.ne.s32.totalorder %s3202_s26, %s3198_s25 }
  0x6c   : > { %p32_p8 = scmp.eq.s32.totalorder %s31_s14, 0  ;;  %p42_p12 = scmp.eq.s32.totalorder %s3206_s27, 0 }
  0x6d   : > { %p4660_p2 = scmp.eq.s32.totalorder %s3284_s28, 2  ;;  %p2635_p4 = scmp.lt.s32.totalorder %s3206_s27, 3 }
  0x6e   : > { %s3421_s18 = scalar_select %p32_p8, %s3202_s26, %s34_s10  }
  0x6f   : > { %p3415_p1 = por %p4660_p2, %p41_p13  ;;  %p43_p6 = por %p42_p12, %p41_p13 }
  0x70   : > { %s269_s19 = sand.u32 1, %s3202_s26   ;;  %s2580_s17 = sshll.u32 %s3206_s27, 9 }
  0x71   : > { %s2481_s20 = sshll.u32 %s269_s19, 5  ;;  %s3428_s29 = scalar_lea.hbm %s4532_s0, %s2580_s17 }
  0x72   : > { %s273_s11 = scalar_lea.vmem [#allocation2], %s2481_s20  ;;  %p3432_p11 = pnand %p2635_p4, %p43_p6 }
  0x73   : > { %s280_s16 = sshll.u32 %s273_s11, 4  ;;  %s3436_s13 = scalar_lea.sflag [#allocation3], %s269_s19  ;;  %s3430_s16 = int_to_ptr.vmem [resolvable:$true] %s280_s16 }
  0x74   : > { %s3046_s10 = scalar_lea.hbm %s3428_s29, 512  ;;  %p3048_p0 = pneg %p3432_p11 }
  0x75   : > { %p3047_p9 = scmp.ne.s32.totalorder %s3428_s29, %s3046_s10  ;;  %s3051_s17 = scalar_lea.hbm %s4532_s0, 1536 }
  0x76   : > { %p3052_p7 = scmp.lt.u32.totalorder %s3428_s29, %s4532_s0  ;;  %p3053_p10 = scmp.lt.u32.totalorder %s3051_s17, %s3046_s10 }
  0x77   : > { %p3049_p3 = pnand %p3048_p0, %p3047_p9  ;;  %p3055_p8 = scmp.lt.u32.totalorder %s3046_s10, %s3428_s29 }
  0x78   : > { %p3054_p13 = por %p3053_p10, %p3052_p7 }
  0x79   : > { %p3050_p5 = pneg %p3049_p3 }
  0x7a   : > { %p3056_p12 = por %p3055_p8, %p3054_p13 }
  0x7c   : > { %p3057_p2 = pnand %p3056_p12, %p3050_p5 }
  0x7e   : > { %3060 = shalt.err (!%p3057_p2)
}
  0x7f   : > { %s3061_s19 = scalar_lea.vmem %s3430_s16, 512  ;;  %s3214_s11 = smov [#allocation2]  }
  0x80   : > { %p3062_p4 = scmp.ne.s32.totalorder %s3430_s16, %s3061_s19  ;;  %s3066_s14 = sshll.u32 %s3214_s11, 4  ;;  %s3067_s14 = int_to_ptr.vmem [resolvable:$false] %s3066_s14 }
  0x81   : > { %s3068_s20 = scalar_lea.vmem %s3067_s14, 1024  ;;  %p3069_p3 = scmp.lt.s32.totalorder %s3430_s16, %s3067_s14 }
  0x82   : > { %p3064_p6 = pnand %p3062_p4, %p3048_p0  ;;  %p3070_p7 = scmp.lt.s32.totalorder %s3068_s20, %s3061_s19 }
  0x84   : > { %p3065_p9 = pneg %p3064_p6  ;;  %p3071_p10 = por %p3070_p7, %p3069_p3 }
  0x86   : > { %p3072_p13 = pnand %p3071_p10, %p3065_p9 }
  0x88   : > { %3075 = shalt.err (!%p3072_p13)
}
  0x89   : > { %s3215_s10 = smov 64   ;;  %s3216_s17 = smov 4  }
  0x8a   : > { %2626 = dma.hbm_to_vmem [thread:$0]  (!%p3432_p11), %s3428_s29, 512, %s3430_s16, %s3436_s13, %s3215_s10, %s3215_s10, %s3216_s17  }
  0x8b   : > { %p4663_p0 = scmp.ne.s32.totalorder %s4657_s9, 0 }
  0x8d   : > { %292 = sbr.rel (%p4663_p0) target bundleno = 2525 (0x9dd), region = 40 }
  0x94   : > { %s3467_s21 = sand.u32 1, %s3198_s25   ;;  %p4664_p5 = scmp.ne.s32.totalorder %s4655_s30, 0 }
  0x95   : > { %s2485_s23 = sshll.u32 %s3467_s21, 5  ;;  %s295_s19 = scalar_lea.sflag [#allocation3], %s3467_s21 }
  0x96   : > { %s3471_s11 = scalar_lea.vmem [#allocation2], %s2485_s23 }
  0x97   : > { %3173 = dma.done.wait (%p4664_p5), %s295_s19, 512  }
  0x98   : > { %3175 = vsyncadd (%p4664_p5), %s295_s19, 4294966784  ;;  %p4665_p11 = scmp.eq.s32.totalorder %s3284_s28, 0 }
  0x9a   : > { %3177 = dma.done.wait (%p4665_p11), [#allocation6], 256   ;;  %p4666_p8 = pmov %p4665_p11 }
  0x9c   : > { %3179 = vsyncadd (%p4666_p8), [#allocation6], 4294967040  ;;  %p4667_p12 = pmov %p4666_p8 }
  0x9d   : > { %p4668_p2 = pmov %p4666_p8 }
  0x9e   : > { %3181 = dma.done.wait (%p4667_p12), [#allocation9], 8704  }
  0x9f   : > { %3183 = vsyncadd (%p4668_p2), [#allocation9], 4294958592  ;;  %s2490_s9 = sshll.u32 %s3467_s21, 6  ;;  %p4669_p4 = scmp.ne.s32.totalorder %s3284_s28, 0 }
  0xa0   : > { %s3486_s29 = scalar_lea.vmem [#allocation11], %s2490_s9  ;;  %v352_v0 = vld [vmem:[#allocation5] sm:$0xff] (!%p4669_p4)  ;;  %v354_v1 = vld [vmem:[#allocation7] sm:$0xff] (!%p4669_p4) }
  0xa1   : > { %351 = sbr.rel (%p4669_p4) target bundleno = 168 (0xa8), region = 64  ;;  %353 = vst [vmem:[#allocation12] sm:$0xff] (!%p4669_p4), %v352_v0  ;;  %355 = vst [vmem:[#allocation14] sm:$0xff] (!%p4669_p4), %v354_v1 }
  0xa8 PF: > { %v3490_v2 = vld [vmem:[#allocation8 + $0x104] ss:$16 sps:$4 sm:$0xff]   ;;  %v3492_v3 = vld [vmem:[#allocation8 + $0x10c] ss:$16 sps:$4 sm:$0xff]   ;;  %v4543_v4 = vmov 0   ;;  %s3737_s30 = sshll.u32 %s3284_s28, 3 }
  0xa9   : > { %621 = vmatprep.mubr.bf16.mxu0 %v4543_v4  ;;  %662 = vmatprep.mubr.bf16.mxu1 %v4543_v4  ;;  %v3497_v5 = vld [vmem:[#allocation8 + $0x100] ss:$16 sps:$4 sm:$0xff]   ;;  %v3499_v6 = vld [vmem:[#allocation8 + $0x108] ss:$16 sps:$4 sm:$0xff]   ;;  %v3502_v7 = vld [vmem:[#allocation8 + $0x124] ss:$16 sps:$4 sm:$0xff]  }
  0xaa   : > { %589 = vmatprep.subr.bf16.mxu0 %v3490_v2  ;;  %630 = vmatprep.subr.bf16.mxu1 %v3492_v3  ;;  %v3506_v8 = vld [vmem:[#allocation8 + $0x12c] ss:$16 sps:$4 sm:$0xff]   ;;  %v3508_v9 = vld [vmem:[#allocation8 + $0x120] ss:$16 sps:$4 sm:$0xff]   ;;  %v3511_v10 = vld [vmem:[#allocation8 + $0x128] ss:$16 sps:$4 sm:$0xff]  }
  0xab   : > { %590 = vmatpush1.bf16.msra.mxu0 %v3497_v5  ;;  %631 = vmatpush1.bf16.msra.mxu1 %v3499_v6  ;;  %4670 = vst [vmem:[#allocation20_spill] sm:$0xff] %v3511_v10  ;;  %v3514_v11 = vld [vmem:[#allocation8 + $0x144] ss:$16 sps:$4 sm:$0xff]   ;;  %v3516_v12 = vld [vmem:[#allocation8 + $0x14c] ss:$16 sps:$4 sm:$0xff]   ;;  %p933_p6 = scmp.lt.s32.totalorder %s3737_s30, 20 }
  0xac   : > { %591 = vmatprep.subr.bf16.mxu0 %v3502_v7  ;;  %632 = vmatprep.subr.bf16.mxu1 %v3506_v8  ;;  %4671 = vst [vmem:[#allocation21_spill] sm:$0xff] %v3514_v11  ;;  %4672 = vst [vmem:[#allocation22_spill] sm:$0xff] %v3516_v12  ;;  %v3518_v13 = vld [vmem:[#allocation8 + $0x140] ss:$16 sps:$4 sm:$0xff]   ;;  %v3520_v14 = vld [vmem:[#allocation8 + $0x148] ss:$16 sps:$4 sm:$0xff]  }
  0xad   : > { %4673 = vst [vmem:[#allocation23_spill] sm:$0xff] %v3518_v13  ;;  %4674 = vst [vmem:[#allocation24_spill] sm:$0xff] %v3520_v14  ;;  %v3524_v15 = vld [vmem:[#allocation8 + $0x164] ss:$16 sps:$4 sm:$0xff]   ;;  %v3528_v16 = vld [vmem:[#allocation8 + $0x16c] ss:$16 sps:$4 sm:$0xff]  }
  0xae   : > { %4675 = vst [vmem:[#allocation25_spill] sm:$0xff] %v3524_v15  ;;  %4676 = vst [vmem:[#allocation26_spill] sm:$0xff] %v3528_v16  ;;  %v3530_v17 = vld [vmem:[#allocation8 + $0x160] ss:$16 sps:$4 sm:$0xff]   ;;  %v3534_v18 = vld [vmem:[#allocation8 + $0x168] ss:$16 sps:$4 sm:$0xff]  }
  0xaf   : > { %592 = vmatpush1.bf16.msra.mxu0 %v3508_v9  ;;  %633 = vmatpush1.bf16.msra.mxu1 %v3511_v10  ;;  %4677 = vst [vmem:[#allocation27_spill] sm:$0xff] %v3530_v17  ;;  %4678 = vst [vmem:[#allocation28_spill] sm:$0xff] %v3534_v18  ;;  %v3536_v19 = vld [vmem:[#allocation8 + $0x184] ss:$16 sps:$4 sm:$0xff]   ;;  %v3540_v20 = vld [vmem:[#allocation8 + $0x18c] ss:$16 sps:$4 sm:$0xff]  }
  0xb0   : > { %593 = vmatprep.subr.bf16.mxu0 %v3514_v11  ;;  %634 = vmatprep.subr.bf16.mxu1 %v3516_v12  ;;  %4679 = vst [vmem:[#allocation29_spill] sm:$0xff] %v3536_v19  ;;  %4680 = vst [vmem:[#allocation30_spill] sm:$0xff] %v3540_v20  ;;  %v3542_v21 = vld [vmem:[#allocation8 + $0x180] ss:$16 sps:$4 sm:$0xff]   ;;  %v3544_v22 = vld [vmem:[#allocation8 + $0x188] ss:$16 sps:$4 sm:$0xff]  }
  0xb1   : > { %4681 = vst [vmem:[#allocation31_spill] sm:$0xff] %v3542_v21  ;;  %4682 = vst [vmem:[#allocation32_spill] sm:$0xff] %v3544_v22  ;;  %v3548_v23 = vld [vmem:[#allocation8 + $0x1a4] ss:$16 sps:$4 sm:$0xff]   ;;  %v3552_v24 = vld [vmem:[#allocation8 + $0x1ac] ss:$16 sps:$4 sm:$0xff]  }
  0xb2   : > { %4683 = vst [vmem:[#allocation33_spill] sm:$0xff] %v3548_v23  ;;  %4684 = vst [vmem:[#allocation34_spill] sm:$0xff] %v3552_v24  ;;  %v3556_v25 = vld [vmem:[#allocation8 + $0x1a0] ss:$16 sps:$4 sm:$0xff]   ;;  %v3558_v26 = vld [vmem:[#allocation8 + $0x1a8] ss:$16 sps:$4 sm:$0xff]  }
  0xb3   : > { %594 = vmatpush1.bf16.msra.mxu0 %v3518_v13  ;;  %635 = vmatpush1.bf16.msra.mxu1 %v3520_v14  ;;  %4685 = vst [vmem:[#allocation35_spill] sm:$0xff] %v3556_v25  ;;  %4686 = vst [vmem:[#allocation36_spill] sm:$0xff] %v3558_v26  ;;  %v3562_v27 = vld [vmem:[#allocation8 + $0x1c4] ss:$16 sps:$4 sm:$0xff]   ;;  %v3564_v28 = vld [vmem:[#allocation8 + $0x1cc] ss:$16 sps:$4 sm:$0xff]  }
  0xb4   : > { %595 = vmatprep.subr.bf16.mxu0 %v3524_v15  ;;  %636 = vmatprep.subr.bf16.mxu1 %v3528_v16  ;;  %4687 = vst [vmem:[#allocation37_spill] sm:$0xff] %v3562_v27  ;;  %4688 = vst [vmem:[#allocation38_spill] sm:$0xff] %v3564_v28  ;;  %v3566_v29 = vld [vmem:[#allocation8 + $0x1c0] ss:$16 sps:$4 sm:$0xff]   ;;  %v3568_v30 = vld [vmem:[#allocation8 + $0x1c8] ss:$16 sps:$4 sm:$0xff]  }
  0xb5   : > { %4689 = vst [vmem:[#allocation39_spill] sm:$0xff] %v3566_v29  ;;  %4690 = vst [vmem:[#allocation40_spill] sm:$0xff] %v3568_v30  ;;  %v3572_v31 = vld [vmem:[#allocation8 + $0x1e4] ss:$16 sps:$4 sm:$0xff]   ;;  %v3576_v32 = vld [vmem:[#allocation8 + $0x1ec] ss:$16 sps:$4 sm:$0xff]  }
  0xb6   : > { %4691 = vst [vmem:[#allocation41_spill] sm:$0xff] %v3572_v31  ;;  %4692 = vst [vmem:[#allocation42_spill] sm:$0xff] %v3576_v32  ;;  %v3578_v33 = vld [vmem:[#allocation8 + $0x1e0] ss:$16 sps:$4 sm:$0xff]   ;;  %v3580_v34 = vld [vmem:[#allocation8 + $0x1e8] ss:$16 sps:$4 sm:$0xff]  }
  0xb7   : > { %596 = vmatpush1.bf16.msra.mxu0 %v3530_v17  ;;  %637 = vmatpush1.bf16.msra.mxu1 %v3534_v18  ;;  %4693 = vst [vmem:[#allocation43_spill] sm:$0xff] %v3578_v33  ;;  %4694 = vst [vmem:[#allocation44_spill] sm:$0xff] %v3580_v34  ;;  %v3584_v35 = vld [vmem:[#allocation14] sm:$0xff]  ;;  %v3588_v36 = vld [vmem:[#allocation8 + $0x4] ss:$16 sps:$4 sm:$0xff]   ;;  %s1127_s15 = sadd.s32 1, %s3737_s30 }
  0xb8   : > { %597 = vmatprep.subr.bf16.mxu0 %v3536_v19  ;;  %638 = vmatprep.subr.bf16.mxu1 %v3540_v20  ;;  %4695 = vst [vmem:[#allocation45_spill] sm:$0xff] %v3588_v36  ;;  %v3590_v37 = vld [vmem:[#allocation8 + $0xc] ss:$16 sps:$4 sm:$0xff]   ;;  %v428_v38 = vpack.c.bf16 %v3584_v35, %v3584_v35  ;;  %v3594_v39 = vld [vmem:[#allocation8] ss:$16 sps:$4 sm:$0xff]   ;;  %p1128_p9 = scmp.lt.s32.totalorder %s1127_s15, 20 }
  0xb9   : > { %4696 = vst [vmem:[#allocation46_spill] sm:$0xff] %v3590_v37  ;;  %v3596_v40 = vld [vmem:[#allocation8 + $0x8] ss:$16 sps:$4 sm:$0xff]   ;;  %v3600_v41 = vld [vmem:[#allocation8 + $0x24] ss:$16 sps:$4 sm:$0xff]   ;;  %s1322_s14 = sadd.s32 2, %s3737_s30 }
  0xba   : > { %v3604_v42 = vld [vmem:[#allocation8 + $0x2c] ss:$16 sps:$4 sm:$0xff]   ;;  %v3606_v43 = vld [vmem:[#allocation8 + $0x20] ss:$16 sps:$4 sm:$0xff]   ;;  %v3610_v44 = vld [vmem:[#allocation8 + $0x28] ss:$16 sps:$4 sm:$0xff]  }
  0xbb   : > { %598 = vmatpush1.bf16.msra.mxu0 %v3542_v21  ;;  %639 = vmatpush1.bf16.msra.mxu1 %v3544_v22  ;;  %v3614_v45 = vld [vmem:[#allocation8 + $0x44] ss:$16 sps:$4 sm:$0xff]   ;;  %v3616_v46 = vld [vmem:[#allocation8 + $0x4c] ss:$16 sps:$4 sm:$0xff]   ;;  %v3620_v47 = vld [vmem:[#allocation8 + $0x40] ss:$16 sps:$4 sm:$0xff]  }
  0xbc   : > { %599 = vmatprep.subr.bf16.mxu0 %v3548_v23  ;;  %640 = vmatprep.subr.bf16.mxu1 %v3552_v24  ;;  %v3622_v48 = vld [vmem:[#allocation8 + $0x48] ss:$16 sps:$4 sm:$0xff]   ;;  %v3626_v49 = vld [vmem:[#allocation8 + $0x64] ss:$16 sps:$4 sm:$0xff]   ;;  %v3630_v50 = vld [vmem:[#allocation8 + $0x6c] ss:$16 sps:$4 sm:$0xff]  }
  0xbd   : > { %v3634_v51 = vld [vmem:[#allocation8 + $0x60] ss:$16 sps:$4 sm:$0xff]   ;;  %v3636_v52 = vld [vmem:[#allocation8 + $0x68] ss:$16 sps:$4 sm:$0xff]   ;;  %v3640_v53 = vld [vmem:[#allocation8 + $0x84] ss:$16 sps:$4 sm:$0xff]  }
  0xbe   : > { %v3642_v54 = vld [vmem:[#allocation8 + $0x8c] ss:$16 sps:$4 sm:$0xff]   ;;  %v3646_v55 = vld [vmem:[#allocation8 + $0x80] ss:$16 sps:$4 sm:$0xff]   ;;  %v3648_v56 = vld [vmem:[#allocation8 + $0x88] ss:$16 sps:$4 sm:$0xff]  }
  0xbf   : > { %600 = vmatpush1.bf16.msra.mxu0 %v3556_v25  ;;  %641 = vmatpush1.bf16.msra.mxu1 %v3558_v26  ;;  %v3652_v57 = vld [vmem:[#allocation8 + $0xa4] ss:$16 sps:$4 sm:$0xff]   ;;  %v3654_v58 = vld [vmem:[#allocation8 + $0xac] ss:$16 sps:$4 sm:$0xff]   ;;  %v3658_v59 = vld [vmem:[#allocation8 + $0xa0] ss:$16 sps:$4 sm:$0xff]  }
  0xc0   : > { %601 = vmatprep.subr.bf16.mxu0 %v3562_v27  ;;  %642 = vmatprep.subr.bf16.mxu1 %v3564_v28  ;;  %4697 = vst [vmem:[#allocation47_spill] sm:$0xff] %v3658_v59  ;;  %v3660_v60 = vld [vmem:[#allocation8 + $0xa8] ss:$16 sps:$4 sm:$0xff]   ;;  %v3664_v61 = vld [vmem:[#allocation8 + $0xc4] ss:$16 sps:$4 sm:$0xff]   ;;  %p1323_p3 = scmp.lt.s32.totalorder %s1322_s14, 20 }
  0xc1   : > { %v3666_v62 = vld [vmem:[#allocation8 + $0xcc] ss:$16 sps:$4 sm:$0xff]   ;;  %v3670_v63 = vld [vmem:[#allocation8 + $0xc0] ss:$16 sps:$4 sm:$0xff]   ;;  %v3672_v0 = vld [vmem:[#allocation8 + $0xc8] ss:$16 sps:$4 sm:$0xff]  }
  0xc2   : > { %4698 = vst [vmem:[#allocation48_spill] sm:$0xff] %v3666_v62  ;;  %v3676_v1 = vld [vmem:[#allocation8 + $0xe4] ss:$16 sps:$4 sm:$0xff]   ;;  %s934_s16 = scalar_select %p933_p6, 1, 0 }
  0xc3   : > { %602 = vmatpush1.bf16.msra.mxu0 %v3566_v29  ;;  %643 = vmatpush1.bf16.msra.mxu1 %v3568_v30  ;;  %s1129_s13 = scalar_select %p1128_p9, 1, 0 }
  0xc4   : > { %603 = vmatprep.subr.bf16.mxu0 %v3572_v31  ;;  %644 = vmatprep.subr.bf16.mxu1 %v3576_v32  ;;  %s1324_s20 = scalar_select %p1323_p3, 1, 0 }
  0xc5   : > { %s1517_s10 = sadd.s32 3, %s3737_s30  ;;  %s1712_s23 = sadd.s32 4, %s3737_s30 }
  0xc6   : > { %p1518_p7 = scmp.lt.s32.totalorder %s1517_s10, 20  ;;  %p1713_p10 = scmp.lt.s32.totalorder %s1712_s23, 20 }
  0xc7   : > { %604 = vmatpush1.bf16.msra.mxu0 %v3578_v33  ;;  %645 = vmatpush1.bf16.msra.mxu1 %v3580_v34  ;;  %s1907_s9 = sadd.s32 5, %s3737_s30  ;;  %s2102_s15 = sadd.s32 6, %s3737_s30 }
  0xc8   : > { %831 = vmatprep.subr.bf16.mxu0 %v3588_v36  ;;  %872 = vmatprep.subr.bf16.mxu1 %v3590_v37  ;;  %s1519_s17 = scalar_select %p1518_p7, 1, 0 }
  0xc9   : > { %s1714_s19 = scalar_select %p1713_p10, 1, 0 }
  0xca   : > { %622 = vmatmul.mubr.bf16.vlgmr.msra.gmra.mrb[0].mxu0 %v428_v38  ;;  %663 = vmatmul.mubr.bf16.vlgmr.msra.gmra.mrb[0].mxu1 %v428_v38  ;;  %v3678_v38 = vld [vmem:[#allocation8 + $0xec] ss:$16 sps:$4 sm:$0xff]   ;;  %p1908_p13 = scmp.lt.s32.totalorder %s1907_s9, 20  ;;  %p2103_p0 = scmp.lt.s32.totalorder %s2102_s15, 20 }
  0xcb   : > { %832 = vmatpush1.bf16.msra.mxu0 %v3594_v39  ;;  %873 = vmatpush1.bf16.msra.mxu1 %v3596_v40  ;;  %4699 = vst [vmem:[#allocation49_spill] sm:$0xff] %v3678_v38  ;;  %p4835_p8 = scmp.eq.s32.totalorder %s3284_s28, 2 }
  0xcc   : > { %833 = vmatprep.subr.bf16.mxu0 %v3600_v41  ;;  %874 = vmatprep.subr.bf16.mxu1 %v3604_v42 }
  0xcd   : > { %863 = vmatprep.mubr.bf16.mxu0 %v4543_v4  ;;  %904 = vmatprep.mubr.bf16.mxu1 %v4543_v4  ;;  %v3682_v4 = vld [vmem:[#allocation8 + $0xe0] ss:$16 sps:$4 sm:$0xff]  }
  0xcf   : > { %834 = vmatpush1.bf16.msra.mxu0 %v3606_v43  ;;  %875 = vmatpush1.bf16.msra.mxu1 %v3610_v44 }
  0xd0   : > { %835 = vmatprep.subr.bf16.mxu0 %v3614_v45  ;;  %876 = vmatprep.subr.bf16.mxu1 %v3616_v46 }
  0xd3   : > { %836 = vmatpush1.bf16.msra.mxu0 %v3620_v47  ;;  %877 = vmatpush1.bf16.msra.mxu1 %v3622_v48 }
  0xd4   : > { %837 = vmatprep.subr.bf16.mxu0 %v3626_v49  ;;  %878 = vmatprep.subr.bf16.mxu1 %v3630_v50 }
  0xd7   : > { %838 = vmatpush1.bf16.msra.mxu0 %v3634_v51  ;;  %879 = vmatpush1.bf16.msra.mxu1 %v3636_v52 }
  0xd8   : > { %839 = vmatprep.subr.bf16.mxu0 %v3640_v53  ;;  %880 = vmatprep.subr.bf16.mxu1 %v3642_v54 }
  0xdb   : > { %840 = vmatpush1.bf16.msra.mxu0 %v3646_v55  ;;  %881 = vmatpush1.bf16.msra.mxu1 %v3648_v56 }
  0xdc   : > { %841 = vmatprep.subr.bf16.mxu0 %v3652_v57  ;;  %882 = vmatprep.subr.bf16.mxu1 %v3654_v58 }
  0xdf   : > { %842 = vmatpush1.bf16.msra.mxu0 %v3658_v59  ;;  %883 = vmatpush1.bf16.msra.mxu1 %v3660_v60  ;;  %v3684_v59 = vld [vmem:[#allocation8 + $0xe8] ss:$16 sps:$4 sm:$0xff]  }
  0xe0   : > { %843 = vmatprep.subr.bf16.mxu0 %v3664_v61  ;;  %884 = vmatprep.subr.bf16.mxu1 %v3666_v62  ;;  %v427_v62 = vld [vmem:[%s3471_s11] sm:$0xf] }
  0xe3   : > { %844 = vmatpush1.bf16.msra.mxu0 %v3670_v63  ;;  %885 = vmatpush1.bf16.msra.mxu1 %v3672_v0 }
  0xe4   : > { %845 = vmatprep.subr.bf16.mxu0 %v3676_v1  ;;  %886 = vmatprep.subr.bf16.mxu1 %v3678_v38  ;;  %v4700_v38 = vmov 0  }
  0xe7   : > { %846 = vmatpush1.bf16.msra.mxu0 %v3682_v4  ;;  %887 = vmatpush1.bf16.msra.mxu1 %v3684_v59 }
  0xe8   : > { %942 = vmatprep.subr.bf16.mxu0 %v3490_v2  ;;  %983 = vmatprep.subr.bf16.mxu1 %v3492_v3 }
  0xea   : > { %864 = vmatmul.mubr.bf16.vlgmr.msra.gmra.mrb[4].mxu0 %v427_v62  ;;  %905 = vmatmul.mubr.bf16.vlgmr.msra.gmra.mrb[4].mxu1 %v427_v62 }
  0xeb   : > { %943 = vmatpush1.bf16.msra.mxu0 %v3497_v5  ;;  %984 = vmatpush1.bf16.msra.mxu1 %v3499_v6 }
  0xec   : > { %944 = vmatprep.subr.bf16.mxu0 %v3502_v7  ;;  %985 = vmatprep.subr.bf16.mxu1 %v3506_v8 }
  0xed   : > { %974 = vmatprep.mubr.bf16.mxu0 %v4700_v38  ;;  %1015 = vmatprep.mubr.bf16.mxu1 %v4700_v38 }
  0xef   : > { %945 = vmatpush1.bf16.msra.mxu0 %v3508_v9  ;;  %986 = vmatpush1.bf16.msra.mxu1 %v3511_v10 }
  0xf0   : > { %946 = vmatprep.subr.bf16.mxu0 %v3514_v11  ;;  %987 = vmatprep.subr.bf16.mxu1 %v3516_v12 }
  0xf3   : > { %947 = vmatpush1.bf16.msra.mxu0 %v3518_v13  ;;  %988 = vmatpush1.bf16.msra.mxu1 %v3520_v14 }
  0xf4   : > { %948 = vmatprep.subr.bf16.mxu0 %v3524_v15  ;;  %989 = vmatprep.subr.bf16.mxu1 %v3528_v16 }
  0xf7   : > { %949 = vmatpush1.bf16.msra.mxu0 %v3530_v17  ;;  %990 = vmatpush1.bf16.msra.mxu1 %v3534_v18 }
  0xf8   : > { %950 = vmatprep.subr.bf16.mxu0 %v3536_v19  ;;  %991 = vmatprep.subr.bf16.mxu1 %v3540_v20  ;;  %v3731_v20 = vld [vmem:[#allocation10 + $0x18] sm:$0xff] }
  0xfb   : > { %951 = vmatpush1.bf16.msra.mxu0 %v3542_v21  ;;  %992 = vmatpush1.bf16.msra.mxu1 %v3544_v22  ;;  %v3729_v21 = vld [vmem:[#allocation10 + $0x8] sm:$0xff] }
  0xfc   : > { %952 = vmatprep.subr.bf16.mxu0 %v3548_v23  ;;  %993 = vmatprep.subr.bf16.mxu1 %v3552_v24  ;;  %v3727_v23 = vld [vmem:[#allocation10] sm:$0xff] }
  0xff   : > { %953 = vmatpush1.bf16.msra.mxu0 %v3556_v25  ;;  %994 = vmatpush1.bf16.msra.mxu1 %v3558_v26 }
 0x100   : > { %954 = vmatprep.subr.bf16.mxu0 %v3562_v27  ;;  %995 = vmatprep.subr.bf16.mxu1 %v3564_v28 }
 0x103   : > { %955 = vmatpush1.bf16.msra.mxu0 %v3566_v29  ;;  %996 = vmatpush1.bf16.msra.mxu1 %v3568_v30 }
 0x104   : > { %956 = vmatprep.subr.bf16.mxu0 %v3572_v31  ;;  %997 = vmatprep.subr.bf16.mxu1 %v3576_v32 }
 0x107   : > { %957 = vmatpush1.bf16.msra.mxu0 %v3578_v33  ;;  %998 = vmatpush1.bf16.msra.mxu1 %v3580_v34 }
 0x108   : > { %1024 = vmatprep.subr.bf16.mxu0 %v3588_v36  ;;  %1065 = vmatprep.subr.bf16.mxu1 %v3590_v37 }
 0x19d   : > { %v623_v62 = vpop.f32.mrb[0].mxu0  ;;  %v664_v27 = vpop.f32.mrb[0].mxu1 }
 0x19e   : > { %v625_v26 = vpop.f32.mrb[1].mxu0  ;;  %v666_v28 = vpop.f32.mrb[1].mxu1 }
 0x19f   : > { %v627_v25 = vpop.f32.mrb[2].mxu0  ;;  %v668_v29 = vpop.f32.mrb[2].mxu1 }
 0x1a0   : > { %v628_v24 = vpop.f32.mrb[3].mxu0  ;;  %v669_v30 = vpop.f32.mrb[3].mxu1 }
 0x1bd   : > { %v865_v31 = vpop.f32.mrb[4].mxu0  ;;  %v906_v32 = vpop.f32.mrb[4].mxu1 }
 0x1be   : > { %v866_v22 = vadd.f32 %v865_v31, %v623_v62  ;;  %v907_v33 = vadd.f32 %v906_v32, %v664_v27  ;;  %v867_v36 = vpop.f32.mrb[5].mxu0  ;;  %v908_v34 = vpop.f32.mrb[5].mxu1  ;;  %v935_v62 = vstv %s934_s16  ;;  %s1909_s16 = scalar_select %p1908_p13, 1, 0 }
 0x1bf   : > { %v868_v37 = vadd.f32 %v867_v36, %v625_v26  ;;  %v909_v19 = vadd.f32 %v908_v34, %v666_v28  ;;  %v869_v18 = vpop.f32.mrb[6].mxu0  ;;  %v910_v25 = vpop.f32.mrb[6].mxu1  ;;  %v3739_v26 = vld [vmem:[#allocation10 + $0x10] sm:$0xff]  ;;  %vm936_vm0 = vcmp.eq.s32.totalorder %v935_v62, 1 }
 0x1c0   : > { %v913_v24 = vadd.f32 %v866_v22, %v3727_v23  ;;  %v870_v29 = vpop.f32.mrb[7].mxu0  ;;  %v911_v30 = vpop.f32.mrb[7].mxu1  ;;  %4701 = vst [vmem:[#allocation50_spill] sm:$0xff] %v3739_v26  ;;  %v915_v18 = vadd.f32 %v907_v33, %v3739_v26  ;;  %v4710_v62 = vld [vmem:[#allocation32_spill] sm:$0xff] }
 0x1c1   : > { %v914_v17 = vadd.f32 %v868_v37, %v3729_v21  ;;  %v916_v27 = vadd.f32 %v909_v19, %v3731_v20  ;;  %v425_v19 = vld [vmem:[#allocation12] sm:$0xff] }
 0x1c2   : > { %2786 = vtanh.f32 %v913_v24 }
 0x1c3   : > { %2788 = vtanh.f32 %v914_v17 }
 0x1c4   : > { %2790 = vtanh.f32 %v916_v27 }
 0x1c5   : > { %2792 = vtanh.f32 %v915_v18 }
 0x1cc   : > { %v2787_v28 = vpop.eup %2786 }
 0x1cd   : > { %v921_v31 = vmul.f32 0.5, %v2787_v28  ;;  %v2789_v22 = vpop.eup %2788 }
 0x1ce   : > { %v923_v34 = vmul.f32 0.5, %v2789_v22  ;;  %v2791_v36 = vpop.eup %2790  ;;  %v4704_v22 = vld [vmem:[#allocation49_spill] sm:$0xff] }
 0x1cf   : > { %v922_v32 = vadd.f32 0.5, %v921_v31  ;;  %v2793_v33 = vpop.eup %2792 }
 0x1d0   : > { %v924_v17 = vadd.f32 0.5, %v923_v34  ;;  %v925_v30 = vmul.f32 0.5, %v2793_v33  ;;  %v4705_v34 = vld [vmem:[#allocation27_spill] sm:$0xff] }
 0x1d1   : > { %v928_v37 = vmul.f32 %v2791_v36, %v922_v32  ;;  %v2557_v32 = vld [vmem:[%s3471_s11 + $0x4] sm:$0xf]  ;;  %v4713_v33 = vld [vmem:[#allocation35_spill] sm:$0xff] }
 0x1d2   : > { %v927_v25 = vmul.f32 %v924_v17, %v425_v19  ;;  %v926_v27 = vadd.f32 0.5, %v925_v30  ;;  %v4706_v36 = vld [vmem:[#allocation28_spill] sm:$0xff]  ;;  %v4708_v17 = vld [vmem:[#allocation30_spill] sm:$0xff] }
 0x1d3   : > { %v4714_v30 = vld [vmem:[#allocation36_spill] sm:$0xff] }
 0x1d4   : > { %v929_v24 = vadd.f32 %v928_v37, %v927_v25  ;;  %v4709_v37 = vld [vmem:[#allocation31_spill] sm:$0xff]  ;;  %v4711_v25 = vld [vmem:[#allocation33_spill] sm:$0xff] }
 0x1d6   : > { %2794 = vtanh.f32 %v929_v24  ;;  %v3743_v29 = vsel %vm936_vm0, %v929_v24, %v425_v19  ;;  %v4707_v19 = vld [vmem:[#allocation29_spill] sm:$0xff]  ;;  %v4712_v24 = vld [vmem:[#allocation34_spill] sm:$0xff] }
 0x1e0   : > { %v2795_v28 = vpop.eup %2794 }
 0x1e1   : > { %v931_v26 = vmul.f32 %v2795_v28, %v926_v27  ;;  %v4715_v27 = vld [vmem:[#allocation37_spill] sm:$0xff]  ;;  %v4716_v28 = vld [vmem:[#allocation38_spill] sm:$0xff] }
 0x1e3   : > { %932 = vst [vmem:[%s3486_s29] sm:$0xff] %v931_v26  ;;  %v3747_v18 = vsel %vm936_vm0, %v931_v26, %v3584_v35  ;;  %v4702_v35 = vld [vmem:[#allocation47_spill] sm:$0xff]  ;;  %v4703_v26 = vld [vmem:[#allocation48_spill] sm:$0xff] }
 0x1e4   : > { %v941_v31 = vpack.c.bf16 %v3747_v18, %v3747_v18 }
 0x1e6   : > { %975 = vmatmul.mubr.bf16.vlgmr.msra.gmra.mrb[8].mxu0 %v941_v31  ;;  %1016 = vmatmul.mubr.bf16.vlgmr.msra.gmra.mrb[8].mxu1 %v941_v31  ;;  %v4717_v31 = vld [vmem:[#allocation39_spill] sm:$0xff] }
 0x1e7   : > { %1025 = vmatpush1.bf16.msra.mxu0 %v3594_v39  ;;  %1066 = vmatpush1.bf16.msra.mxu1 %v3596_v40 }
 0x1e8   : > { %1026 = vmatprep.subr.bf16.mxu0 %v3600_v41  ;;  %1067 = vmatprep.subr.bf16.mxu1 %v3604_v42 }
 0x1e9   : > { %1056 = vmatprep.mubr.bf16.mxu0 %v4700_v38  ;;  %1097 = vmatprep.mubr.bf16.mxu1 %v4700_v38 }
 0x1eb   : > { %1027 = vmatpush1.bf16.msra.mxu0 %v3606_v43  ;;  %1068 = vmatpush1.bf16.msra.mxu1 %v3610_v44 }
 0x1ec   : > { %1028 = vmatprep.subr.bf16.mxu0 %v3614_v45  ;;  %1069 = vmatprep.subr.bf16.mxu1 %v3616_v46 }
 0x1ef   : > { %1029 = vmatpush1.bf16.msra.mxu0 %v3620_v47  ;;  %1070 = vmatpush1.bf16.msra.mxu1 %v3622_v48 }
 0x1f0   : > { %1030 = vmatprep.subr.bf16.mxu0 %v3626_v49  ;;  %1071 = vmatprep.subr.bf16.mxu1 %v3630_v50 }
 0x1f3   : > { %1031 = vmatpush1.bf16.msra.mxu0 %v3634_v51  ;;  %1072 = vmatpush1.bf16.msra.mxu1 %v3636_v52 }
 0x1f4   : > { %1032 = vmatprep.subr.bf16.mxu0 %v3640_v53  ;;  %1073 = vmatprep.subr.bf16.mxu1 %v3642_v54 }
 0x1f7   : > { %1033 = vmatpush1.bf16.msra.mxu0 %v3646_v55  ;;  %1074 = vmatpush1.bf16.msra.mxu1 %v3648_v56 }
 0x1f8   : > { %1034 = vmatprep.subr.bf16.mxu0 %v3652_v57  ;;  %1075 = vmatprep.subr.bf16.mxu1 %v3654_v58 }
 0x1fb   : > { %1035 = vmatpush1.bf16.msra.mxu0 %v4702_v35  ;;  %1076 = vmatpush1.bf16.msra.mxu1 %v3660_v60 }
 0x1fc   : > { %1036 = vmatprep.subr.bf16.mxu0 %v3664_v61  ;;  %1077 = vmatprep.subr.bf16.mxu1 %v4703_v26 }
 0x1ff   : > { %1037 = vmatpush1.bf16.msra.mxu0 %v3670_v63  ;;  %1078 = vmatpush1.bf16.msra.mxu1 %v3672_v0 }
 0x200   : > { %1038 = vmatprep.subr.bf16.mxu0 %v3676_v1  ;;  %1079 = vmatprep.subr.bf16.mxu1 %v4704_v22 }
 0x203   : > { %1039 = vmatpush1.bf16.msra.mxu0 %v3682_v4  ;;  %1080 = vmatpush1.bf16.msra.mxu1 %v3684_v59 }
 0x204   : > { %1137 = vmatprep.subr.bf16.mxu0 %v3490_v2  ;;  %1178 = vmatprep.subr.bf16.mxu1 %v3492_v3 }
 0x206   : > { %1057 = vmatmul.mubr.bf16.vlgmr.msra.gmra.mrb[12].mxu0 %v2557_v32  ;;  %1098 = vmatmul.mubr.bf16.vlgmr.msra.gmra.mrb[12].mxu1 %v2557_v32  ;;  %v4718_v32 = vld [vmem:[#allocation40_spill] sm:$0xff] }
 0x207   : > { %1138 = vmatpush1.bf16.msra.mxu0 %v3497_v5  ;;  %1179 = vmatpush1.bf16.msra.mxu1 %v3499_v6 }
 0x208   : > { %1139 = vmatprep.subr.bf16.mxu0 %v3502_v7  ;;  %1180 = vmatprep.subr.bf16.mxu1 %v3506_v8 }
 0x209   : > { %1169 = vmatprep.mubr.bf16.mxu0 %v4700_v38  ;;  %1210 = vmatprep.mubr.bf16.mxu1 %v4700_v38 }
 0x20b   : > { %1140 = vmatpush1.bf16.msra.mxu0 %v3508_v9  ;;  %1181 = vmatpush1.bf16.msra.mxu1 %v3511_v10 }
 0x20c   : > { %1141 = vmatprep.subr.bf16.mxu0 %v3514_v11  ;;  %1182 = vmatprep.subr.bf16.mxu1 %v3516_v12 }
 0x20f   : > { %1142 = vmatpush1.bf16.msra.mxu0 %v3518_v13  ;;  %1183 = vmatpush1.bf16.msra.mxu1 %v3520_v14 }
 0x210   : > { %1143 = vmatprep.subr.bf16.mxu0 %v3524_v15  ;;  %1184 = vmatprep.subr.bf16.mxu1 %v3528_v16 }
 0x213   : > { %1144 = vmatpush1.bf16.msra.mxu0 %v4705_v34  ;;  %1185 = vmatpush1.bf16.msra.mxu1 %v4706_v36 }
 0x214   : > { %1145 = vmatprep.subr.bf16.mxu0 %v4707_v19  ;;  %1186 = vmatprep.subr.bf16.mxu1 %v4708_v17  ;;  %v4719_v17 = vld [vmem:[#allocation41_spill] sm:$0xff] }
 0x217   : > { %1146 = vmatpush1.bf16.msra.mxu0 %v4709_v37  ;;  %1187 = vmatpush1.bf16.msra.mxu1 %v4710_v62  ;;  %v4720_v37 = vld [vmem:[#allocation42_spill] sm:$0xff]  ;;  %v4721_v62 = vld [vmem:[#allocation43_spill] sm:$0xff] }
 0x218   : > { %1147 = vmatprep.subr.bf16.mxu0 %v4711_v25  ;;  %1188 = vmatprep.subr.bf16.mxu1 %v4712_v24  ;;  %v4722_v25 = vld [vmem:[#allocation44_spill] sm:$0xff]  ;;  %v4723_v24 = vld [vmem:[#allocation45_spill] sm:$0xff] }
 0x21b   : > { %1148 = vmatpush1.bf16.msra.mxu0 %v4713_v33  ;;  %1189 = vmatpush1.bf16.msra.mxu1 %v4714_v30  ;;  %v4724_v33 = vld [vmem:[#allocation46_spill] sm:$0xff] }
 0x21c   : > { %1149 = vmatprep.subr.bf16.mxu0 %v4715_v27  ;;  %1190 = vmatprep.subr.bf16.mxu1 %v4716_v28 }
 0x21f   : > { %1150 = vmatpush1.bf16.msra.mxu0 %v4717_v31  ;;  %1191 = vmatpush1.bf16.msra.mxu1 %v4718_v32 }
 0x220   : > { %1151 = vmatprep.subr.bf16.mxu0 %v4719_v17  ;;  %1192 = vmatprep.subr.bf16.mxu1 %v4720_v37 }
 0x223   : > { %1152 = vmatpush1.bf16.msra.mxu0 %v4721_v62  ;;  %1193 = vmatpush1.bf16.msra.mxu1 %v4722_v25 }
 0x224   : > { %1219 = vmatprep.subr.bf16.mxu0 %v4723_v24  ;;  %1260 = vmatprep.subr.bf16.mxu1 %v4724_v33 }
 0x2b9   : > { %v976_v30 = vpop.f32.mrb[8].mxu0  ;;  %v1017_v27 = vpop.f32.mrb[8].mxu1 }
 0x2ba   : > { %v978_v19 = vpop.f32.mrb[9].mxu0  ;;  %v1019_v28 = vpop.f32.mrb[9].mxu1 }
 0x2bb   : > { %v980_v36 = vpop.f32.mrb[10].mxu0  ;;  %v1021_v31 = vpop.f32.mrb[10].mxu1 }
 0x2bc   : > { %v981_v34 = vpop.f32.mrb[11].mxu0  ;;  %v1022_v32 = vpop.f32.mrb[11].mxu1 }
 0x2d9   : > { %v1058_v16 = vpop.f32.mrb[12].mxu0  ;;  %v1099_v17 = vpop.f32.mrb[12].mxu1 }
 0x2da   : > { %v1059_v15 = vadd.f32 %v1058_v16, %v976_v30  ;;  %v1100_v37 = vadd.f32 %v1099_v17, %v1017_v27  ;;  %v1060_v62 = vpop.f32.mrb[13].mxu0  ;;  %v1101_v14 = vpop.f32.mrb[13].mxu1  ;;  %v4725_v16 = vld [vmem:[#allocation50_spill] sm:$0xff] }
 0x2db   : > { %v1061_v25 = vadd.f32 %v1060_v62, %v978_v19  ;;  %v1102_v13 = vadd.f32 %v1101_v14, %v1019_v28  ;;  %v1062_v24 = vpop.f32.mrb[14].mxu0  ;;  %v1103_v12 = vpop.f32.mrb[14].mxu1 }
 0x2dc   : > { %v1106_v33 = vadd.f32 %v1059_v15, %v3727_v23  ;;  %v1063_v11 = vpop.f32.mrb[15].mxu0  ;;  %v1104_v10 = vpop.f32.mrb[15].mxu1  ;;  %v1108_v17 = vadd.f32 %v1100_v37, %v4725_v16 }
 0x2dd   : > { %v1107_v36 = vadd.f32 %v1061_v25, %v3729_v21  ;;  %v1109_v34 = vadd.f32 %v1102_v13, %v3731_v20  ;;  %v1130_v25 = vstv %s1129_s13  ;;  %s2104_s13 = scalar_select %p2103_p0, 1, 0 }
 0x2de   : > { %2796 = vtanh.f32 %v1106_v33  ;;  %vm1131_vm1 = vcmp.eq.s32.totalorder %v1130_v25, 1  ;;  %v4743_v25 = vld [vmem:[#allocation37_spill] sm:$0xff] }
 0x2df   : > { %2798 = vtanh.f32 %v1107_v36 }
 0x2e0   : > { %2800 = vtanh.f32 %v1109_v34 }
 0x2e1   : > { %2802 = vtanh.f32 %v1108_v17  ;;  %v4729_v17 = vld [vmem:[#allocation23_spill] sm:$0xff] }
 0x2e8   : > { %v2797_v30 = vpop.eup %2796 }
 0x2e9   : > { %v1114_v19 = vmul.f32 0.5, %v2797_v30  ;;  %v2799_v14 = vpop.eup %2798  ;;  %v4734_v30 = vld [vmem:[#allocation28_spill] sm:$0xff] }
 0x2ea   : > { %v1116_v11 = vmul.f32 0.5, %v2799_v14  ;;  %v2801_v10 = vpop.eup %2800  ;;  %v4737_v14 = vld [vmem:[#allocation31_spill] sm:$0xff] }
 0x2eb   : > { %v1115_v12 = vadd.f32 0.5, %v1114_v19  ;;  %v2803_v37 = vpop.eup %2802  ;;  %v4735_v19 = vld [vmem:[#allocation29_spill] sm:$0xff] }
 0x2ec   : > { %v1117_v15 = vadd.f32 0.5, %v1116_v11  ;;  %v1118_v27 = vmul.f32 0.5, %v2803_v37  ;;  %v4739_v11 = vld [vmem:[#allocation33_spill] sm:$0xff]  ;;  %v4746_v37 = vld [vmem:[#allocation40_spill] sm:$0xff] }
 0x2ed   : > { %v1121_v62 = vmul.f32 %v2801_v10, %v1115_v12  ;;  %v4738_v12 = vld [vmem:[#allocation32_spill] sm:$0xff]  ;;  %v4740_v10 = vld [vmem:[#allocation34_spill] sm:$0xff] }
 0x2ee   : > { %v1120_v13 = vmul.f32 %v1117_v15, %v3743_v29  ;;  %v1119_v28 = vadd.f32 0.5, %v1118_v27  ;;  %v4741_v15 = vld [vmem:[#allocation35_spill] sm:$0xff]  ;;  %v4747_v27 = vld [vmem:[#allocation41_spill] sm:$0xff] }
 0x2f0   : > { %v1122_v24 = vadd.f32 %v1121_v62, %v1120_v13  ;;  %v4742_v62 = vld [vmem:[#allocation36_spill] sm:$0xff]  ;;  %v4744_v13 = vld [vmem:[#allocation38_spill] sm:$0xff] }
 0x2f2   : > { %2804 = vtanh.f32 %v1122_v24  ;;  %v3827_v33 = vsel %vm1131_vm1, %v1122_v24, %v3743_v29  ;;  %v2559_v29 = vld [vmem:[%s3471_s11 + $0x8] sm:$0xf]  ;;  %v4745_v24 = vld [vmem:[#allocation39_spill] sm:$0xff] }
 0x2fc   : > { %v2805_v31 = vpop.eup %2804 }
 0x2fd   : > { %v1124_v32 = vmul.f32 %v2805_v31, %v1119_v28  ;;  %v4748_v28 = vld [vmem:[#allocation42_spill] sm:$0xff]  ;;  %v4749_v31 = vld [vmem:[#allocation43_spill] sm:$0xff] }
 0x2ff   : > { %2558 = vst [vmem:[%s3486_s29 + $0x8] sm:$0xff] %v1124_v32  ;;  %v3831_v36 = vsel %vm1131_vm1, %v1124_v32, %v3747_v18  ;;  %v4726_v18 = vld [vmem:[#allocation20_spill] sm:$0xff] }
 0x300   : > { %v1136_v34 = vpack.c.bf16 %v3831_v36, %v3831_v36  ;;  %v4750_v32 = vld [vmem:[#allocation44_spill] sm:$0xff] }
 0x302   : > { %1170 = vmatmul.mubr.bf16.vlgmr.msra.gmra.mrb[16].mxu0 %v1136_v34  ;;  %1211 = vmatmul.mubr.bf16.vlgmr.msra.gmra.mrb[16].mxu1 %v1136_v34  ;;  %v4751_v34 = vld [vmem:[#allocation45_spill] sm:$0xff] }
 0x303   : > { %1220 = vmatpush1.bf16.msra.mxu0 %v3594_v39  ;;  %1261 = vmatpush1.bf16.msra.mxu1 %v3596_v40 }
 0x304   : > { %1221 = vmatprep.subr.bf16.mxu0 %v3600_v41  ;;  %1262 = vmatprep.subr.bf16.mxu1 %v3604_v42 }
 0x305   : > { %1251 = vmatprep.mubr.bf16.mxu0 %v4700_v38  ;;  %1292 = vmatprep.mubr.bf16.mxu1 %v4700_v38 }
 0x307   : > { %1222 = vmatpush1.bf16.msra.mxu0 %v3606_v43  ;;  %1263 = vmatpush1.bf16.msra.mxu1 %v3610_v44 }
 0x308   : > { %1223 = vmatprep.subr.bf16.mxu0 %v3614_v45  ;;  %1264 = vmatprep.subr.bf16.mxu1 %v3616_v46 }
 0x30b   : > { %1224 = vmatpush1.bf16.msra.mxu0 %v3620_v47  ;;  %1265 = vmatpush1.bf16.msra.mxu1 %v3622_v48 }
 0x30c   : > { %1225 = vmatprep.subr.bf16.mxu0 %v3626_v49  ;;  %1266 = vmatprep.subr.bf16.mxu1 %v3630_v50 }
 0x30f   : > { %1226 = vmatpush1.bf16.msra.mxu0 %v3634_v51  ;;  %1267 = vmatpush1.bf16.msra.mxu1 %v3636_v52 }
 0x310   : > { %1227 = vmatprep.subr.bf16.mxu0 %v3640_v53  ;;  %1268 = vmatprep.subr.bf16.mxu1 %v3642_v54 }
 0x313   : > { %1228 = vmatpush1.bf16.msra.mxu0 %v3646_v55  ;;  %1269 = vmatpush1.bf16.msra.mxu1 %v3648_v56 }
 0x314   : > { %1229 = vmatprep.subr.bf16.mxu0 %v3652_v57  ;;  %1270 = vmatprep.subr.bf16.mxu1 %v3654_v58 }
 0x317   : > { %1230 = vmatpush1.bf16.msra.mxu0 %v4702_v35  ;;  %1271 = vmatpush1.bf16.msra.mxu1 %v3660_v60 }
 0x318   : > { %1231 = vmatprep.subr.bf16.mxu0 %v3664_v61  ;;  %1272 = vmatprep.subr.bf16.mxu1 %v4703_v26 }
 0x31b   : > { %1232 = vmatpush1.bf16.msra.mxu0 %v3670_v63  ;;  %1273 = vmatpush1.bf16.msra.mxu1 %v3672_v0 }
 0x31c   : > { %1233 = vmatprep.subr.bf16.mxu0 %v3676_v1  ;;  %1274 = vmatprep.subr.bf16.mxu1 %v4704_v22 }
 0x31f   : > { %1234 = vmatpush1.bf16.msra.mxu0 %v3682_v4  ;;  %1275 = vmatpush1.bf16.msra.mxu1 %v3684_v59 }
 0x320   : > { %1332 = vmatprep.subr.bf16.mxu0 %v3490_v2  ;;  %1373 = vmatprep.subr.bf16.mxu1 %v3492_v3  ;;  %v4727_v2 = vld [vmem:[#allocation21_spill] sm:$0xff]  ;;  %v4728_v3 = vld [vmem:[#allocation22_spill] sm:$0xff] }
 0x322   : > { %1252 = vmatmul.mubr.bf16.vlgmr.msra.gmra.mrb[20].mxu0 %v2559_v29  ;;  %1293 = vmatmul.mubr.bf16.vlgmr.msra.gmra.mrb[20].mxu1 %v2559_v29  ;;  %v4752_v29 = vld [vmem:[#allocation46_spill] sm:$0xff] }
 0x323   : > { %1333 = vmatpush1.bf16.msra.mxu0 %v3497_v5  ;;  %1374 = vmatpush1.bf16.msra.mxu1 %v3499_v6  ;;  %v4730_v5 = vld [vmem:[#allocation24_spill] sm:$0xff]  ;;  %v4731_v6 = vld [vmem:[#allocation25_spill] sm:$0xff] }
 0x324   : > { %1334 = vmatprep.subr.bf16.mxu0 %v3502_v7  ;;  %1375 = vmatprep.subr.bf16.mxu1 %v3506_v8  ;;  %v4732_v7 = vld [vmem:[#allocation26_spill] sm:$0xff]  ;;  %v4733_v8 = vld [vmem:[#allocation27_spill] sm:$0xff] }
 0x325   : > { %1364 = vmatprep.mubr.bf16.mxu0 %v4700_v38  ;;  %1405 = vmatprep.mubr.bf16.mxu1 %v4700_v38 }
 0x327   : > { %1335 = vmatpush1.bf16.msra.mxu0 %v3508_v9  ;;  %1376 = vmatpush1.bf16.msra.mxu1 %v4726_v18  ;;  %v4736_v9 = vld [vmem:[#allocation30_spill] sm:$0xff] }
 0x328   : > { %1336 = vmatprep.subr.bf16.mxu0 %v4727_v2  ;;  %1377 = vmatprep.subr.bf16.mxu1 %v4728_v3 }
 0x32b   : > { %1337 = vmatpush1.bf16.msra.mxu0 %v4729_v17  ;;  %1378 = vmatpush1.bf16.msra.mxu1 %v4730_v5 }
 0x32c   : > { %1338 = vmatprep.subr.bf16.mxu0 %v4731_v6  ;;  %1379 = vmatprep.subr.bf16.mxu1 %v4732_v7 }
 0x32f   : > { %1339 = vmatpush1.bf16.msra.mxu0 %v4733_v8  ;;  %1380 = vmatpush1.bf16.msra.mxu1 %v4734_v30 }
 0x330   : > { %1340 = vmatprep.subr.bf16.mxu0 %v4735_v19  ;;  %1381 = vmatprep.subr.bf16.mxu1 %v4736_v9 }
 0x333   : > { %1341 = vmatpush1.bf16.msra.mxu0 %v4737_v14  ;;  %1382 = vmatpush1.bf16.msra.mxu1 %v4738_v12 }
 0x334   : > { %1342 = vmatprep.subr.bf16.mxu0 %v4739_v11  ;;  %1383 = vmatprep.subr.bf16.mxu1 %v4740_v10 }
 0x337   : > { %1343 = vmatpush1.bf16.msra.mxu0 %v4741_v15  ;;  %1384 = vmatpush1.bf16.msra.mxu1 %v4742_v62 }
 0x338   : > { %1344 = vmatprep.subr.bf16.mxu0 %v4743_v25  ;;  %1385 = vmatprep.subr.bf16.mxu1 %v4744_v13 }
 0x33b   : > { %1345 = vmatpush1.bf16.msra.mxu0 %v4745_v24  ;;  %1386 = vmatpush1.bf16.msra.mxu1 %v4746_v37 }
 0x33c   : > { %1346 = vmatprep.subr.bf16.mxu0 %v4747_v27  ;;  %1387 = vmatprep.subr.bf16.mxu1 %v4748_v28 }
 0x33f   : > { %1347 = vmatpush1.bf16.msra.mxu0 %v4749_v31  ;;  %1388 = vmatpush1.bf16.msra.mxu1 %v4750_v32 }
 0x340   : > { %1414 = vmatprep.subr.bf16.mxu0 %v4751_v34  ;;  %1455 = vmatprep.subr.bf16.mxu1 %v4752_v29 }
 0x3d5   : > { %v1171_v18 = vpop.f32.mrb[16].mxu0  ;;  %v1212_v2 = vpop.f32.mrb[16].mxu1 }
 0x3d6   : > { %v1173_v3 = vpop.f32.mrb[17].mxu0  ;;  %v1214_v17 = vpop.f32.mrb[17].mxu1 }
 0x3d7   : > { %v1175_v5 = vpop.f32.mrb[18].mxu0  ;;  %v1216_v6 = vpop.f32.mrb[18].mxu1 }
 0x3d8   : > { %v1176_v7 = vpop.f32.mrb[19].mxu0  ;;  %v1217_v8 = vpop.f32.mrb[19].mxu1 }
 0x3d9   : > { %v1325_v8 = vstv %s1324_s20  ;;  %s3218_s20 = smov [#allocation12]  }
 0x3da   : > { %vm1326_vm2 = vcmp.eq.s32.totalorder %v1325_v8, 1  ;;  %s2334_s10 = sshll.u32 %s3218_s20, 4  ;;  %s2335_s10 = int_to_ptr.vmem [resolvable:$true] %s2334_s10 }
 0x3db   : > { %p3083_p4 = scmp.lt.s32.totalorder %s2335_s10, %s2335_s10 }
 0x3f5   : > { %v1253_v30 = vpop.f32.mrb[20].mxu0  ;;  %v1294_v19 = vpop.f32.mrb[20].mxu1 }
 0x3f6   : > { %v1254_v9 = vadd.f32 %v1253_v30, %v1171_v18  ;;  %v1295_v14 = vadd.f32 %v1294_v19, %v1212_v2  ;;  %v1255_v12 = vpop.f32.mrb[21].mxu0  ;;  %v1296_v11 = vpop.f32.mrb[21].mxu1 }
 0x3f7   : > { %v1256_v10 = vadd.f32 %v1255_v12, %v1173_v3  ;;  %v1297_v15 = vadd.f32 %v1296_v11, %v1214_v17  ;;  %v1257_v62 = vpop.f32.mrb[22].mxu0  ;;  %v1298_v25 = vpop.f32.mrb[22].mxu1 }
 0x3f8   : > { %v1301_v13 = vadd.f32 %v1254_v9, %v3727_v23  ;;  %v1258_v24 = vpop.f32.mrb[23].mxu0  ;;  %v1299_v37 = vpop.f32.mrb[23].mxu1  ;;  %v1303_v31 = vadd.f32 %v1295_v14, %v4725_v16 }
 0x3f9   : > { %v1302_v27 = vadd.f32 %v1256_v10, %v3729_v21  ;;  %v1304_v28 = vadd.f32 %v1297_v15, %v3731_v20 }
 0x3fa   : > { %2806 = vtanh.f32 %v1301_v13  ;;  %v4047_v13 = vld [vmem:[#allocation8 + $0x1e8] ss:$16 sps:$4 sm:$0xff]  }
 0x3fb   : > { %2808 = vtanh.f32 %v1302_v27  ;;  %4777 = vst [vmem:[#allocation40_spill] sm:$0xff] %v4047_v13 }
 0x3fc   : > { %2810 = vtanh.f32 %v1304_v28 }
 0x3fd   : > { %2812 = vtanh.f32 %v1303_v31 }
 0x404   : > { %v2807_v32 = vpop.eup %2806 }
 0x405   : > { %v1309_v18 = vmul.f32 0.5, %v2807_v32  ;;  %v2809_v2 = vpop.eup %2808 }
 0x406   : > { %v1311_v17 = vmul.f32 0.5, %v2809_v2  ;;  %v2811_v5 = vpop.eup %2810 }
 0x407   : > { %v1310_v3 = vadd.f32 0.5, %v1309_v18  ;;  %v2813_v14 = vpop.eup %2812 }
 0x408   : > { %v1312_v6 = vadd.f32 0.5, %v1311_v17  ;;  %v1313_v12 = vmul.f32 0.5, %v2813_v14 }
 0x409   : > { %v1316_v7 = vmul.f32 %v2811_v5, %v1310_v3 }
 0x40a   : > { %v1315_v30 = vmul.f32 %v1312_v6, %v3827_v33  ;;  %v1314_v11 = vadd.f32 0.5, %v1313_v12 }
 0x40c   : > { %v1317_v19 = vadd.f32 %v1316_v7, %v1315_v30 }
 0x40e   : > { %2814 = vtanh.f32 %v1317_v19  ;;  %v3911_v9 = vsel %vm1326_vm2, %v1317_v19, %v3827_v33  ;;  %v4041_v33 = vld [vmem:[#allocation8 + $0x1ec] ss:$16 sps:$4 sm:$0xff]  }
 0x40f   : > { %4775 = vst [vmem:[#allocation38_spill] sm:$0xff] %v4041_v33 }
 0x418   : > { %v2815_v10 = vpop.eup %2814 }
 0x419   : > { %v1319_v15 = vmul.f32 %v2815_v10, %v1314_v11 }
 0x41b   : > { %2560 = vst [vmem:[%s3486_s29 + $0x10] sm:$0xff] %v1319_v15  ;;  %v3915_v62 = vsel %vm1326_vm2, %v1319_v15, %v3831_v36  ;;  %v4044_v36 = vld [vmem:[#allocation8 + $0x1e0] ss:$16 sps:$4 sm:$0xff]  }
 0x41c   : > { %v1331_v25 = vpack.c.bf16 %v3915_v62, %v3915_v62  ;;  %4776 = vst [vmem:[#allocation39_spill] sm:$0xff] %v4044_v36 }
 0x41e   : > { %1365 = vmatmul.mubr.bf16.vlgmr.msra.gmra.mrb[24].mxu0 %v1331_v25  ;;  %1406 = vmatmul.mubr.bf16.vlgmr.msra.gmra.mrb[24].mxu1 %v1331_v25 }
 0x41f   : > { %1415 = vmatpush1.bf16.msra.mxu0 %v3594_v39  ;;  %1456 = vmatpush1.bf16.msra.mxu1 %v3596_v40  ;;  %v2561_v39 = vld [vmem:[%s3471_s11 + $0xc] sm:$0xf]  ;;  %v3952_v40 = vld [vmem:[#allocation8 + $0x104] ss:$16 sps:$4 sm:$0xff]  }
 0x420   : > { %1416 = vmatprep.subr.bf16.mxu0 %v3600_v41  ;;  %1457 = vmatprep.subr.bf16.mxu1 %v3604_v42  ;;  %v3955_v41 = vld [vmem:[#allocation8 + $0x10c] ss:$16 sps:$4 sm:$0xff]   ;;  %v3958_v42 = vld [vmem:[#allocation8 + $0x100] ss:$16 sps:$4 sm:$0xff]  }
 0x421   : > { %1446 = vmatprep.mubr.bf16.mxu0 %v4700_v38  ;;  %1487 = vmatprep.mubr.bf16.mxu1 %v4700_v38 }
 0x423   : > { %1417 = vmatpush1.bf16.msra.mxu0 %v3606_v43  ;;  %1458 = vmatpush1.bf16.msra.mxu1 %v3610_v44  ;;  %v3961_v43 = vld [vmem:[#allocation8 + $0x108] ss:$16 sps:$4 sm:$0xff]   ;;  %v3967_v44 = vld [vmem:[#allocation8 + $0x12c] ss:$16 sps:$4 sm:$0xff]  }
 0x424   : > { %1418 = vmatprep.subr.bf16.mxu0 %v3614_v45  ;;  %1459 = vmatprep.subr.bf16.mxu1 %v3616_v46  ;;  %v3972_v45 = vld [vmem:[#allocation8 + $0x120] ss:$16 sps:$4 sm:$0xff]   ;;  %v3975_v46 = vld [vmem:[#allocation8 + $0x128] ss:$16 sps:$4 sm:$0xff]  }
 0x425   : > { %4753 = vst [vmem:[#allocation47_spill] sm:$0xff] %v3975_v46 }
 0x427   : > { %1419 = vmatpush1.bf16.msra.mxu0 %v3620_v47  ;;  %1460 = vmatpush1.bf16.msra.mxu1 %v3622_v48  ;;  %v3978_v47 = vld [vmem:[#allocation8 + $0x144] ss:$16 sps:$4 sm:$0xff]   ;;  %v3981_v48 = vld [vmem:[#allocation8 + $0x14c] ss:$16 sps:$4 sm:$0xff]  }
 0x428   : > { %1420 = vmatprep.subr.bf16.mxu0 %v3626_v49  ;;  %1461 = vmatprep.subr.bf16.mxu1 %v3630_v50  ;;  %4754 = vst [vmem:[#allocation48_spill] sm:$0xff] %v3978_v47  ;;  %4755 = vst [vmem:[#allocation49_spill] sm:$0xff] %v3981_v48  ;;  %v3984_v49 = vld [vmem:[#allocation8 + $0x140] ss:$16 sps:$4 sm:$0xff]   ;;  %v3987_v50 = vld [vmem:[#allocation8 + $0x148] ss:$16 sps:$4 sm:$0xff]  }
 0x429   : > { %4756 = vst [vmem:[#allocation50_spill] sm:$0xff] %v3984_v49  ;;  %4757 = vst [vmem:[#allocation20_spill] sm:$0xff] %v3987_v50 }
 0x42b   : > { %1421 = vmatpush1.bf16.msra.mxu0 %v3634_v51  ;;  %1462 = vmatpush1.bf16.msra.mxu1 %v3636_v52  ;;  %v3990_v51 = vld [vmem:[#allocation8 + $0x164] ss:$16 sps:$4 sm:$0xff]   ;;  %v3993_v52 = vld [vmem:[#allocation8 + $0x16c] ss:$16 sps:$4 sm:$0xff]  }
 0x42c   : > { %1422 = vmatprep.subr.bf16.mxu0 %v3640_v53  ;;  %1463 = vmatprep.subr.bf16.mxu1 %v3642_v54  ;;  %4758 = vst [vmem:[#allocation21_spill] sm:$0xff] %v3990_v51  ;;  %4759 = vst [vmem:[#allocation22_spill] sm:$0xff] %v3993_v52  ;;  %v3996_v53 = vld [vmem:[#allocation8 + $0x160] ss:$16 sps:$4 sm:$0xff]   ;;  %v3999_v54 = vld [vmem:[#allocation8 + $0x168] ss:$16 sps:$4 sm:$0xff]  }
 0x42d   : > { %4760 = vst [vmem:[#allocation23_spill] sm:$0xff] %v3996_v53  ;;  %4761 = vst [vmem:[#allocation24_spill] sm:$0xff] %v3999_v54 }
 0x42f   : > { %1423 = vmatpush1.bf16.msra.mxu0 %v3646_v55  ;;  %1464 = vmatpush1.bf16.msra.mxu1 %v3648_v56  ;;  %v4002_v55 = vld [vmem:[#allocation8 + $0x184] ss:$16 sps:$4 sm:$0xff]   ;;  %v4005_v56 = vld [vmem:[#allocation8 + $0x18c] ss:$16 sps:$4 sm:$0xff]  }
 0x430   : > { %1424 = vmatprep.subr.bf16.mxu0 %v3652_v57  ;;  %1465 = vmatprep.subr.bf16.mxu1 %v3654_v58  ;;  %4762 = vst [vmem:[#allocation25_spill] sm:$0xff] %v4002_v55  ;;  %4763 = vst [vmem:[#allocation26_spill] sm:$0xff] %v4005_v56  ;;  %v4008_v57 = vld [vmem:[#allocation8 + $0x180] ss:$16 sps:$4 sm:$0xff]   ;;  %v4011_v58 = vld [vmem:[#allocation8 + $0x188] ss:$16 sps:$4 sm:$0xff]  }
 0x431   : > { %4764 = vst [vmem:[#allocation27_spill] sm:$0xff] %v4008_v57  ;;  %4765 = vst [vmem:[#allocation28_spill] sm:$0xff] %v4011_v58 }
 0x433   : > { %1425 = vmatpush1.bf16.msra.mxu0 %v4702_v35  ;;  %1466 = vmatpush1.bf16.msra.mxu1 %v3660_v60  ;;  %v4017_v60 = vld [vmem:[#allocation8 + $0x1ac] ss:$16 sps:$4 sm:$0xff]   ;;  %v4032_v35 = vld [vmem:[#allocation8 + $0x1c0] ss:$16 sps:$4 sm:$0xff]  }
 0x434   : > { %1426 = vmatprep.subr.bf16.mxu0 %v3664_v61  ;;  %1467 = vmatprep.subr.bf16.mxu1 %v4703_v26  ;;  %4767 = vst [vmem:[#allocation30_spill] sm:$0xff] %v4017_v60  ;;  %v4020_v61 = vld [vmem:[#allocation8 + $0x1a0] ss:$16 sps:$4 sm:$0xff]   ;;  %4772 = vst [vmem:[#allocation35_spill] sm:$0xff] %v4032_v35  ;;  %v4035_v26 = vld [vmem:[#allocation8 + $0x1c8] ss:$16 sps:$4 sm:$0xff]  }
 0x435   : > { %4768 = vst [vmem:[#allocation31_spill] sm:$0xff] %v4020_v61  ;;  %4773 = vst [vmem:[#allocation36_spill] sm:$0xff] %v4035_v26 }
 0x437   : > { %1427 = vmatpush1.bf16.msra.mxu0 %v3670_v63  ;;  %1468 = vmatpush1.bf16.msra.mxu1 %v3672_v0  ;;  %v4023_v63 = vld [vmem:[#allocation8 + $0x1a8] ss:$16 sps:$4 sm:$0xff]   ;;  %v4026_v0 = vld [vmem:[#allocation8 + $0x1c4] ss:$16 sps:$4 sm:$0xff]  }
 0x438   : > { %1428 = vmatprep.subr.bf16.mxu0 %v3676_v1  ;;  %1469 = vmatprep.subr.bf16.mxu1 %v4704_v22  ;;  %4769 = vst [vmem:[#allocation32_spill] sm:$0xff] %v4023_v63  ;;  %4770 = vst [vmem:[#allocation33_spill] sm:$0xff] %v4026_v0  ;;  %v4029_v1 = vld [vmem:[#allocation8 + $0x1cc] ss:$16 sps:$4 sm:$0xff]   ;;  %v4038_v22 = vld [vmem:[#allocation8 + $0x1e4] ss:$16 sps:$4 sm:$0xff]  }
 0x439   : > { %4771 = vst [vmem:[#allocation34_spill] sm:$0xff] %v4029_v1  ;;  %4774 = vst [vmem:[#allocation37_spill] sm:$0xff] %v4038_v22 }
 0x43b   : > { %1429 = vmatpush1.bf16.msra.mxu0 %v3682_v4  ;;  %1470 = vmatpush1.bf16.msra.mxu1 %v3684_v59  ;;  %v3964_v4 = vld [vmem:[#allocation8 + $0x124] ss:$16 sps:$4 sm:$0xff]  }
 0x43c   : > { %1527 = vmatprep.subr.bf16.mxu0 %v3952_v40  ;;  %1568 = vmatprep.subr.bf16.mxu1 %v3955_v41  ;;  %v4014_v59 = vld [vmem:[#allocation8 + $0x1a4] ss:$16 sps:$4 sm:$0xff]  }
 0x43d   : > { %4766 = vst [vmem:[#allocation29_spill] sm:$0xff] %v4014_v59 }
 0x43e   : > { %1447 = vmatmul.mubr.bf16.vlgmr.msra.gmra.mrb[28].mxu0 %v2561_v39  ;;  %1488 = vmatmul.mubr.bf16.vlgmr.msra.gmra.mrb[28].mxu1 %v2561_v39 }
 0x43f   : > { %1528 = vmatpush1.bf16.msra.mxu0 %v3958_v42  ;;  %1569 = vmatpush1.bf16.msra.mxu1 %v3961_v43 }
 0x440   : > { %1529 = vmatprep.subr.bf16.mxu0 %v3964_v4  ;;  %1570 = vmatprep.subr.bf16.mxu1 %v3967_v44 }
 0x441   : > { %1559 = vmatprep.mubr.bf16.mxu0 %v4700_v38  ;;  %1600 = vmatprep.mubr.bf16.mxu1 %v4700_v38 }
 0x443   : > { %1530 = vmatpush1.bf16.msra.mxu0 %v3972_v45  ;;  %1571 = vmatpush1.bf16.msra.mxu1 %v3975_v46 }
 0x444   : > { %1531 = vmatprep.subr.bf16.mxu0 %v3978_v47  ;;  %1572 = vmatprep.subr.bf16.mxu1 %v3981_v48 }
 0x447   : > { %1532 = vmatpush1.bf16.msra.mxu0 %v3984_v49  ;;  %1573 = vmatpush1.bf16.msra.mxu1 %v3987_v50 }
 0x448   : > { %1533 = vmatprep.subr.bf16.mxu0 %v3990_v51  ;;  %1574 = vmatprep.subr.bf16.mxu1 %v3993_v52 }
 0x44b   : > { %1534 = vmatpush1.bf16.msra.mxu0 %v3996_v53  ;;  %1575 = vmatpush1.bf16.msra.mxu1 %v3999_v54 }
 0x44c   : > { %1535 = vmatprep.subr.bf16.mxu0 %v4002_v55  ;;  %1576 = vmatprep.subr.bf16.mxu1 %v4005_v56 }
 0x44f   : > { %1536 = vmatpush1.bf16.msra.mxu0 %v4008_v57  ;;  %1577 = vmatpush1.bf16.msra.mxu1 %v4011_v58 }
 0x450   : > { %1537 = vmatprep.subr.bf16.mxu0 %v4014_v59  ;;  %1578 = vmatprep.subr.bf16.mxu1 %v4017_v60 }
 0x453   : > { %1538 = vmatpush1.bf16.msra.mxu0 %v4020_v61  ;;  %1579 = vmatpush1.bf16.msra.mxu1 %v4023_v63 }
 0x454   : > { %1539 = vmatprep.subr.bf16.mxu0 %v4026_v0  ;;  %1580 = vmatprep.subr.bf16.mxu1 %v4029_v1 }
 0x457   : > { %1540 = vmatpush1.bf16.msra.mxu0 %v4032_v35  ;;  %1581 = vmatpush1.bf16.msra.mxu1 %v4035_v26 }
 0x458   : > { %1541 = vmatprep.subr.bf16.mxu0 %v4038_v22  ;;  %1582 = vmatprep.subr.bf16.mxu1 %v4041_v33 }
 0x45b   : > { %1542 = vmatpush1.bf16.msra.mxu0 %v4044_v36  ;;  %1583 = vmatpush1.bf16.msra.mxu1 %v4047_v13 }
 0x45c   : > { %1609 = vmatprep.subr.bf16.mxu0 %v4751_v34  ;;  %1650 = vmatprep.subr.bf16.mxu1 %v4752_v29 }
 0x4f1   : > { %v1366_v24 = vpop.f32.mrb[24].mxu0  ;;  %v1407_v37 = vpop.f32.mrb[24].mxu1 }
 0x4f2   : > { %v1368_v27 = vpop.f32.mrb[25].mxu0  ;;  %v1409_v28 = vpop.f32.mrb[25].mxu1 }
 0x4f3   : > { %v1370_v31 = vpop.f32.mrb[26].mxu0  ;;  %v1411_v32 = vpop.f32.mrb[26].mxu1 }
 0x4f4   : > { %v1371_v18 = vpop.f32.mrb[27].mxu0  ;;  %v1412_v2 = vpop.f32.mrb[27].mxu1  ;;  %v1520_v32 = vstv %s1519_s17 }
 0x4f5   : > { %vm1521_vm3 = vcmp.eq.s32.totalorder %v1520_v32, 1  ;;  %v4126_v32 = vld [vmem:[#allocation8 + $0xac] ss:$16 sps:$4 sm:$0xff]  }
 0x511   : > { %v1448_v3 = vpop.f32.mrb[28].mxu0  ;;  %v1489_v17 = vpop.f32.mrb[28].mxu1 }
 0x512   : > { %v1449_v5 = vadd.f32 %v1448_v3, %v1366_v24  ;;  %v1490_v6 = vadd.f32 %v1489_v17, %v1407_v37  ;;  %v1450_v7 = vpop.f32.mrb[29].mxu0  ;;  %v1491_v8 = vpop.f32.mrb[29].mxu1 }
 0x513   : > { %v1451_v30 = vadd.f32 %v1450_v7, %v1368_v27  ;;  %v1492_v19 = vadd.f32 %v1491_v8, %v1409_v28  ;;  %v1452_v34 = vpop.f32.mrb[30].mxu0  ;;  %v1493_v14 = vpop.f32.mrb[30].mxu1 }
 0x514   : > { %v1496_v29 = vadd.f32 %v1449_v5, %v3727_v23  ;;  %v1453_v12 = vpop.f32.mrb[31].mxu0  ;;  %v1494_v11 = vpop.f32.mrb[31].mxu1  ;;  %v1498_v25 = vadd.f32 %v1490_v6, %v4725_v16  ;;  %v4073_v34 = vld [vmem:[#allocation8 + $0x24] ss:$16 sps:$4 sm:$0xff]   ;;  %v4076_v14 = vld [vmem:[#allocation8 + $0x2c] ss:$16 sps:$4 sm:$0xff]  }
 0x515   : > { %v1497_v10 = vadd.f32 %v1451_v30, %v3729_v21  ;;  %v1499_v15 = vadd.f32 %v1492_v19, %v3731_v20  ;;  %v4067_v19 = vld [vmem:[#allocation8] ss:$16 sps:$4 sm:$0xff]   ;;  %v4087_v12 = vld [vmem:[#allocation8 + $0x44] ss:$16 sps:$4 sm:$0xff]   ;;  %v4090_v11 = vld [vmem:[#allocation8 + $0x4c] ss:$16 sps:$4 sm:$0xff]  }
 0x516   : > { %2816 = vtanh.f32 %v1496_v29  ;;  %v4084_v29 = vld [vmem:[#allocation8 + $0x28] ss:$16 sps:$4 sm:$0xff]  }
 0x517   : > { %2818 = vtanh.f32 %v1497_v10  ;;  %v4093_v10 = vld [vmem:[#allocation8 + $0x40] ss:$16 sps:$4 sm:$0xff]  }
 0x518   : > { %2820 = vtanh.f32 %v1499_v15  ;;  %v4096_v15 = vld [vmem:[#allocation8 + $0x48] ss:$16 sps:$4 sm:$0xff]  }
 0x519   : > { %2822 = vtanh.f32 %v1498_v25  ;;  %v4099_v25 = vld [vmem:[#allocation8 + $0x64] ss:$16 sps:$4 sm:$0xff]  }
 0x520   : > { %v2817_v39 = vpop.eup %2816 }
 0x521   : > { %v1504_v24 = vmul.f32 0.5, %v2817_v39  ;;  %v2819_v37 = vpop.eup %2818  ;;  %v4102_v39 = vld [vmem:[#allocation8 + $0x6c] ss:$16 sps:$4 sm:$0xff]  }
 0x522   : > { %v1506_v23 = vmul.f32 0.5, %v2819_v37  ;;  %v2821_v28 = vpop.eup %2820  ;;  %v4108_v37 = vld [vmem:[#allocation8 + $0x68] ss:$16 sps:$4 sm:$0xff]  }
 0x523   : > { %v1505_v27 = vadd.f32 0.5, %v1504_v24  ;;  %v2823_v3 = vpop.eup %2822  ;;  %v4105_v24 = vld [vmem:[#allocation8 + $0x60] ss:$16 sps:$4 sm:$0xff]  }
 0x524   : > { %v1507_v31 = vadd.f32 0.5, %v1506_v23  ;;  %v1508_v17 = vmul.f32 0.5, %v2823_v3  ;;  %v4114_v23 = vld [vmem:[#allocation8 + $0x8c] ss:$16 sps:$4 sm:$0xff]   ;;  %v4135_v3 = vld [vmem:[#allocation8 + $0xc4] ss:$16 sps:$4 sm:$0xff]  }
 0x525   : > { %v1511_v21 = vmul.f32 %v2821_v28, %v1505_v27  ;;  %v4111_v27 = vld [vmem:[#allocation8 + $0x84] ss:$16 sps:$4 sm:$0xff]   ;;  %v4117_v28 = vld [vmem:[#allocation8 + $0x80] ss:$16 sps:$4 sm:$0xff]   ;;  %4778 = vst [vmem:[#allocation41_spill] sm:$0xff] %v4135_v3 }
 0x526   : > { %v1510_v20 = vmul.f32 %v1507_v31, %v3911_v9  ;;  %v1509_v5 = vadd.f32 0.5, %v1508_v17  ;;  %v4120_v31 = vld [vmem:[#allocation8 + $0x88] ss:$16 sps:$4 sm:$0xff]   ;;  %v4138_v17 = vld [vmem:[#allocation8 + $0xcc] ss:$16 sps:$4 sm:$0xff]  }
 0x527   : > { %4779 = vst [vmem:[#allocation42_spill] sm:$0xff] %v4138_v17 }
 0x528   : > { %v1512_v18 = vadd.f32 %v1511_v21, %v1510_v20  ;;  %v4123_v21 = vld [vmem:[#allocation8 + $0xa4] ss:$16 sps:$4 sm:$0xff]   ;;  %v4129_v20 = vld [vmem:[#allocation8 + $0xa0] ss:$16 sps:$4 sm:$0xff]  }
 0x52a   : > { %2824 = vtanh.f32 %v1512_v18  ;;  %v4059_v2 = vsel %vm1521_vm3, %v1512_v18, %v3911_v9  ;;  %v4070_v9 = vld [vmem:[#allocation8 + $0x8] ss:$16 sps:$4 sm:$0xff]  }
 0x52b   : > { %v4132_v18 = vld [vmem:[#allocation8 + $0xa8] ss:$16 sps:$4 sm:$0xff]  }
 0x534   : > { %v2825_v6 = vpop.eup %2824 }
 0x535   : > { %v1514_v7 = vmul.f32 %v2825_v6, %v1509_v5  ;;  %v4141_v5 = vld [vmem:[#allocation8 + $0xc0] ss:$16 sps:$4 sm:$0xff]   ;;  %v4144_v6 = vld [vmem:[#allocation8 + $0xc8] ss:$16 sps:$4 sm:$0xff]  }
 0x536   : > { %4780 = vst [vmem:[#allocation43_spill] sm:$0xff] %v4141_v5 }
 0x537   : > { %2562 = vst [vmem:[%s3486_s29 + $0x18] sm:$0xff] %v1514_v7  ;;  %v4063_v8 = vsel %vm1521_vm3, %v1514_v7, %v3915_v62  ;;  %v4081_v62 = vld [vmem:[#allocation8 + $0x20] ss:$16 sps:$4 sm:$0xff]   ;;  %v4147_v7 = vld [vmem:[#allocation8 + $0xe4] ss:$16 sps:$4 sm:$0xff]  }
 0x538   : > { %v1526_v30 = vpack.c.bf16 %v4063_v8, %v4063_v8 }
 0x53a   : > { %1560 = vmatmul.mubr.bf16.vlgmr.msra.gmra.mrb[32].mxu0 %v1526_v30  ;;  %1601 = vmatmul.mubr.bf16.vlgmr.msra.gmra.mrb[32].mxu1 %v1526_v30  ;;  %v4150_v30 = vld [vmem:[#allocation8 + $0xec] ss:$16 sps:$4 sm:$0xff]  }
 0x53b   : > { %1610 = vmatpush1.bf16.msra.mxu0 %v4067_v19  ;;  %1651 = vmatpush1.bf16.msra.mxu1 %v4070_v9 }
 0x53c   : > { %1611 = vmatprep.subr.bf16.mxu0 %v4073_v34  ;;  %1652 = vmatprep.subr.bf16.mxu1 %v4076_v14 }
 0x53d   : > { %1641 = vmatprep.mubr.bf16.mxu0 %v4700_v38  ;;  %1682 = vmatprep.mubr.bf16.mxu1 %v4700_v38 }
 0x53f   : > { %1612 = vmatpush1.bf16.msra.mxu0 %v4081_v62  ;;  %1653 = vmatpush1.bf16.msra.mxu1 %v4084_v29 }
 0x540   : > { %1613 = vmatprep.subr.bf16.mxu0 %v4087_v12  ;;  %1654 = vmatprep.subr.bf16.mxu1 %v4090_v11 }
 0x543   : > { %1614 = vmatpush1.bf16.msra.mxu0 %v4093_v10  ;;  %1655 = vmatpush1.bf16.msra.mxu1 %v4096_v15 }
 0x544   : > { %1615 = vmatprep.subr.bf16.mxu0 %v4099_v25  ;;  %1656 = vmatprep.subr.bf16.mxu1 %v4102_v39 }
 0x547   : > { %1616 = vmatpush1.bf16.msra.mxu0 %v4105_v24  ;;  %1657 = vmatpush1.bf16.msra.mxu1 %v4108_v37 }
 0x548   : > { %1617 = vmatprep.subr.bf16.mxu0 %v4111_v27  ;;  %1658 = vmatprep.subr.bf16.mxu1 %v4114_v23 }
 0x54b   : > { %1618 = vmatpush1.bf16.msra.mxu0 %v4117_v28  ;;  %1659 = vmatpush1.bf16.msra.mxu1 %v4120_v31 }
 0x54c   : > { %1619 = vmatprep.subr.bf16.mxu0 %v4123_v21  ;;  %1660 = vmatprep.subr.bf16.mxu1 %v4126_v32 }
 0x54f   : > { %1620 = vmatpush1.bf16.msra.mxu0 %v4129_v20  ;;  %1661 = vmatpush1.bf16.msra.mxu1 %v4132_v18 }
 0x550   : > { %1621 = vmatprep.subr.bf16.mxu0 %v4135_v3  ;;  %1662 = vmatprep.subr.bf16.mxu1 %v4138_v17  ;;  %v4153_v3 = vld [vmem:[#allocation8 + $0xe0] ss:$16 sps:$4 sm:$0xff]   ;;  %v4156_v17 = vld [vmem:[#allocation8 + $0xe8] ss:$16 sps:$4 sm:$0xff]  }
 0x553   : > { %1622 = vmatpush1.bf16.msra.mxu0 %v4141_v5  ;;  %1663 = vmatpush1.bf16.msra.mxu1 %v4144_v6  ;;  %v2563_v5 = vld [vmem:[%s3471_s11 + $0x10] sm:$0xf] }
 0x554   : > { %1623 = vmatprep.subr.bf16.mxu0 %v4147_v7  ;;  %1664 = vmatprep.subr.bf16.mxu1 %v4150_v30 }
 0x557   : > { %1624 = vmatpush1.bf16.msra.mxu0 %v4153_v3  ;;  %1665 = vmatpush1.bf16.msra.mxu1 %v4156_v17 }
 0x558   : > { %1722 = vmatprep.subr.bf16.mxu0 %v3952_v40  ;;  %1763 = vmatprep.subr.bf16.mxu1 %v3955_v41 }
 0x55a   : > { %1642 = vmatmul.mubr.bf16.vlgmr.msra.gmra.mrb[36].mxu0 %v2563_v5  ;;  %1683 = vmatmul.mubr.bf16.vlgmr.msra.gmra.mrb[36].mxu1 %v2563_v5  ;;  %v4194_v5 = vld [vmem:[#allocation8 + $0x4] ss:$16 sps:$4 sm:$0xff]  }
 0x55b   : > { %1723 = vmatpush1.bf16.msra.mxu0 %v3958_v42  ;;  %1764 = vmatpush1.bf16.msra.mxu1 %v3961_v43  ;;  %4781 = vst [vmem:[#allocation44_spill] sm:$0xff] %v4194_v5 }
 0x55c   : > { %1724 = vmatprep.subr.bf16.mxu0 %v3964_v4  ;;  %1765 = vmatprep.subr.bf16.mxu1 %v3967_v44 }
 0x55d   : > { %1754 = vmatprep.mubr.bf16.mxu0 %v4700_v38  ;;  %1795 = vmatprep.mubr.bf16.mxu1 %v4700_v38 }
 0x55f   : > { %1725 = vmatpush1.bf16.msra.mxu0 %v3972_v45  ;;  %1766 = vmatpush1.bf16.msra.mxu1 %v3975_v46 }
 0x560   : > { %1726 = vmatprep.subr.bf16.mxu0 %v3978_v47  ;;  %1767 = vmatprep.subr.bf16.mxu1 %v3981_v48 }
 0x563   : > { %1727 = vmatpush1.bf16.msra.mxu0 %v3984_v49  ;;  %1768 = vmatpush1.bf16.msra.mxu1 %v3987_v50 }
 0x564   : > { %1728 = vmatprep.subr.bf16.mxu0 %v3990_v51  ;;  %1769 = vmatprep.subr.bf16.mxu1 %v3993_v52 }
 0x567   : > { %1729 = vmatpush1.bf16.msra.mxu0 %v3996_v53  ;;  %1770 = vmatpush1.bf16.msra.mxu1 %v3999_v54 }
 0x568   : > { %1730 = vmatprep.subr.bf16.mxu0 %v4002_v55  ;;  %1771 = vmatprep.subr.bf16.mxu1 %v4005_v56 }
 0x56b   : > { %1731 = vmatpush1.bf16.msra.mxu0 %v4008_v57  ;;  %1772 = vmatpush1.bf16.msra.mxu1 %v4011_v58 }
 0x56c   : > { %1732 = vmatprep.subr.bf16.mxu0 %v4014_v59  ;;  %1773 = vmatprep.subr.bf16.mxu1 %v4017_v60 }
 0x56f   : > { %1733 = vmatpush1.bf16.msra.mxu0 %v4020_v61  ;;  %1774 = vmatpush1.bf16.msra.mxu1 %v4023_v63  ;;  %v4197_v63 = vld [vmem:[#allocation8 + $0xc] ss:$16 sps:$4 sm:$0xff]  }
 0x570   : > { %1734 = vmatprep.subr.bf16.mxu0 %v4026_v0  ;;  %1775 = vmatprep.subr.bf16.mxu1 %v4029_v1  ;;  %4782 = vst [vmem:[#allocation45_spill] sm:$0xff] %v4197_v63 }
 0x573   : > { %1735 = vmatpush1.bf16.msra.mxu0 %v4032_v35  ;;  %1776 = vmatpush1.bf16.msra.mxu1 %v4035_v26 }
 0x574   : > { %1736 = vmatprep.subr.bf16.mxu0 %v4038_v22  ;;  %1777 = vmatprep.subr.bf16.mxu1 %v4041_v33 }
 0x577   : > { %1737 = vmatpush1.bf16.msra.mxu0 %v4044_v36  ;;  %1778 = vmatpush1.bf16.msra.mxu1 %v4047_v13 }
 0x578   : > { %1804 = vmatprep.subr.bf16.mxu0 %v4194_v5  ;;  %1845 = vmatprep.subr.bf16.mxu1 %v4197_v63  ;;  %v4200_v63 = vld [vmem:[#allocation10] sm:$0xff] }
 0x60d   : > { %v1561_v1 = vpop.f32.mrb[32].mxu0  ;;  %v1602_v35 = vpop.f32.mrb[32].mxu1 }
 0x60e   : > { %v1563_v0 = vpop.f32.mrb[33].mxu0  ;;  %v1604_v26 = vpop.f32.mrb[33].mxu1 }
 0x60f   : > { %v1565_v61 = vpop.f32.mrb[34].mxu0  ;;  %v1606_v22 = vpop.f32.mrb[34].mxu1 }
 0x610   : > { %v1566_v60 = vpop.f32.mrb[35].mxu0  ;;  %v1607_v33 = vpop.f32.mrb[35].mxu1  ;;  %v4203_v22 = vld [vmem:[#allocation10 + $0x8] sm:$0xff] }
 0x62d   : > { %v1643_v59 = vpop.f32.mrb[36].mxu0  ;;  %v1684_v36 = vpop.f32.mrb[36].mxu1 }
 0x62e   : > { %v1644_v58 = vadd.f32 %v1643_v59, %v1561_v1  ;;  %v1685_v13 = vadd.f32 %v1684_v36, %v1602_v35  ;;  %v1645_v57 = vpop.f32.mrb[37].mxu0  ;;  %v1686_v56 = vpop.f32.mrb[37].mxu1  ;;  %v4206_v59 = vld [vmem:[#allocation10 + $0x18] sm:$0xff] }
 0x62f   : > { %v1646_v5 = vadd.f32 %v1645_v57, %v1563_v0  ;;  %v1687_v55 = vadd.f32 %v1686_v56, %v1604_v26  ;;  %v1647_v54 = vpop.f32.mrb[38].mxu0  ;;  %v1688_v53 = vpop.f32.mrb[38].mxu1  ;;  %v1715_v26 = vstv %s1714_s19 }
 0x630   : > { %v1691_v52 = vadd.f32 %v4200_v63, %v1644_v58  ;;  %v1648_v51 = vpop.f32.mrb[39].mxu0  ;;  %v1689_v61 = vpop.f32.mrb[39].mxu1  ;;  %v1693_v53 = vadd.f32 %v1685_v13, %v4725_v16  ;;  %vm1716_vm4 = vcmp.eq.s32.totalorder %v1715_v26, 1  ;;  %v4792_v26 = vld [vmem:[#allocation27_spill] sm:$0xff] }
 0x631   : > { %v1692_v60 = vadd.f32 %v4203_v22, %v1646_v5  ;;  %v1694_v1 = vadd.f32 %v4206_v59, %v1687_v55 }
 0x632   : > { %2826 = vtanh.f32 %v1691_v52 }
 0x633   : > { %2828 = vtanh.f32 %v1692_v60 }
 0x634   : > { %2830 = vtanh.f32 %v1694_v1 }
 0x635   : > { %2832 = vtanh.f32 %v1693_v53 }
 0x63c   : > { %v2827_v54 = vpop.eup %2826 }
 0x63d   : > { %v1699_v56 = vmul.f32 0.5, %v2827_v54  ;;  %v2829_v51 = vpop.eup %2828  ;;  %v4785_v54 = vld [vmem:[#allocation43_spill] sm:$0xff] }
 0x63e   : > { %v1701_v58 = vmul.f32 0.5, %v2829_v51  ;;  %v2831_v0 = vpop.eup %2830  ;;  %v4786_v51 = vld [vmem:[#allocation21_spill] sm:$0xff] }
 0x63f   : > { %v1700_v57 = vadd.f32 0.5, %v1699_v56  ;;  %v2833_v16 = vpop.eup %2832  ;;  %v2565_v56 = vld [vmem:[%s3471_s11 + $0x14] sm:$0xf] }
 0x640   : > { %v1702_v52 = vadd.f32 0.5, %v1701_v58  ;;  %v1703_v13 = vmul.f32 0.5, %v2833_v16  ;;  %v4788_v58 = vld [vmem:[#allocation23_spill] sm:$0xff]  ;;  %v4795_v16 = vld [vmem:[#allocation30_spill] sm:$0xff] }
 0x641   : > { %v1706_v35 = vmul.f32 %v2831_v0, %v1700_v57  ;;  %v4787_v57 = vld [vmem:[#allocation22_spill] sm:$0xff]  ;;  %v4789_v0 = vld [vmem:[#allocation24_spill] sm:$0xff] }
 0x642   : > { %v1705_v55 = vmul.f32 %v1702_v52, %v4059_v2  ;;  %v1704_v5 = vadd.f32 0.5, %v1703_v13  ;;  %v4790_v52 = vld [vmem:[#allocation25_spill] sm:$0xff]  ;;  %v4796_v13 = vld [vmem:[#allocation31_spill] sm:$0xff] }
 0x644   : > { %v1707_v33 = vadd.f32 %v1706_v35, %v1705_v55  ;;  %v4791_v35 = vld [vmem:[#allocation26_spill] sm:$0xff]  ;;  %v4793_v55 = vld [vmem:[#allocation28_spill] sm:$0xff] }
 0x646   : > { %2834 = vtanh.f32 %v1707_v33  ;;  %v4213_v36 = vsel %vm1716_vm4, %v1707_v33, %v4059_v2  ;;  %v4783_v2 = vld [vmem:[#allocation41_spill] sm:$0xff] }
 0x647   : > { %v4794_v33 = vld [vmem:[#allocation29_spill] sm:$0xff] }
 0x650   : > { %v2835_v61 = vpop.eup %2834 }
 0x651   : > { %v1709_v60 = vmul.f32 %v2835_v61, %v1704_v5  ;;  %v4797_v5 = vld [vmem:[#allocation32_spill] sm:$0xff]  ;;  %v4798_v61 = vld [vmem:[#allocation33_spill] sm:$0xff] }
 0x653   : > { %2564 = vst [vmem:[%s3486_s29 + $0x20] sm:$0xff] %v1709_v60  ;;  %v4217_v1 = vsel %vm1716_vm4, %v1709_v60, %v4063_v8  ;;  %v4784_v8 = vld [vmem:[#allocation42_spill] sm:$0xff] }
 0x654   : > { %v1721_v53 = vpack.c.bf16 %v4217_v1, %v4217_v1  ;;  %v4799_v60 = vld [vmem:[#allocation34_spill] sm:$0xff] }
 0x656   : > { %1755 = vmatmul.mubr.bf16.vlgmr.msra.gmra.mrb[40].mxu0 %v1721_v53  ;;  %1796 = vmatmul.mubr.bf16.vlgmr.msra.gmra.mrb[40].mxu1 %v1721_v53  ;;  %v4800_v53 = vld [vmem:[#allocation35_spill] sm:$0xff] }
 0x657   : > { %1805 = vmatpush1.bf16.msra.mxu0 %v4067_v19  ;;  %1846 = vmatpush1.bf16.msra.mxu1 %v4070_v9 }
 0x658   : > { %1806 = vmatprep.subr.bf16.mxu0 %v4073_v34  ;;  %1847 = vmatprep.subr.bf16.mxu1 %v4076_v14 }
 0x659   : > { %1836 = vmatprep.mubr.bf16.mxu0 %v4700_v38  ;;  %1877 = vmatprep.mubr.bf16.mxu1 %v4700_v38 }
 0x65b   : > { %1807 = vmatpush1.bf16.msra.mxu0 %v4081_v62  ;;  %1848 = vmatpush1.bf16.msra.mxu1 %v4084_v29 }
 0x65c   : > { %1808 = vmatprep.subr.bf16.mxu0 %v4087_v12  ;;  %1849 = vmatprep.subr.bf16.mxu1 %v4090_v11 }
 0x65f   : > { %1809 = vmatpush1.bf16.msra.mxu0 %v4093_v10  ;;  %1850 = vmatpush1.bf16.msra.mxu1 %v4096_v15 }
 0x660   : > { %1810 = vmatprep.subr.bf16.mxu0 %v4099_v25  ;;  %1851 = vmatprep.subr.bf16.mxu1 %v4102_v39 }
 0x663   : > { %1811 = vmatpush1.bf16.msra.mxu0 %v4105_v24  ;;  %1852 = vmatpush1.bf16.msra.mxu1 %v4108_v37 }
 0x664   : > { %1812 = vmatprep.subr.bf16.mxu0 %v4111_v27  ;;  %1853 = vmatprep.subr.bf16.mxu1 %v4114_v23 }
 0x667   : > { %1813 = vmatpush1.bf16.msra.mxu0 %v4117_v28  ;;  %1854 = vmatpush1.bf16.msra.mxu1 %v4120_v31 }
 0x668   : > { %1814 = vmatprep.subr.bf16.mxu0 %v4123_v21  ;;  %1855 = vmatprep.subr.bf16.mxu1 %v4126_v32 }
 0x66b   : > { %1815 = vmatpush1.bf16.msra.mxu0 %v4129_v20  ;;  %1856 = vmatpush1.bf16.msra.mxu1 %v4132_v18 }
 0x66c   : > { %1816 = vmatprep.subr.bf16.mxu0 %v4783_v2  ;;  %1857 = vmatprep.subr.bf16.mxu1 %v4784_v8 }
 0x66f   : > { %1817 = vmatpush1.bf16.msra.mxu0 %v4785_v54  ;;  %1858 = vmatpush1.bf16.msra.mxu1 %v4144_v6 }
 0x670   : > { %1818 = vmatprep.subr.bf16.mxu0 %v4147_v7  ;;  %1859 = vmatprep.subr.bf16.mxu1 %v4150_v30 }
 0x673   : > { %1819 = vmatpush1.bf16.msra.mxu0 %v4153_v3  ;;  %1860 = vmatpush1.bf16.msra.mxu1 %v4156_v17 }
 0x674   : > { %1917 = vmatprep.subr.bf16.mxu0 %v3952_v40  ;;  %1958 = vmatprep.subr.bf16.mxu1 %v3955_v41 }
 0x676   : > { %1837 = vmatmul.mubr.bf16.vlgmr.msra.gmra.mrb[44].mxu0 %v2565_v56  ;;  %1878 = vmatmul.mubr.bf16.vlgmr.msra.gmra.mrb[44].mxu1 %v2565_v56  ;;  %v4801_v56 = vld [vmem:[#allocation36_spill] sm:$0xff] }
 0x677   : > { %1918 = vmatpush1.bf16.msra.mxu0 %v3958_v42  ;;  %1959 = vmatpush1.bf16.msra.mxu1 %v3961_v43 }
 0x678   : > { %1919 = vmatprep.subr.bf16.mxu0 %v3964_v4  ;;  %1960 = vmatprep.subr.bf16.mxu1 %v3967_v44 }
 0x679   : > { %1949 = vmatprep.mubr.bf16.mxu0 %v4700_v38  ;;  %1990 = vmatprep.mubr.bf16.mxu1 %v4700_v38 }
 0x67b   : > { %1920 = vmatpush1.bf16.msra.mxu0 %v3972_v45  ;;  %1961 = vmatpush1.bf16.msra.mxu1 %v3975_v46 }
 0x67c   : > { %1921 = vmatprep.subr.bf16.mxu0 %v3978_v47  ;;  %1962 = vmatprep.subr.bf16.mxu1 %v3981_v48 }
 0x67f   : > { %1922 = vmatpush1.bf16.msra.mxu0 %v3984_v49  ;;  %1963 = vmatpush1.bf16.msra.mxu1 %v3987_v50 }
 0x680   : > { %1923 = vmatprep.subr.bf16.mxu0 %v4786_v51  ;;  %1964 = vmatprep.subr.bf16.mxu1 %v4787_v57 }
 0x683   : > { %1924 = vmatpush1.bf16.msra.mxu0 %v4788_v58  ;;  %1965 = vmatpush1.bf16.msra.mxu1 %v4789_v0 }
 0x684   : > { %1925 = vmatprep.subr.bf16.mxu0 %v4790_v52  ;;  %1966 = vmatprep.subr.bf16.mxu1 %v4791_v35  ;;  %v4802_v35 = vld [vmem:[#allocation37_spill] sm:$0xff] }
 0x687   : > { %1926 = vmatpush1.bf16.msra.mxu0 %v4792_v26  ;;  %1967 = vmatpush1.bf16.msra.mxu1 %v4793_v55  ;;  %v4803_v26 = vld [vmem:[#allocation38_spill] sm:$0xff]  ;;  %v4804_v55 = vld [vmem:[#allocation39_spill] sm:$0xff] }
 0x688   : > { %1927 = vmatprep.subr.bf16.mxu0 %v4794_v33  ;;  %1968 = vmatprep.subr.bf16.mxu1 %v4795_v16  ;;  %v4805_v33 = vld [vmem:[#allocation40_spill] sm:$0xff] }
 0x689   : > { %v4806_v16 = vld [vmem:[#allocation44_spill] sm:$0xff] }
 0x68b   : > { %1928 = vmatpush1.bf16.msra.mxu0 %v4796_v13  ;;  %1969 = vmatpush1.bf16.msra.mxu1 %v4797_v5  ;;  %v4807_v13 = vld [vmem:[#allocation45_spill] sm:$0xff] }
 0x68c   : > { %1929 = vmatprep.subr.bf16.mxu0 %v4798_v61  ;;  %1970 = vmatprep.subr.bf16.mxu1 %v4799_v60 }
 0x68f   : > { %1930 = vmatpush1.bf16.msra.mxu0 %v4800_v53  ;;  %1971 = vmatpush1.bf16.msra.mxu1 %v4801_v56 }
 0x690   : > { %1931 = vmatprep.subr.bf16.mxu0 %v4802_v35  ;;  %1972 = vmatprep.subr.bf16.mxu1 %v4803_v26 }
 0x693   : > { %1932 = vmatpush1.bf16.msra.mxu0 %v4804_v55  ;;  %1973 = vmatpush1.bf16.msra.mxu1 %v4805_v33 }
 0x694   : > { %1999 = vmatprep.subr.bf16.mxu0 %v4806_v16  ;;  %2040 = vmatprep.subr.bf16.mxu1 %v4807_v13 }
 0x729   : > { %v1756_v5 = vpop.f32.mrb[40].mxu0  ;;  %v1797_v61 = vpop.f32.mrb[40].mxu1 }
 0x72a   : > { %v1758_v52 = vpop.f32.mrb[41].mxu0  ;;  %v1799_v60 = vpop.f32.mrb[41].mxu1 }
 0x72b   : > { %v1760_v0 = vpop.f32.mrb[42].mxu0  ;;  %v1801_v53 = vpop.f32.mrb[42].mxu1 }
 0x72c   : > { %v1761_v58 = vpop.f32.mrb[43].mxu0  ;;  %v1802_v56 = vpop.f32.mrb[43].mxu1 }
 0x749   : > { %v1838_v57 = vpop.f32.mrb[44].mxu0  ;;  %v1879_v35 = vpop.f32.mrb[44].mxu1 }
 0x74a   : > { %v1839_v51 = vadd.f32 %v1838_v57, %v1756_v5  ;;  %v1880_v26 = vadd.f32 %v1879_v35, %v1797_v61  ;;  %v1840_v55 = vpop.f32.mrb[45].mxu0  ;;  %v1881_v50 = vpop.f32.mrb[45].mxu1  ;;  %v4294_v57 = vld [vmem:[#allocation10 + $0x10] sm:$0xff] }
 0x74b   : > { %v1841_v33 = vadd.f32 %v1840_v55, %v1758_v52  ;;  %v1882_v49 = vadd.f32 %v1881_v50, %v1799_v60  ;;  %v1842_v16 = vpop.f32.mrb[46].mxu0  ;;  %v1883_v48 = vpop.f32.mrb[46].mxu1 }
 0x74c   : > { %v1886_v13 = vadd.f32 %v4200_v63, %v1839_v51  ;;  %v1843_v47 = vpop.f32.mrb[47].mxu0  ;;  %v1884_v46 = vpop.f32.mrb[47].mxu1  ;;  %v1888_v52 = vadd.f32 %v4294_v57, %v1880_v26 }
 0x74d   : > { %v1887_v0 = vadd.f32 %v4203_v22, %v1841_v33  ;;  %v1889_v58 = vadd.f32 %v4206_v59, %v1882_v49  ;;  %v1910_v49 = vstv %s1909_s16 }
 0x74e   : > { %2836 = vtanh.f32 %v1886_v13  ;;  %vm1911_vm5 = vcmp.eq.s32.totalorder %v1910_v49, 1  ;;  %v4825_v49 = vld [vmem:[#allocation33_spill] sm:$0xff] }
 0x74f   : > { %2838 = vtanh.f32 %v1887_v0 }
 0x750   : > { %2840 = vtanh.f32 %v1889_v58 }
 0x751   : > { %2842 = vtanh.f32 %v1888_v52  ;;  %v4811_v52 = vld [vmem:[#allocation50_spill] sm:$0xff] }
 0x758   : > { %v2837_v50 = vpop.eup %2836 }
 0x759   : > { %v1894_v35 = vmul.f32 0.5, %v2837_v50  ;;  %v2839_v48 = vpop.eup %2838  ;;  %v4816_v50 = vld [vmem:[#allocation24_spill] sm:$0xff] }
 0x75a   : > { %v1896_v46 = vmul.f32 0.5, %v2839_v48  ;;  %v2841_v47 = vpop.eup %2840  ;;  %v4819_v48 = vld [vmem:[#allocation27_spill] sm:$0xff] }
 0x75b   : > { %v1895_v51 = vadd.f32 0.5, %v1894_v35  ;;  %v2843_v26 = vpop.eup %2842  ;;  %v4817_v35 = vld [vmem:[#allocation25_spill] sm:$0xff] }
 0x75c   : > { %v1897_v55 = vadd.f32 0.5, %v1896_v46  ;;  %v1898_v61 = vmul.f32 0.5, %v2843_v26  ;;  %v4821_v46 = vld [vmem:[#allocation29_spill] sm:$0xff]  ;;  %v4828_v26 = vld [vmem:[#allocation36_spill] sm:$0xff] }
 0x75d   : > { %v1901_v33 = vmul.f32 %v2841_v47, %v1895_v51  ;;  %v4820_v51 = vld [vmem:[#allocation28_spill] sm:$0xff]  ;;  %v4822_v47 = vld [vmem:[#allocation30_spill] sm:$0xff] }
 0x75e   : > { %v1900_v16 = vmul.f32 %v1897_v55, %v4213_v36  ;;  %v1899_v60 = vadd.f32 0.5, %v1898_v61  ;;  %v4823_v55 = vld [vmem:[#allocation31_spill] sm:$0xff]  ;;  %v4829_v61 = vld [vmem:[#allocation37_spill] sm:$0xff] }
 0x760   : > { %v1902_v13 = vadd.f32 %v1901_v33, %v1900_v16  ;;  %v4824_v33 = vld [vmem:[#allocation32_spill] sm:$0xff]  ;;  %v4826_v16 = vld [vmem:[#allocation34_spill] sm:$0xff] }
 0x762   : > { %2844 = vtanh.f32 %v1902_v13  ;;  %v4299_v5 = vsel %vm1911_vm5, %v1902_v13, %v4213_v36  ;;  %v2567_v36 = vld [vmem:[%s3471_s11 + $0x18] sm:$0xf] }
 0x763   : > { %v4827_v13 = vld [vmem:[#allocation35_spill] sm:$0xff] }
 0x76c   : > { %v2845_v53 = vpop.eup %2844 }
 0x76d   : > { %v1904_v56 = vmul.f32 %v2845_v53, %v1899_v60  ;;  %v4830_v60 = vld [vmem:[#allocation38_spill] sm:$0xff]  ;;  %v4831_v53 = vld [vmem:[#allocation39_spill] sm:$0xff] }
 0x76f   : > { %2566 = vst [vmem:[%s3486_s29 + $0x28] sm:$0xff] %v1904_v56  ;;  %v4303_v0 = vsel %vm1911_vm5, %v1904_v56, %v4217_v1  ;;  %v4808_v1 = vld [vmem:[#allocation47_spill] sm:$0xff]  ;;  %v4832_v56 = vld [vmem:[#allocation40_spill] sm:$0xff] }
 0x770   : > { %v1916_v58 = vpack.c.bf16 %v4303_v0, %v4303_v0 }
 0x772   : > { %1950 = vmatmul.mubr.bf16.vlgmr.msra.gmra.mrb[48].mxu0 %v1916_v58  ;;  %1991 = vmatmul.mubr.bf16.vlgmr.msra.gmra.mrb[48].mxu1 %v1916_v58  ;;  %v4833_v58 = vld [vmem:[#allocation44_spill] sm:$0xff] }
 0x773   : > { %2000 = vmatpush1.bf16.msra.mxu0 %v4067_v19  ;;  %2041 = vmatpush1.bf16.msra.mxu1 %v4070_v9 }
 0x774   : > { %2001 = vmatprep.subr.bf16.mxu0 %v4073_v34  ;;  %2042 = vmatprep.subr.bf16.mxu1 %v4076_v14 }
 0x775   : > { %2031 = vmatprep.mubr.bf16.mxu0 %v4700_v38  ;;  %2072 = vmatprep.mubr.bf16.mxu1 %v4700_v38 }
 0x777   : > { %2002 = vmatpush1.bf16.msra.mxu0 %v4081_v62  ;;  %2043 = vmatpush1.bf16.msra.mxu1 %v4084_v29 }
 0x778   : > { %2003 = vmatprep.subr.bf16.mxu0 %v4087_v12  ;;  %2044 = vmatprep.subr.bf16.mxu1 %v4090_v11 }
 0x77b   : > { %2004 = vmatpush1.bf16.msra.mxu0 %v4093_v10  ;;  %2045 = vmatpush1.bf16.msra.mxu1 %v4096_v15 }
 0x77c   : > { %2005 = vmatprep.subr.bf16.mxu0 %v4099_v25  ;;  %2046 = vmatprep.subr.bf16.mxu1 %v4102_v39 }
 0x77f   : > { %2006 = vmatpush1.bf16.msra.mxu0 %v4105_v24  ;;  %2047 = vmatpush1.bf16.msra.mxu1 %v4108_v37 }
 0x780   : > { %2007 = vmatprep.subr.bf16.mxu0 %v4111_v27  ;;  %2048 = vmatprep.subr.bf16.mxu1 %v4114_v23 }
 0x783   : > { %2008 = vmatpush1.bf16.msra.mxu0 %v4117_v28  ;;  %2049 = vmatpush1.bf16.msra.mxu1 %v4120_v31 }
 0x784   : > { %2009 = vmatprep.subr.bf16.mxu0 %v4123_v21  ;;  %2050 = vmatprep.subr.bf16.mxu1 %v4126_v32 }
 0x787   : > { %2010 = vmatpush1.bf16.msra.mxu0 %v4129_v20  ;;  %2051 = vmatpush1.bf16.msra.mxu1 %v4132_v18 }
 0x788   : > { %2011 = vmatprep.subr.bf16.mxu0 %v4783_v2  ;;  %2052 = vmatprep.subr.bf16.mxu1 %v4784_v8 }
 0x78b   : > { %2012 = vmatpush1.bf16.msra.mxu0 %v4785_v54  ;;  %2053 = vmatpush1.bf16.msra.mxu1 %v4144_v6 }
 0x78c   : > { %2013 = vmatprep.subr.bf16.mxu0 %v4147_v7  ;;  %2054 = vmatprep.subr.bf16.mxu1 %v4150_v30 }
 0x78f   : > { %2014 = vmatpush1.bf16.msra.mxu0 %v4153_v3  ;;  %2055 = vmatpush1.bf16.msra.mxu1 %v4156_v17 }
 0x790   : > { %2112 = vmatprep.subr.bf16.mxu0 %v3952_v40  ;;  %2153 = vmatprep.subr.bf16.mxu1 %v3955_v41  ;;  %v4809_v40 = vld [vmem:[#allocation48_spill] sm:$0xff]  ;;  %v4810_v41 = vld [vmem:[#allocation49_spill] sm:$0xff] }
 0x792   : > { %2032 = vmatmul.mubr.bf16.vlgmr.msra.gmra.mrb[52].mxu0 %v2567_v36  ;;  %2073 = vmatmul.mubr.bf16.vlgmr.msra.gmra.mrb[52].mxu1 %v2567_v36  ;;  %v4834_v36 = vld [vmem:[#allocation45_spill] sm:$0xff] }
 0x793   : > { %2113 = vmatpush1.bf16.msra.mxu0 %v3958_v42  ;;  %2154 = vmatpush1.bf16.msra.mxu1 %v3961_v43  ;;  %v4812_v42 = vld [vmem:[#allocation20_spill] sm:$0xff]  ;;  %v4813_v43 = vld [vmem:[#allocation21_spill] sm:$0xff] }
 0x794   : > { %2114 = vmatprep.subr.bf16.mxu0 %v3964_v4  ;;  %2155 = vmatprep.subr.bf16.mxu1 %v3967_v44  ;;  %v4814_v4 = vld [vmem:[#allocation22_spill] sm:$0xff]  ;;  %v4815_v44 = vld [vmem:[#allocation23_spill] sm:$0xff] }
 0x795   : > { %2144 = vmatprep.mubr.bf16.mxu0 %v4700_v38  ;;  %2185 = vmatprep.mubr.bf16.mxu1 %v4700_v38 }
 0x797   : > { %2115 = vmatpush1.bf16.msra.mxu0 %v3972_v45  ;;  %2156 = vmatpush1.bf16.msra.mxu1 %v4808_v1  ;;  %v4818_v45 = vld [vmem:[#allocation26_spill] sm:$0xff] }
 0x798   : > { %2116 = vmatprep.subr.bf16.mxu0 %v4809_v40  ;;  %2157 = vmatprep.subr.bf16.mxu1 %v4810_v41 }
 0x79b   : > { %2117 = vmatpush1.bf16.msra.mxu0 %v4811_v52  ;;  %2158 = vmatpush1.bf16.msra.mxu1 %v4812_v42 }
 0x79c   : > { %2118 = vmatprep.subr.bf16.mxu0 %v4813_v43  ;;  %2159 = vmatprep.subr.bf16.mxu1 %v4814_v4 }
 0x79f   : > { %2119 = vmatpush1.bf16.msra.mxu0 %v4815_v44  ;;  %2160 = vmatpush1.bf16.msra.mxu1 %v4816_v50 }
 0x7a0   : > { %2120 = vmatprep.subr.bf16.mxu0 %v4817_v35  ;;  %2161 = vmatprep.subr.bf16.mxu1 %v4818_v45 }
 0x7a3   : > { %2121 = vmatpush1.bf16.msra.mxu0 %v4819_v48  ;;  %2162 = vmatpush1.bf16.msra.mxu1 %v4820_v51 }
 0x7a4   : > { %2122 = vmatprep.subr.bf16.mxu0 %v4821_v46  ;;  %2163 = vmatprep.subr.bf16.mxu1 %v4822_v47 }
 0x7a7   : > { %2123 = vmatpush1.bf16.msra.mxu0 %v4823_v55  ;;  %2164 = vmatpush1.bf16.msra.mxu1 %v4824_v33 }
 0x7a8   : > { %2124 = vmatprep.subr.bf16.mxu0 %v4825_v49  ;;  %2165 = vmatprep.subr.bf16.mxu1 %v4826_v16 }
 0x7ab   : > { %2125 = vmatpush1.bf16.msra.mxu0 %v4827_v13  ;;  %2166 = vmatpush1.bf16.msra.mxu1 %v4828_v26 }
 0x7ac   : > { %2126 = vmatprep.subr.bf16.mxu0 %v4829_v61  ;;  %2167 = vmatprep.subr.bf16.mxu1 %v4830_v60 }
 0x7af   : > { %2127 = vmatpush1.bf16.msra.mxu0 %v4831_v53  ;;  %2168 = vmatpush1.bf16.msra.mxu1 %v4832_v56 }
 0x7b0   : > { %2194 = vmatprep.subr.bf16.mxu0 %v4833_v58  ;;  %2235 = vmatprep.subr.bf16.mxu1 %v4834_v36 }
 0x845   : > { %v1951_v1 = vpop.f32.mrb[48].mxu0  ;;  %v1992_v40 = vpop.f32.mrb[48].mxu1 }
 0x846   : > { %v1953_v41 = vpop.f32.mrb[49].mxu0  ;;  %v1994_v52 = vpop.f32.mrb[49].mxu1 }
 0x847   : > { %v1955_v42 = vpop.f32.mrb[50].mxu0  ;;  %v1996_v43 = vpop.f32.mrb[50].mxu1 }
 0x848   : > { %v1956_v4 = vpop.f32.mrb[51].mxu0  ;;  %v1997_v44 = vpop.f32.mrb[51].mxu1  ;;  %v2105_v43 = vstv %s2104_s13 }
 0x849   : > { %vm2106_vm6 = vcmp.eq.s32.totalorder %v2105_v43, 1 }
 0x865   : > { %v2033_v50 = vpop.f32.mrb[52].mxu0  ;;  %v2074_v35 = vpop.f32.mrb[52].mxu1 }
 0x866   : > { %v2034_v45 = vadd.f32 %v2033_v50, %v1951_v1  ;;  %v2075_v48 = vadd.f32 %v2074_v35, %v1992_v40  ;;  %v2035_v51 = vpop.f32.mrb[53].mxu0  ;;  %v2076_v46 = vpop.f32.mrb[53].mxu1 }
 0x867   : > { %v2036_v47 = vadd.f32 %v2035_v51, %v1953_v41  ;;  %v2077_v55 = vadd.f32 %v2076_v46, %v1994_v52  ;;  %v2037_v33 = vpop.f32.mrb[54].mxu0  ;;  %v2078_v49 = vpop.f32.mrb[54].mxu1 }
 0x868   : > { %v2081_v16 = vadd.f32 %v4200_v63, %v2034_v45  ;;  %v2038_v13 = vpop.f32.mrb[55].mxu0  ;;  %v2079_v26 = vpop.f32.mrb[55].mxu1  ;;  %v2083_v53 = vadd.f32 %v4294_v57, %v2075_v48 }
 0x869   : > { %v2082_v61 = vadd.f32 %v4203_v22, %v2036_v47  ;;  %v2084_v60 = vadd.f32 %v4206_v59, %v2077_v55 }
 0x86a   : > { %2846 = vtanh.f32 %v2081_v16 }
 0x86b   : > { %2848 = vtanh.f32 %v2082_v61 }
 0x86c   : > { %2850 = vtanh.f32 %v2084_v60 }
 0x86d   : > { %2852 = vtanh.f32 %v2083_v53 }
 0x874   : > { %v2847_v56 = vpop.eup %2846 }
 0x875   : > { %v2089_v58 = vmul.f32 0.5, %v2847_v56  ;;  %v2849_v36 = vpop.eup %2848 }
 0x876   : > { %v2091_v40 = vmul.f32 0.5, %v2849_v36  ;;  %v2851_v41 = vpop.eup %2850 }
 0x877   : > { %v2090_v1 = vadd.f32 0.5, %v2089_v58  ;;  %v2853_v35 = vpop.eup %2852 }
 0x878   : > { %v2092_v52 = vadd.f32 0.5, %v2091_v40  ;;  %v2093_v45 = vmul.f32 0.5, %v2853_v35 }
 0x879   : > { %v2096_v42 = vmul.f32 %v2851_v41, %v2090_v1 }
 0x87a   : > { %v2095_v4 = vmul.f32 %v2092_v52, %v4299_v5  ;;  %v2094_v48 = vadd.f32 0.5, %v2093_v45 }
 0x87c   : > { %v2097_v44 = vadd.f32 %v2096_v42, %v2095_v4 }
 0x87e   : > { %2854 = vtanh.f32 %v2097_v44  ;;  %v4383_v50 = vsel %vm2106_vm6, %v2097_v44, %v4299_v5 }
 0x888   : > { %v2855_v51 = vpop.eup %2854 }
 0x889   : > { %v2099_v46 = vmul.f32 %v2855_v51, %v2094_v48 }
 0x88b   : > { %2568 = vst [vmem:[%s3486_s29 + $0x30] sm:$0xff] %v2099_v46  ;;  %v4387_v47 = vsel %vm2106_vm6, %v2099_v46, %v4303_v0 }
 0x88c   : > { %v2111_v55 = vpack.c.bf16 %v4387_v47, %v4387_v47 }
 0x88e   : > { %2145 = vmatmul.mubr.bf16.vlgmr.msra.gmra.mrb[56].mxu0 %v2111_v55  ;;  %2186 = vmatmul.mubr.bf16.vlgmr.msra.gmra.mrb[56].mxu1 %v2111_v55 }
 0x88f   : > { %2195 = vmatpush1.bf16.msra.mxu0 %v4067_v19  ;;  %2236 = vmatpush1.bf16.msra.mxu1 %v4070_v9 }
 0x890   : > { %2196 = vmatprep.subr.bf16.mxu0 %v4073_v34  ;;  %2237 = vmatprep.subr.bf16.mxu1 %v4076_v14 }
 0x891   : > { %2226 = vmatprep.mubr.bf16.mxu0 %v4700_v38  ;;  %2267 = vmatprep.mubr.bf16.mxu1 %v4700_v38  ;;  %v2569_v38 = vld [vmem:[%s3471_s11 + $0x1c] sm:$0xf]  ;;  %s2297_s11 = sadd.s32 7, %s3737_s30  ;;  %s3076_s30 = scalar_lea.vmem %s2335_s10, 128 }
 0x892   : > { %p2298_p5 = scmp.lt.s32.totalorder %s2297_s11, 20  ;;  %p3077_p11 = scmp.ne.s32.totalorder %s2335_s10, %s3076_s30 }
 0x893   : > { %2197 = vmatpush1.bf16.msra.mxu0 %v4081_v62  ;;  %2238 = vmatpush1.bf16.msra.mxu1 %v4084_v29  ;;  %p3084_p6 = scmp.lt.s32.totalorder %s3076_s30, %s3076_s30 }
 0x894   : > { %2198 = vmatprep.subr.bf16.mxu0 %v4087_v12  ;;  %2239 = vmatprep.subr.bf16.mxu1 %v4090_v11  ;;  %s2299_s14 = scalar_select %p2298_p5, 1, 0 }
 0x895   : > { %p3078_p12 = pnand %p3077_p11, %p4835_p8  ;;  %p3085_p9 = por %p3084_p6, %p3083_p4 }
 0x896   : > { %v2300_v5 = vstv %s2299_s14 }
 0x897   : > { %2199 = vmatpush1.bf16.msra.mxu0 %v4093_v10  ;;  %2240 = vmatpush1.bf16.msra.mxu1 %v4096_v15  ;;  %vm2301_vm7 = vcmp.eq.s32.totalorder %v2300_v5, 1  ;;  %p3079_p2 = pneg %p3078_p12 }
 0x898   : > { %2200 = vmatprep.subr.bf16.mxu0 %v4099_v25  ;;  %2241 = vmatprep.subr.bf16.mxu1 %v4102_v39 }
 0x899   : > { %p3086_p3 = pnand %p3085_p9, %p3079_p2 }
 0x89b   : > { %2201 = vmatpush1.bf16.msra.mxu0 %v4105_v24  ;;  %2242 = vmatpush1.bf16.msra.mxu1 %v4108_v37 }
 0x89c   : > { %2202 = vmatprep.subr.bf16.mxu0 %v4111_v27  ;;  %2243 = vmatprep.subr.bf16.mxu1 %v4114_v23 }
 0x89f   : > { %2203 = vmatpush1.bf16.msra.mxu0 %v4117_v28  ;;  %2244 = vmatpush1.bf16.msra.mxu1 %v4120_v31 }
 0x8a0   : > { %2204 = vmatprep.subr.bf16.mxu0 %v4123_v21  ;;  %2245 = vmatprep.subr.bf16.mxu1 %v4126_v32 }
 0x8a3   : > { %2205 = vmatpush1.bf16.msra.mxu0 %v4129_v20  ;;  %2246 = vmatpush1.bf16.msra.mxu1 %v4132_v18 }
 0x8a4   : > { %2206 = vmatprep.subr.bf16.mxu0 %v4783_v2  ;;  %2247 = vmatprep.subr.bf16.mxu1 %v4784_v8 }
 0x8a7   : > { %2207 = vmatpush1.bf16.msra.mxu0 %v4785_v54  ;;  %2248 = vmatpush1.bf16.msra.mxu1 %v4144_v6 }
 0x8a8   : > { %2208 = vmatprep.subr.bf16.mxu0 %v4147_v7  ;;  %2249 = vmatprep.subr.bf16.mxu1 %v4150_v30 }
 0x8ab   : > { %2209 = vmatpush1.bf16.msra.mxu0 %v4153_v3  ;;  %2250 = vmatpush1.bf16.msra.mxu1 %v4156_v17 }
 0x8ae   : > { %2227 = vmatmul.mubr.bf16.vlgmr.msra.gmra.mrb[60].mxu0 %v2569_v38  ;;  %2268 = vmatmul.mubr.bf16.vlgmr.msra.gmra.mrb[60].mxu1 %v2569_v38 }
 0x961   : > { %v2146_v19 = vpop.f32.mrb[56].mxu0  ;;  %v2187_v9 = vpop.f32.mrb[56].mxu1 }
 0x962   : > { %v2148_v34 = vpop.f32.mrb[57].mxu0  ;;  %v2189_v14 = vpop.f32.mrb[57].mxu1 }
 0x963   : > { %v2150_v62 = vpop.f32.mrb[58].mxu0  ;;  %v2191_v29 = vpop.f32.mrb[58].mxu1 }
 0x964   : > { %v2151_v12 = vpop.f32.mrb[59].mxu0  ;;  %v2192_v11 = vpop.f32.mrb[59].mxu1 }
 0x981   : > { %v2228_v10 = vpop.f32.mrb[60].mxu0  ;;  %v2269_v15 = vpop.f32.mrb[60].mxu1 }
 0x982   : > { %v2229_v25 = vadd.f32 %v2228_v10, %v2146_v19  ;;  %v2270_v39 = vadd.f32 %v2269_v15, %v2187_v9  ;;  %v2230_v24 = vpop.f32.mrb[61].mxu0  ;;  %v2271_v37 = vpop.f32.mrb[61].mxu1 }
 0x983   : > { %v2231_v27 = vadd.f32 %v2230_v24, %v2148_v34  ;;  %v2272_v23 = vadd.f32 %v2271_v37, %v2189_v14  ;;  %v2232_v28 = vpop.f32.mrb[62].mxu0  ;;  %v2273_v31 = vpop.f32.mrb[62].mxu1 }
 0x984   : > { %v2276_v21 = vadd.f32 %v4200_v63, %v2229_v25  ;;  %v2233_v32 = vpop.f32.mrb[63].mxu0  ;;  %v2274_v20 = vpop.f32.mrb[63].mxu1  ;;  %v2278_v17 = vadd.f32 %v4294_v57, %v2270_v39 }
 0x985   : > { %v2277_v18 = vadd.f32 %v4203_v22, %v2231_v27  ;;  %v2279_v3 = vadd.f32 %v4206_v59, %v2272_v23 }
 0x986   : > { %2856 = vtanh.f32 %v2276_v21 }
 0x987   : > { %2858 = vtanh.f32 %v2277_v18 }
 0x988   : > { %2860 = vtanh.f32 %v2279_v3 }
 0x989   : > { %2862 = vtanh.f32 %v2278_v17 }
 0x990   : > { %v2857_v6 = vpop.eup %2856 }
 0x991   : > { %v2284_v7 = vmul.f32 0.5, %v2857_v6  ;;  %v2859_v30 = vpop.eup %2858 }
 0x992   : > { %v2286_v63 = vmul.f32 0.5, %v2859_v30  ;;  %v2861_v8 = vpop.eup %2860 }
 0x993   : > { %v2285_v2 = vadd.f32 0.5, %v2284_v7  ;;  %v2863_v33 = vpop.eup %2862 }
 0x994   : > { %v2287_v54 = vadd.f32 0.5, %v2286_v63 }
 0x995   : > { %v2291_v22 = vmul.f32 %v2861_v8, %v2285_v2 }
 0x996   : > { %v2290_v59 = vmul.f32 %v2287_v54, %v4383_v50 }
 0x998   : > { %v2292_v0 = vadd.f32 %v2291_v22, %v2290_v59 }
 0x99a   : > { %2864 = vtanh.f32 %v2292_v0  ;;  %v2302_v57 = vsel %vm2301_vm7, %v2292_v0, %v4383_v50 }
 0x99b   : > { %2304 = vst [vmem:[#allocation12] sm:$0xff] %v2302_v57 }
 0x99c   : > { %3089 = shalt.err (!%p3086_p3)
}
 0x99d   : > { %s3090_s19 = scalar_lea.hbm %s4538_s6, 128  ;;  %p4836_p10 = pmov %p4835_p8 }
 0x99e   : > { %p3091_p7 = scmp.ne.s32.totalorder %s4538_s6, %s3090_s19  ;;  %p3096_p5 = scmp.lt.u32.totalorder %s3090_s19, %s4538_s6 }
 0x9a0   : > { %p3092_p13 = pnand %p3091_p7, %p4836_p10 }
 0x9a2   : > { %p3093_p0 = pneg %p3092_p13 }
 0x9a4   : > { %p3098_p11 = pnand %p3096_p5, %p3093_p0 }
 0x9a6   : > { %3101 = shalt.err (!%p3098_p11)
}
 0x9a7   : > { %2602 = dma.vmem_to_hbm [thread:$0]  (%p4835_p8), %s2335_s10, 128, %s4538_s6, [#allocation13]   ;;  %v2288_v49 = vmul.f32 0.5, %v2863_v33  ;;  %v2865_v13 = vpop.eup %2864 }
 0x9a8   : > { %s2581_s20 = sshll.u32 %s3284_s28, 10  ;;  %s2320_s30 = sshll.u32 %s3486_s29, 4  ;;  %s4457_s30 = int_to_ptr.vmem [resolvable:$true] %s2320_s30 }
 0x9a9   : > { %v2289_v16 = vadd.f32 0.5, %v2288_v49  ;;  %s3219_s17 = smov [#allocation14]   ;;  %s4455_s16 = scalar_lea.hbm %s4537_s5, %s2581_s20 }
 0x9aa   : > { %s2345_s23 = sshll.u32 %s3219_s17, 4  ;;  %s2307_s10 = scalar_lea.sflag [#allocation4], %s3467_s21  ;;  %s4459_s23 = int_to_ptr.vmem [resolvable:$true] %s2345_s23 }
 0x9ab   : > { %v2294_v26 = vmul.f32 %v2865_v13, %v2289_v16  ;;  %s3102_s15 = scalar_lea.vmem %s4457_s30, 1024  ;;  %s3220_s13 = smov [#allocation11]  }
 0x9ac   : > { %p3103_p12 = scmp.ne.s32.totalorder %s4457_s30, %s3102_s15  ;;  %s3106_s11 = sshll.u32 %s3220_s13, 4  ;;  %s3107_s11 = int_to_ptr.vmem [resolvable:$false] %s3106_s11 }
 0x9ad   : > { %2570 = vst [vmem:[%s3486_s29 + $0x38] sm:$0xff] %v2294_v26  ;;  %v2303_v61 = vsel %vm2301_vm7, %v2294_v26, %v4387_v47  ;;  %s3108_s14 = scalar_lea.vmem %s3107_s11, 2048  ;;  %p3109_p6 = scmp.lt.s32.totalorder %s4457_s30, %s3107_s11 }
 0x9ae   : > { %p3104_p2 = pnand %p3103_p12, %p3415_p1  ;;  %p3110_p9 = scmp.lt.s32.totalorder %s3108_s14, %s3102_s15 }
 0x9b0   : > { %p3105_p4 = pneg %p3104_p2  ;;  %p3111_p3 = por %p3110_p9, %p3109_p6 }
 0x9b2   : > { %p3112_p7 = pnand %p3111_p3, %p3105_p4 }
 0x9b4   : > { %3115 = shalt.err (!%p3112_p7)
}
 0x9b5   : > { %s3116_s29 = scalar_lea.hbm %s4455_s16, 1024  ;;  %s3120_s19 = scalar_lea.hbm %s4537_s5, 3072 }
 0x9b6   : > { %p3117_p10 = scmp.ne.s32.totalorder %s4455_s16, %s3116_s29  ;;  %p3121_p5 = scmp.lt.u32.totalorder %s4455_s16, %s4537_s5 }
 0x9b7   : > { %p3122_p11 = scmp.lt.u32.totalorder %s3120_s19, %s3116_s29  ;;  %p3124_p12 = scmp.lt.u32.totalorder %s3116_s29, %s4455_s16 }
 0x9b8   : > { %p3118_p13 = pnand %p3117_p10, %p3415_p1 }
 0x9b9   : > { %p3123_p8 = por %p3122_p11, %p3121_p5 }
 0x9ba   : > { %p3119_p0 = pneg %p3118_p13 }
 0x9bb   : > { %p3125_p2 = por %p3124_p12, %p3123_p8 }
 0x9bd   : > { %p3126_p4 = pnand %p3125_p2, %p3119_p0 }
 0x9bf   : > { %3129 = shalt.err (!%p3126_p4)
}
 0x9c0   : > { %s3221_s15 = smov 128   ;;  %s3222_s11 = smov 8   ;;  %2305 = vst [vmem:[#allocation14] sm:$0xff] %v2303_v61 }
 0x9c1   : > { %2600 = dma.vmem_to_hbm [thread:$0]  (%p3415_p1), %s4457_s30, 1024, %s4455_s16, %s2307_s10, %s3221_s15, %s3221_s15, %s3222_s11  }
 0x9c2   : > { %s3130_s14 = scalar_lea.vmem %s4459_s23, 128  ;;  %p4837_p9 = scmp.eq.s32.totalorder %s3284_s28, 2 }
 0x9c3   : > { %p3131_p6 = scmp.ne.s32.totalorder %s4459_s23, %s3130_s14  ;;  %p3137_p10 = scmp.lt.s32.totalorder %s4459_s23, %s4459_s23 }
 0x9c4   : > { %p3138_p13 = scmp.lt.s32.totalorder %s3130_s14, %s3130_s14 }
 0x9c5   : > { %p3132_p3 = pnand %p3131_p6, %p4837_p9 }
 0x9c6   : > { %p3139_p0 = por %p3138_p13, %p3137_p10 }
 0x9c7   : > { %p3133_p7 = pneg %p3132_p3 }
 0x9c9   : > { %p3140_p5 = pnand %p3139_p0, %p3133_p7 }
 0x9cb   : > { %3143 = shalt.err (!%p3140_p5)
}
 0x9cc   : > { %s3144_s17 = scalar_lea.hbm %s4539_s7, 128  ;;  %p4838_p11 = pmov %p4837_p9 }
 0x9cd   : > { %p3145_p1 = scmp.ne.s32.totalorder %s4539_s7, %s3144_s17  ;;  %p3150_p2 = scmp.lt.u32.totalorder %s3144_s17, %s4539_s7 }
 0x9cf   : > { %p3146_p8 = pnand %p3145_p1, %p4838_p11 }
 0x9d1   : > { %p3147_p12 = pneg %p3146_p8 }
 0x9d3   : > { %p3152_p4 = pnand %p3150_p2, %p3147_p12 }
 0x9d5   : > { %3155 = shalt.err (!%p3152_p4)
}
 0x9d6   : > { %p4839_p6 = pmov %p4837_p9 }
 0x9d8   : > { %2604 = dma.vmem_to_hbm [thread:$0]  (%p4839_p6), %s4459_s23, 128, %s4539_s7, [#allocation13]  }
 0x9d9   : > { %p4840_p9 = pmov %p4839_p6 }
 0x9da   : > { %p4841_p3 = pmov %p4839_p6 }
 0x9db   : > { %3185 = dma.done.wait (%p4840_p9), [#allocation13], 256  }
 0x9dc   : > { %3187 = vsyncadd (%p4841_p3), [#allocation13], 4294967040 }
 0x9dd PF: > { %p2644_p7 = scmp.ge.s32.totalorder %s3206_s27, 2  ;;  %s2365_s9 = sand.u32 1, %s3194_s24  }
 0x9de   : > { %p4842_p10 = scmp.ne.s32.totalorder %s4656_s8, 0  ;;  %s2366_s13 = scalar_lea.sflag [#allocation4], %s2365_s9 }
 0x9e0   : > { %p2628_p13 = pnand %p2644_p7, %p4842_p10 }
 0x9e2   : > { %3189 = dma.done.wait (!%p2628_p13), %s2366_s13, 1024  }
 0x9e3   : > { %3191 = vsyncadd (!%p2628_p13), %s2366_s13, 4294966272  ;;  %p24_p0 = scmp.ge.s32.totalorder %s3405_s22, 5   ;;  %s4843_s24 = smov %s3198_s25 }
 0x9e4   : > { %s4844_s25 = smov %s3202_s26  ;;  %s4845_s26 = smov %s3421_s18 }
 0x9e5   : > { %s4846_s27 = smov %s3405_s22  ;;  %26 = sbr.rel (!%p24_p0) target bundleno = 8 (0x8), region = 135 }
 0x9ec   :  { %2371 = vsyncpa [#allocation3], 1 }
 0x9ed   :  { %2373 = vsyncpa [#allocation3 + $0x1], 1 }
 0x9ee   :  { %2374 = vsyncpa [#allocation6], 1 }
 0x9ef   :  { %2375 = vsyncpa [#allocation9], 1 }
 0x9f0   :  { %2376 = vsyncpa [#allocation4], 1 }
 0x9f1   :  { %2378 = vsyncpa [#allocation4 + $0x1], 1 }
 0x9f2   :  { %2379 = vsyncpa [#allocation13], 1 }

</bundles_post_ra>
